<compile_context>
chip_gen: v7x
topology: tpu7x:2x2x1
jax: 0.10.0
libtpu: 0.0.40
codegen_flags: <defaults>
</compile_context>

<pallas_src>
import functools

import jax
import jax.numpy as jnp
from jax.experimental import pallas as pl
from jax.experimental.pallas import tpu as pltpu


# ---------------------------------------------------------------------------
# Pass 1: conv (im2col + single matmul) + per-tile centered BN statistics.
# ---------------------------------------------------------------------------
def _conv_stats_kernel(x_ref, w_ref, b_ref, y_ref, stats_ref, *,
                       ksize, stride, ho, wo):
    cin = x_ref.shape[1]
    x = x_ref[0].astype(jnp.float32)                      # (Cin, Hp, Wp)

    # im2col patch matrix (K*K*Cin, Ho*Wo); rows are tap-major, channel-minor,
    # matching the (Cout, K*K*Cin) weight built in the wrapper.
    taps = []
    for i in range(ksize):
        for j in range(ksize):
            win = x[:, i:i + stride * ho:stride, j:j + stride * wo:stride]
            taps.append(win.reshape(cin, ho * wo))
    patches = jnp.concatenate(taps, axis=0)               # (K*K*Cin, Ho*Wo)

    # One deep MXU matmul, lane-dense accumulator: (Cout, Ho*Wo).
    y = jnp.dot(w_ref[...].astype(jnp.float32), patches,
                preferred_element_type=jnp.float32)
    y = y + b_ref[...].astype(jnp.float32)                # (Cout, 1) broadcast

    y_ref[0] = y.astype(y_ref.dtype)

    # Centered per-tile statistics (numerically safe); combined across the
    # batch grid in the wrapper (Chan's parallel variance formula).
    mean_t = jnp.mean(y, axis=1, keepdims=True)                       # (Cout,1)
    m2_t = jnp.sum(jnp.square(y - mean_t), axis=1, keepdims=True)     # (Cout,1)
    stats_ref[0, :, 0:1] = mean_t
    stats_ref[0, :, 1:2] = m2_t


# ---------------------------------------------------------------------------
# Pass 2: pre-fused BN (y*scale + shift) + ReLU, full lane-width elementwise.
# ---------------------------------------------------------------------------
def _bn_relu_kernel(y_ref, scale_ref, shift_ref, o_ref):
    y = y_ref[0].astype(jnp.float32)                      # (Cout, Ho*Wo)
    out = y * scale_ref[...] + shift_ref[...]             # two full-width passes
    o_ref[0] = jnp.maximum(out, 0.0).astype(o_ref.dtype)


# ---------------------------------------------------------------------------
# Wrapper
# ---------------------------------------------------------------------------
def batch_norm_deconv2d(x_nchw, w_hwio, bias, gamma, beta, *,
                        kernel_size, stride, upsample=None, eps=1e-3):
    """Forward pass matching BatchNormDeconv2d (training-mode BN)."""
    n, cin, h, w = x_nchw.shape
    cout = w_hwio.shape[-1]

    x = x_nchw
    if upsample:
        # Nearest-neighbor upsample via reshape + broadcast (no gather).
        x = jnp.broadcast_to(x[:, :, :, None, :, None],
                             (n, cin, h, upsample, w, upsample))
        x = x.reshape(n, cin, h * upsample, w * upsample)
    pad = kernel_size // 2
    # TODO(synk): fuse the nearest upsample + reflection pad into the kernel's
    # load path (reflected index arithmetic) to avoid one extra HBM round trip.
    x = jnp.pad(x, ((0, 0), (0, 0), (pad, pad), (pad, pad)), mode="reflect")

    _, _, hp, wp = x.shape
    ho = (hp - kernel_size) // stride + 1
    wo = (wp - kernel_size) // stride + 1
    hw = ho * wo
    kkc = kernel_size * kernel_size * cin

    # Weight reshaped once to (Cout, K*K*Cin); rows match the im2col tap order.
    w2 = jnp.transpose(w_hwio.astype(jnp.float32).reshape(kkc, cout))
    b2 = bias.astype(jnp.float32).reshape(cout, 1)

    cparams = pltpu.CompilerParams(
        dimension_semantics=("parallel",),      # batch tiles split across TCs
        vmem_limit_bytes=32 * 1024 * 1024)      # explicit budget (fits v5e..v7x)

    conv_kern = functools.partial(_conv_stats_kernel, ksize=kernel_size,
                                  stride=stride, ho=ho, wo=wo)

    y_conv, stats = pl.pallas_call(
        conv_kern,
        grid=(n,),
        out_shape=(jax.ShapeDtypeStruct((n, cout, hw), jnp.float32),
                   jax.ShapeDtypeStruct((n, cout, 2), jnp.float32)),
        in_specs=[
            pl.BlockSpec((1, cin, hp, wp), lambda i: (i, 0, 0, 0)),
            pl.BlockSpec((cout, kkc), lambda i: (0, 0)),
            pl.BlockSpec((cout, 1), lambda i: (0, 0)),
        ],
        out_specs=(
            pl.BlockSpec((1, cout, hw), lambda i: (i, 0, 0)),
            pl.BlockSpec((1, cout, 2), lambda i: (i, 0, 0)),
        ),
        compiler_params=cparams,
    )(x, w2, b2)

    # Combine per-tile centered stats into global training-mode BN statistics
    # (Chan's parallel mean/variance; counts per tile are equal: Ho*Wo).
    mean_t = stats[:, :, 0]                               # (N, Cout)
    m2_t = stats[:, :, 1]                                 # (N, Cout)
    cnt = jnp.float32(hw)
    total = jnp.float32(n * hw)
    mean = jnp.mean(mean_t, axis=0)                       # (Cout,)
    m2 = jnp.sum(m2_t, axis=0) + cnt * jnp.sum(jnp.square(mean_t - mean), axis=0)
    var = m2 / total                                      # biased (training mode)
    inv = jax.lax.rsqrt(var + eps)
    scale = (gamma.astype(jnp.float32) * inv).reshape(cout, 1)
    shift = (beta.astype(jnp.float32)
             - mean * gamma.astype(jnp.float32) * inv).reshape(cout, 1)

    out = pl.pallas_call(
        _bn_relu_kernel,
        grid=(n,),
        out_shape=jax.ShapeDtypeStruct((n, cout, hw), x_nchw.dtype),
        in_specs=[
            pl.BlockSpec((1, cout, hw), lambda i: (i, 0, 0)),
            pl.BlockSpec((cout, 1), lambda i: (0, 0)),
            pl.BlockSpec((cout, 1), lambda i: (0, 0)),
        ],
        out_specs=pl.BlockSpec((1, cout, hw), lambda i: (i, 0, 0)),
        compiler_params=cparams,
    )(y_conv, scale, shift)

    # (N, Cout, Ho*Wo) -> NCHW is a free reshape; no transpose needed.
    return out.reshape(n, cout, ho, wo)


# ---------------------------------------------------------------------------
# Pure-JAX reference mirroring the PyTorch module (training-mode BN).
# ---------------------------------------------------------------------------
def _reference(x_nchw, w_hwio, bias, gamma, beta, *,
               kernel_size, stride, upsample, eps):
    x = jnp.transpose(x_nchw, (0, 2, 3, 1))
    if upsample:
        x = jnp.repeat(jnp.repeat(x, upsample, axis=1), upsample, axis=2)
    pad = kernel_size // 2
    x = jnp.pad(x, ((0, 0), (pad, pad), (pad, pad), (0, 0)), mode="reflect")
    y = jax.lax.conv_general_dilated(
        x, w_hwio, window_strides=(stride, stride), padding="VALID",
        dimension_numbers=("NHWC", "HWIO", "NHWC"))
    y = y + bias
    mean = jnp.mean(y, axis=(0, 1, 2), keepdims=True)
    var = jnp.mean(jnp.square(y - mean), axis=(0, 1, 2), keepdims=True)
    y = (y - mean) * jax.lax.rsqrt(var + eps) * gamma + beta
    y = jnp.maximum(y, 0.0)
    return jnp.transpose(y, (0, 3, 1, 2))


if __name__ == "__main__":
    # Small, module-consistent shapes: N=2, Cin=4, Cout=8, H=W=16, k=3, stride=1, up=2.
    N, CIN, COUT, H, W = 2, 4, 8, 16, 16
    KSIZE, STRIDE, UPSAMPLE = 3, 1, 2
    EPS = 1e-3

    key = jax.random.PRNGKey(0)
    kx, kw, kb = jax.random.split(key, 3)

    x = jax.random.normal(kx, (N, CIN, H, W), jnp.float32)            # NCHW like PyTorch
    w_hwio = jax.random.normal(kw, (KSIZE, KSIZE, CIN, COUT), jnp.float32) * 0.1
    bias = jax.random.normal(kb, (COUT,), jnp.float32) * 0.1
    gamma = jnp.ones((COUT,), jnp.float32)                             # BN default weight
    beta = jnp.zeros((COUT,), jnp.float32)                             # BN default bias

    out = batch_norm_deconv2d(x, w_hwio, bias, gamma, beta,
                              kernel_size=KSIZE, stride=STRIDE,
                              upsample=UPSAMPLE, eps=EPS)
    out = jax.block_until_ready(out)

    ref = _reference(x, w_hwio, bias, gamma, beta,
                     kernel_size=KSIZE, stride=STRIDE,
                     upsample=UPSAMPLE, eps=EPS)
    assert out.shape == (N, COUT, H * UPSAMPLE, W * UPSAMPLE), out.shape
    assert jnp.allclose(out, ref, atol=2e-4, rtol=2e-4), "mismatch vs reference"

    print("KERNEL_OK")
</pallas_src>

<mosaic_0001>
module attributes {stable_mosaic.version = 11 : i64} {
  func.func @_conv_stats_kernel(%arg0: i32, %arg1: memref<1x4x34x34xf32, #tpu.memory_space<vmem>>, %arg2: memref<8x36xf32, #tpu.memory_space<vmem>>, %arg3: memref<8x1xf32, #tpu.memory_space<vmem>>, %arg4: memref<1x8x1024xf32, #tpu.memory_space<vmem>>, %arg5: memref<1x8x2xf32, #tpu.memory_space<vmem>>) attributes {dimension_semantics = [#tpu.dimension_semantics<parallel>], iteration_bounds = array<i64: 2>, scalar_prefetch = 0 : i64, scratch_operands = 0 : i64, tpu.core_type = #tpu.core_type<tc>, window_params = [{transform_indices = @transform_0, window_bounds = array<i64: 1, 4, 34, 34>}, {pipeline_mode = #tpu.pipeline_mode<synchronous>, transform_indices = @transform_1, window_bounds = array<i64: 8, 36>}, {pipeline_mode = #tpu.pipeline_mode<synchronous>, transform_indices = @transform_2, window_bounds = array<i64: 8, 1>}, {transform_indices = @transform_3, window_bounds = array<i64: 1, 8, 1024>}, {transform_indices = @transform_4, window_bounds = array<i64: 1, 8, 2>}]} {
    %c0 = arith.constant 0 : index
    %c0_0 = arith.constant 0 : index
    %c0_1 = arith.constant 0 : index
    %c0_2 = arith.constant 0 : index
    %0 = vector.load %arg1[%c0, %c0_0, %c0_1, %c0_2] : memref<1x4x34x34xf32, #tpu.memory_space<vmem>>, vector<1x4x34x34xf32>
    %1 = vector.shape_cast %0 : vector<1x4x34x34xf32> to vector<4x34x34xf32>
    %2 = vector.extract_strided_slice %1 {offsets = [0, 0, 0], sizes = [4, 32, 32], strides = [1, 1, 1]} : vector<4x34x34xf32> to vector<4x32x32xf32>
    %3 = vector.shape_cast %2 : vector<4x32x32xf32> to vector<4x1024xf32>
    %4 = vector.extract_strided_slice %1 {offsets = [0, 0, 1], sizes = [4, 32, 32], strides = [1, 1, 1]} : vector<4x34x34xf32> to vector<4x32x32xf32>
    %5 = vector.shape_cast %4 : vector<4x32x32xf32> to vector<4x1024xf32>
    %6 = vector.extract_strided_slice %1 {offsets = [0, 0, 2], sizes = [4, 32, 32], strides = [1, 1, 1]} : vector<4x34x34xf32> to vector<4x32x32xf32>
    %7 = vector.shape_cast %6 : vector<4x32x32xf32> to vector<4x1024xf32>
    %8 = vector.extract_strided_slice %1 {offsets = [0, 1, 0], sizes = [4, 32, 32], strides = [1, 1, 1]} : vector<4x34x34xf32> to vector<4x32x32xf32>
    %9 = vector.shape_cast %8 : vector<4x32x32xf32> to vector<4x1024xf32>
    %10 = vector.extract_strided_slice %1 {offsets = [0, 1, 1], sizes = [4, 32, 32], strides = [1, 1, 1]} : vector<4x34x34xf32> to vector<4x32x32xf32>
    %11 = vector.shape_cast %10 : vector<4x32x32xf32> to vector<4x1024xf32>
    %12 = vector.extract_strided_slice %1 {offsets = [0, 1, 2], sizes = [4, 32, 32], strides = [1, 1, 1]} : vector<4x34x34xf32> to vector<4x32x32xf32>
    %13 = vector.shape_cast %12 : vector<4x32x32xf32> to vector<4x1024xf32>
    %14 = vector.extract_strided_slice %1 {offsets = [0, 2, 0], sizes = [4, 32, 32], strides = [1, 1, 1]} : vector<4x34x34xf32> to vector<4x32x32xf32>
    %15 = vector.shape_cast %14 : vector<4x32x32xf32> to vector<4x1024xf32>
    %16 = vector.extract_strided_slice %1 {offsets = [0, 2, 1], sizes = [4, 32, 32], strides = [1, 1, 1]} : vector<4x34x34xf32> to vector<4x32x32xf32>
    %17 = vector.shape_cast %16 : vector<4x32x32xf32> to vector<4x1024xf32>
    %18 = vector.extract_strided_slice %1 {offsets = [0, 2, 2], sizes = [4, 32, 32], strides = [1, 1, 1]} : vector<4x34x34xf32> to vector<4x32x32xf32>
    %19 = vector.shape_cast %18 : vector<4x32x32xf32> to vector<4x1024xf32>
    %20 = tpu.concatenate %3, %5, %7, %9, %11, %13, %15, %17, %19 in 0 : vector<4x1024xf32>, vector<4x1024xf32>, vector<4x1024xf32>, vector<4x1024xf32>, vector<4x1024xf32>, vector<4x1024xf32>, vector<4x1024xf32>, vector<4x1024xf32>, vector<4x1024xf32> -> vector<36x1024xf32>
    %c0_3 = arith.constant 0 : index
    %c0_4 = arith.constant 0 : index
    %21 = vector.load %arg2[%c0_3, %c0_4] : memref<8x36xf32, #tpu.memory_space<vmem>>, vector<8x36xf32>
    %cst = arith.constant dense<0.000000e+00> : vector<8x1024xf32>
    %22 = tpu.matmul %21, %20, %cst {dimension_numbers = #tpu.dot_dimension_numbers<[1], [0], [0], [1], [0, 0, 1, 1], [], []>} : vector<8x36xf32>, vector<36x1024xf32>, vector<8x1024xf32> -> vector<8x1024xf32>
    %c0_5 = arith.constant 0 : index
    %c0_6 = arith.constant 0 : index
    %23 = vector.load %arg3[%c0_5, %c0_6] : memref<8x1xf32, #tpu.memory_space<vmem>>, vector<8x1xf32>
    %24 = vector.broadcast %23 : vector<8x1xf32> to vector<8x1024xf32>
    %25 = arith.addf %22, %24 : vector<8x1024xf32>
    %c0_7 = arith.constant 0 : index
    %c0_8 = arith.constant 0 : index
    %c0_9 = arith.constant 0 : index
    %26 = vector.load %arg4[%c0_7, %c0_8, %c0_9] : memref<1x8x1024xf32, #tpu.memory_space<vmem>>, vector<1x8x1024xf32>
    %27 = vector.shape_cast %26 : vector<1x8x1024xf32> to vector<8x1024xf32>
    %28 = vector.shape_cast %25 : vector<8x1024xf32> to vector<1x8x1024xf32>
    tpu.vector_store %arg4[%c0_7, %c0_8, %c0_9], %28 {strides = array<i32>} : memref<1x8x1024xf32, #tpu.memory_space<vmem>>, vector<1x8x1024xf32>,
    %cst_10 = arith.constant dense<0.000000e+00> : vector<8xf32>
    %29 = vector.multi_reduction <add>, %25, %cst_10 [1] : vector<8x1024xf32> to vector<8xf32>
    %30 = vector.shape_cast %29 : vector<8xf32> to vector<8x1xf32>
    %cst_11 = arith.constant 1.024000e+03 : f32
    %31 = vector.broadcast %cst_11 : f32 to vector<8x1xf32>
    %32 = arith.divf %30, %31 : vector<8x1xf32>
    %33 = vector.broadcast %32 : vector<8x1xf32> to vector<8x1024xf32>
    %34 = arith.subf %25, %33 : vector<8x1024xf32>
    %35 = arith.mulf %34, %34 : vector<8x1024xf32>
    %cst_12 = arith.constant dense<0.000000e+00> : vector<8xf32>
    %36 = vector.multi_reduction <add>, %35, %cst_12 [1] : vector<8x1024xf32> to vector<8xf32>
    %37 = vector.shape_cast %36 : vector<8xf32> to vector<8x1xf32>
    %c0_13 = arith.constant 0 : index
    %c0_14 = arith.constant 0 : index
    %c0_15 = arith.constant 0 : index
    %38 = vector.load %arg5[%c0_13, %c0_14, %c0_15] : memref<1x8x2xf32, #tpu.memory_space<vmem>>, vector<1x8x1xf32>
    %39 = vector.shape_cast %38 : vector<1x8x1xf32> to vector<8x1xf32>
    %40 = vector.shape_cast %32 : vector<8x1xf32> to vector<1x8x1xf32>
    tpu.vector_store %arg5[%c0_13, %c0_14, %c0_15], %40 {strides = array<i32>} : memref<1x8x2xf32, #tpu.memory_space<vmem>>, vector<1x8x1xf32>,
    %c0_16 = arith.constant 0 : index
    %c0_17 = arith.constant 0 : index
    %c1 = arith.constant 1 : index
    %41 = vector.load %arg5[%c0_16, %c0_17, %c1] : memref<1x8x2xf32, #tpu.memory_space<vmem>>, vector<1x8x1xf32>
    %42 = vector.shape_cast %41 : vector<1x8x1xf32> to vector<8x1xf32>
    %43 = vector.shape_cast %37 : vector<8x1xf32> to vector<1x8x1xf32>
    tpu.vector_store %arg5[%c0_16, %c0_17, %c1], %43 {strides = array<i32>} : memref<1x8x2xf32, #tpu.memory_space<vmem>>, vector<1x8x1xf32>,
    return
  }
  func.func @transform_0(%arg0: i32) -> (i32, i32, i32, i32) {
    %c0_i32 = arith.constant 0 : i32
    %c0_i32_0 = arith.constant 0 : i32
    %c0_i32_1 = arith.constant 0 : i32
    %c0_i32_2 = arith.constant 0 : i32
    return %arg0, %c0_i32, %c0_i32_0, %c0_i32_1 : i32, i32, i32, i32
  }
  func.func @transform_1(%arg0: i32) -> (i32, i32) {
    %c0_i32 = arith.constant 0 : i32
    %c0_i32_0 = arith.constant 0 : i32
    %c0_i32_1 = arith.constant 0 : i32
    return %c0_i32, %c0_i32_0 : i32, i32
  }
  func.func @transform_2(%arg0: i32) -> (i32, i32) {
    %c0_i32 = arith.constant 0 : i32
    %c0_i32_0 = arith.constant 0 : i32
    %c0_i32_1 = arith.constant 0 : i32
    return %c0_i32, %c0_i32_0 : i32, i32
  }
  func.func @transform_3(%arg0: i32) -> (i32, i32, i32) {
    %c0_i32 = arith.constant 0 : i32
    %c0_i32_0 = arith.constant 0 : i32
    %c0_i32_1 = arith.constant 0 : i32
    return %arg0, %c0_i32, %c0_i32_0 : i32, i32, i32
  }
  func.func @transform_4(%arg0: i32) -> (i32, i32, i32) {
    %c0_i32 = arith.constant 0 : i32
    %c0_i32_0 = arith.constant 0 : i32
    %c0_i32_1 = arith.constant 0 : i32
    return %arg0, %c0_i32, %c0_i32_0 : i32, i32, i32
  }
}

</mosaic_0001>

<bundles_post_ra>
// kernel: tpu_custom_call.1
= control target key start
LH: loop header
LB: loop body
LE: loop exit
PB: predicated region body
PF: predicated region fallthrough
CT: control target
= control target key end

     0   :  { %10 = vsyncpa [#allocation3], 0  ;;  %s8714_s0 = inlined_call_operand.vmem [shape: f32[2,4,34,34], index: 0, kind: input, shape index: {}]   ;;  %s8715_s1 = inlined_call_operand.vmem [shape: f32[8,36], index: 1, kind: input, shape index: {}]   ;;  %s8716_s2 = inlined_call_operand.vmem [shape: f32[8,1], index: 2, kind: input, shape index: {}]   ;;  %s8717_s3 = inlined_call_operand.hbm [shape: f32[2,8,1024], index: 3, kind: output, shape index: {0}]   ;;  %s8718_s4 = inlined_call_operand.vmem [shape: f32[2,8,2], index: 4, kind: output, shape index: {1}]  }
   0x1   :  { %12 = vsyncpa [#allocation3 + $0x1], 0  ;;  %s5475_s15 = smov 0   ;;  %s5477_s16 = smov 0  }
   0x2   :  { %s5479_s17 = smov 0   ;;  %s5481_s18 = smov 0  }
   0x3 LB: > { %s5496_s19 = sadd.s32 4294967295, %s5438_s18   ;;  %s4773_s20 = sadd.s32 4294967294, %s5438_s18   ;;  %s5438_s18 = sphi %s5481_s18, %s9213_s18   ;;  %s5434_s17 = sphi %s5479_s17, %s9212_s17   ;;  %s5430_s16 = sphi %s5477_s16, %s9211_s16   ;;  %s5426_s15 = sphi %s5475_s15, %s9210_s15  }
   0x4   : > { %s5500_s21 = sadd.s32 1, %s5438_s18   ;;  %s93_s22 = sadd.s32 1, %s5434_s17 }
   0x5   : > { %s90_s23 = ssub.s32 %s5438_s18, %s5500_s21  ;;  %p103_p0 = scmp.ne.s32.totalorder %s5434_s17, %s5430_s16 }
   0x6   : > { %p91_p1 = scmp.eq.s32.totalorder %s90_s23, 0  ;;  %p104_p2 = scmp.eq.s32.totalorder %s5496_s19, 1 }
   0x7   : > { %p109_p3 = scmp.ne.s32.totalorder %s5430_s16, %s5426_s15  ;;  %p110_p4 = scmp.eq.s32.totalorder %s4773_s20, 1 }
   0x8   : > { %s5511_s24 = scalar_select %p91_p1, %s5434_s17, %s93_s22  }
   0x9   : > { %p5513_p5 = por %p104_p2, %p103_p0  ;;  %p5517_p6 = por %p110_p4, %p109_p3 }
   0xa   : > { %p4776_p7 = scmp.ge.s32.totalorder %s5438_s18, 1  ;;  %p168_p8 = scmp.lt.s32.totalorder %s5438_s18, 3 }
   0xc   : > { %p169_p9 = pnand %p4776_p7, %p168_p8 }
   0xe   : > { %172 = sbr.rel (%p169_p9) target bundleno = 1171 (0x493), region = 32 }
  0x15   : > { %p198_p10 = scmp.lt.s32.totalorder %s5496_s19, 1  ;;  %v232_v0 = vlaneseq  ;;  %v5440_v1 = vmov 1983009808   ;;  %v5441_v3 = vmov 1934713408   ;;  %v8723_v5 = vmov 0.0  }
  0x16   : > { %v230_v2 = vunpack.c.l.s4 %v5440_v1  ;;  %v262_v4 = vunpack.c.l.s4 %v5441_v3  ;;  %4400 = vmatprep.mubr.f32.mxu0 %v8723_v5  ;;  %4471 = vmatprep.mubr.f32.mxu1 %v8723_v5  ;;  %s5443_s6 = smov 64   ;;  %s5444_s7 = smov 96   ;;  %vm1522_vm0 = vcmask 1046528   ;;  %vm2847_vm1 = vcmask 1045504  }
  0x17   : > { %s5527_s27 = scalar_select %p198_p10, %s5496_s19, 1  ;;  %v233_v6 = vshrl.u32 %v232_v0, 7  ;;  %vm595_vm2 = vcmask 261120   ;;  %vm597_vm3 = vcmask 523264   ;;  %vm599_vm4 = vcmask 785408  }
  0x18   : > { %v231_v7 = vunpack.c.0.s8 %v230_v2  ;;  %v263_v8 = vunpack.c.0.s8 %v262_v4  ;;  %s5445_s8 = smov 32   ;;  %s5446_s9 = smov 127   ;;  %vm4268_vm5 = vcmask 1043456   ;;  %vm4308_vm6 = vcmask 293888  }
  0x19   : > { %s4830_s28 = smul.u32 160, %s5527_s27  ;;  %s5447_s10 = smov 126   ;;  %vm4664_vm7 = vcmask 7168  }
  0x1a   : > { %v5535_v9 = vsub.s32 %v231_v7, %v233_v6  ;;  %v5559_v18 = vsub.s32 %v263_v8, %v233_v6  ;;  %s189_s20 = sand.u32 1, %s5430_s16   ;;  %s5449_s12 = smov [#allocation2]  }
  0x1b   : > { %s5533_s5 = scalar_lea.vmem %s8714_s0, %s4830_s28  ;;  %s4777_s22 = sshll.u32 %s189_s20, 6 }
  0x1c   : > { %v5538_v10 = vld [vmem:[%s5533_s5 + $0x10] sm:$0xff]  ;;  %v5541_v11 = vld [vmem:[%s5533_s5 + $0x38] sm:$0xff]  ;;  %v5544_v12 = vld [vmem:[%s5533_s5 + $0x60] sm:$0xff]  ;;  %s8653_s23 = scalar_lea.vmem [#allocation2], %s4777_s22  ;;  %s4779_s28 = sshll.u32 %s5527_s27, 3 }
  0x1d   : > { %v5547_v13 = vld [vmem:[%s5533_s5 + $0x88] sm:$0xff]  ;;  %v363_v14 = vcombine.low %v5538_v10, %v5544_v12  ;;  %v364_v15 = vcombine.high %v5538_v10, %v5544_v12  ;;  %v5554_v16 = vld [vmem:[%s5533_s5] sm:$0xff]  ;;  %v5566_v21 = vld [vmem:[%s5533_s5 + $0x50] sm:$0xff]  ;;  %s4797_s27 = sshll.u32 %s5496_s19, 10  ;;  %s5380_s13 = sshll.u32 %s5449_s12, 4  ;;  %s5381_s13 = int_to_ptr.vmem [resolvable:$false] %s5380_s13 }
  0x1e   : > { %v5557_v17 = vld [vmem:[%s5533_s5 + $0x28] sm:$0xff]  ;;  %v379_v19 = vcombine.low %v5541_v11, %v5547_v13  ;;  %v380_v20 = vcombine.high %v5541_v11, %v5547_v13  ;;  %v5569_v22 = vld [vmem:[%s5533_s5 + $0x78] sm:$0xff]  ;;  %v227_v26 = vcombine.low %v5554_v16, %v5566_v21  ;;  %v228_v27 = vcombine.high %v5554_v16, %v5566_v21  ;;  %v5592_v35 = vld [vmem:[%s5533_s5 + $0x30] sm:$0xff]  ;;  %s5382_s14 = scalar_lea.vmem %s5381_s13, 2048 }
  0x1f   : > { %v5572_v23 = vld [vmem:[%s5533_s5 + $0x8] sm:$0xff]  ;;  %v371_v24 = vrot.slane %v363_v14, %v5535_v9  ;;  %v378_v25 = vrot.slane %v364_v15, %v5535_v9  ;;  %v5581_v28 = vld [vmem:[%s5533_s5 + $0x58] sm:$0xff]  ;;  %v243_v31 = vcombine.low %v5557_v17, %v5569_v22  ;;  %v244_v32 = vcombine.high %v5557_v17, %v5569_v22  ;;  %v5595_v36 = vld [vmem:[%s5533_s5 + $0x80] sm:$0xff] }
  0x20   : > { %v387_v29 = vrot.slane %v379_v19, %v5535_v9  ;;  %v394_v30 = vrot.slane %v380_v20, %v5535_v9  ;;  %v235_v33 = vrot.slane %v227_v26, %v5535_v9  ;;  %v242_v34 = vrot.slane %v228_v27, %v5535_v9  ;;  %v5637_v15 = vld [vmem:[%s5533_s5 + $0x18] sm:$0xff]  ;;  %v5647_v26 = vld [vmem:[%s5533_s5 + $0x40] sm:$0xff]  ;;  %v5650_v27 = vld [vmem:[%s5533_s5 + $0x68] sm:$0xff] }
  0x21   : > { %v295_v37 = vcombine.low %v5572_v23, %v5581_v28  ;;  %v296_v38 = vcombine.high %v5572_v23, %v5581_v28  ;;  %v251_v42 = vrot.slane %v243_v31, %v5535_v9  ;;  %v258_v43 = vrot.slane %v244_v32, %v5535_v9 }
  0x22   : > { %v396_v39 = vcombine.high %v371_v24, %v387_v29  ;;  %v412_v40 = vcombine.high %v378_v25, %v394_v30  ;;  %v395_v41 = vcombine.low %v371_v24, %v387_v29  ;;  %v311_v48 = vcombine.low %v5592_v35, %v5595_v36  ;;  %v5653_v29 = vld [vmem:[%s5533_s5 + $0x90] sm:$0xff] }
  0x23   : > { %v303_v44 = vrot.slane %v295_v37, %v5535_v9  ;;  %v310_v45 = vrot.slane %v296_v38, %v5535_v9  ;;  %v312_v49 = vcombine.high %v5592_v35, %v5595_v36  ;;  %v260_v50 = vcombine.high %v235_v33, %v251_v42 }
  0x24   : > { %v5606_v46 = vrot.slane %v396_v39, %v5559_v18  ;;  %v426_v47 = vrot.slane %v412_v40, %v5559_v18  ;;  %v275_v51 = vcombine.low %v242_v34, %v258_v43  ;;  %v276_v52 = vcombine.high %v242_v34, %v258_v43 }
  0x25   : > { %v259_v53 = vcombine.low %v235_v33, %v251_v42  ;;  %v411_v54 = vcombine.low %v378_v25, %v394_v30  ;;  %v319_v56 = vrot.slane %v311_v48, %v5535_v9  ;;  %v274_v57 = vrot.slane %v260_v50, %v5559_v18 }
  0x26   : > { %v4889_v55 = vpack.i.bf16 %v426_v47, %v5606_v46  ;;  %v290_v58 = vrot.slane %v276_v52, %v5559_v18  ;;  %v326_v59 = vrot.slane %v312_v49, %v5535_v9  ;;  %v5623_v63 = vrot.slane %v275_v51, %v5559_v18 }
  0x27   : > { %v5619_v60 = vrot.slane %v259_v53, %v5559_v18  ;;  %v328_v61 = vcombine.high %v303_v44, %v319_v56  ;;  %v327_v62 = vcombine.low %v303_v44, %v319_v56  ;;  %v5626_v0 = vrot.slane %v395_v41, %v5559_v18 }
  0x28   : > { %4890 = vrot.lane.b32.xlu1 %v4889_v55, %s5443_s6  ;;  %8876 = vst [vmem:[#allocation6_spill] sm:$0xff] %v5623_v63  ;;  %v294_v1 = vcombine.high %v290_v58, %v8723_v5  ;;  %v4879_v2 = vpack.i.bf16 %v290_v58, %v274_v57  ;;  %v292_v3 = vcombine.high %v274_v57, %v8723_v5 }
  0x29   : > { %8875 = vst [vmem:[#allocation5_spill] sm:$0xff] %v5619_v60  ;;  %8877 = vst [vmem:[#allocation7_spill] sm:$0xff] %v5626_v0  ;;  %v344_v4 = vcombine.high %v310_v45, %v326_v59  ;;  %v342_v6 = vrot.slane %v328_v61, %v5559_v18  ;;  %v5632_v7 = vrot.slane %v327_v62, %v5559_v18 }
  0x2a   : > { %v343_v8 = vcombine.low %v310_v45, %v326_v59  ;;  %v291_v14 = vcombine.high %v5619_v60, %v8723_v5  ;;  %4880 = vrot.lane.b32.xlu0 %v4879_v2, %s5443_s6  ;;  %v4899_v20 = vpack.i.bf16 %v294_v1, %v292_v3  ;;  %v293_v24 = vcombine.high %v5623_v63, %v8723_v5 }
  0x2b   : > { %8878 = vst [vmem:[#allocation8_spill] sm:$0xff] %v5632_v7  ;;  %v358_v19 = vrot.slane %v344_v4, %v5559_v18  ;;  %v5644_v25 = vrot.slane %v411_v54, %v5559_v18  ;;  %v359_v31 = vcombine.high %v5632_v7, %v8723_v5  ;;  %v360_v33 = vcombine.high %v342_v6, %v8723_v5 }
  0x2c   : > { %v5656_v30 = vrot.slane %v343_v8, %v5559_v18  ;;  %4900 = vrot.lane.b32.xlu1 %v4899_v20, %s5444_s7  ;;  %v431_v38 = vcombine.low %v5637_v15, %v5650_v27  ;;  %v432_v39 = vcombine.high %v5637_v15, %v5650_v27  ;;  %v447_v40 = vcombine.low %v5647_v26, %v5653_v29 }
  0x2d   : > { %8879 = vst [vmem:[#allocation9_spill] sm:$0xff] %v5644_v25  ;;  %v4884_v32 = vpack.i.bf16 %v358_v19, %v342_v6  ;;  %v362_v34 = vcombine.high %v358_v19, %v8723_v5  ;;  %v4894_v41 = vpack.i.bf16 %v293_v24, %v291_v14  ;;  %v427_v42 = vcombine.high %v5626_v0, %v8723_v5 }
  0x2e   : > { %8880 = vst [vmem:[#allocation10_spill] sm:$0xff] %v5656_v30  ;;  %v361_v37 = vcombine.high %v5656_v30, %v8723_v5  ;;  %v429_v43 = vcombine.high %v5644_v25, %v8723_v5  ;;  %v448_v44 = vcombine.high %v5647_v26, %v5653_v29  ;;  %v439_v48 = vrot.slane %v431_v38, %v5535_v9 }
  0x2f   : > { %4885 = vrot.lane.b32.xlu0 %v4884_v32, %s5443_s6  ;;  %v446_v49 = vrot.slane %v432_v39, %v5535_v9  ;;  %v455_v50 = vrot.slane %v447_v40, %v5535_v9  ;;  %v430_v52 = vcombine.high %v426_v47, %v8723_v5  ;;  %v4909_v53 = vpack.i.bf16 %v362_v34, %v360_v33  ;;  %v5736_v33 = vld [vmem:[%s5533_s5 + $0x48] sm:$0x3]  ;;  %v5739_v34 = vld [vmem:[%s5533_s5 + $0x20] sm:$0x3] }
  0x30   : > { %v4904_v45 = vpack.i.bf16 %v361_v37, %v359_v31  ;;  %v462_v51 = vrot.slane %v448_v44, %v5535_v9  ;;  %v428_v56 = vcombine.high %v5606_v46, %v8723_v5  ;;  %v4914_v57 = vpack.i.bf16 %v429_v43, %v427_v42  ;;  %v5742_v37 = vld [vmem:[%s5533_s5 + $0x98] sm:$0x3] }
  0x31   : > { %v463_v54 = vcombine.low %v439_v48, %v455_v50  ;;  %v464_v55 = vcombine.high %v439_v48, %v455_v50  ;;  %v1535_v20 = vrot.slane %v5541_v11, 1  ;;  %v1526_v24 = vrot.slane %v5538_v10, 1 }
  0x32   : > { %4905 = vrot.lane.b32.xlu1 %v4904_v45, %s5445_s8  ;;  %v479_v58 = vcombine.low %v446_v49, %v462_v51  ;;  %v480_v59 = vcombine.high %v446_v49, %v462_v51  ;;  %v4919_v3 = vpack.i.bf16 %v430_v52, %v428_v56  ;;  %v1553_v31 = vrot.slane %v5547_v13, 1  ;;  %v5756_v45 = vld [vmem:[%s5533_s5 + $0x70] sm:$0x3]  ;;  %s8667_s5 = scalar_lea.vmem %s8718_s4, %s4779_s28 }
  0x33   : > { %4895 = vrot.lane.b32.xlu0 %v4894_v41, %s5445_s8  ;;  %v5688_v61 = vrot.slane %v463_v54, %v5559_v18  ;;  %v478_v62 = vrot.slane %v464_v55, %v5559_v18  ;;  %v1544_v32 = vrot.slane %v5544_v12, 1  ;;  %v1537_v38 = vrot.slane %v5647_v26, 1 }
  0x34   : > { %v5692_v47 = vrot.slane %v479_v58, %v5559_v18  ;;  %v494_v1 = vrot.slane %v480_v59, %v5559_v18  ;;  %v1528_v39 = vrot.slane %v5637_v15, 1  ;;  %v1555_v40 = vrot.slane %v5653_v29, 1 }
  0x35   : > { %8881 = vst [vmem:[#allocation11_spill] sm:$0xff] %v5688_v61  ;;  %v495_v46 = vcombine.high %v5688_v61, %v8723_v5  ;;  %v496_v4 = vcombine.high %v478_v62, %v8723_v5  ;;  %v1546_v41 = vrot.slane %v5650_v27, 1  ;;  %v1539_v42 = vrot.slane %v5736_v33, 1 }
  0x36   : > { %8882 = vst [vmem:[#allocation12_spill] sm:$0xff] %v5692_v47  ;;  %4910 = vrot.lane.b32.xlu1 %v4909_v53, %s5444_s7  ;;  %v497_v2 = vcombine.high %v5692_v47, %v8723_v5  ;;  %v498_v6 = vcombine.high %v494_v1, %v8723_v5  ;;  %v4924_v19 = vpack.i.bf16 %v494_v1, %v478_v62  ;;  %v1530_v43 = vrot.slane %v5739_v34, 1 }
  0x37   : > { %4915 = vrot.lane.b32.xlu0 %v4914_v57, %s5445_s8  ;;  %v1557_v44 = vrot.slane %v5742_v37, 1  ;;  %v5761_v48 = vsel %vm1522_vm0, %v1535_v20, %v1537_v38  ;;  %v5766_v49 = vsel %vm1522_vm0, %v1526_v24, %v1528_v39  ;;  %v5771_v50 = vsel %vm1522_vm0, %v1553_v31, %v1555_v40 }
  0x38   : > { %v4929_v8 = vpack.i.bf16 %v497_v2, %v495_v46  ;;  %v4934_v14 = vpack.i.bf16 %v498_v6, %v496_v4  ;;  %v5776_v51 = vsel %vm1522_vm0, %v1544_v32, %v1546_v41  ;;  %v5783_v52 = vsel %vm1522_vm0, %v1537_v38, %v1539_v42 }
  0x39   : > { %v5786_v53 = vsel %vm1522_vm0, %v1528_v39, %v1530_v43  ;;  %v1548_v54 = vrot.slane %v5756_v45, 1  ;;  %v5790_v55 = vsel %vm1522_vm0, %v1555_v40, %v1557_v44  ;;  %v1532_v57 = vrot.slane %v5557_v17, 1 }
  0x3a   : > { %4930 = vrot.lane.b32.xlu1 %v4929_v8, %s5445_s8  ;;  %v1533_v58 = vrot.slane %v5592_v35, 1  ;;  %v1523_v59 = vrot.slane %v5554_v16, 1  ;;  %v1524_v62 = vrot.slane %v5572_v23, 1  ;;  %v1550_v1 = vrot.slane %v5569_v22, 1 }
  0x3b   : > { %4920 = vrot.lane.b32.xlu0 %v4919_v3, %s5444_s7  ;;  %v5793_v56 = vsel %vm1522_vm0, %v1546_v41, %v1548_v54  ;;  %v1551_v46 = vrot.slane %v5595_v36, 1  ;;  %v1541_v4 = vrot.slane %v5566_v21, 1  ;;  %v1542_v6 = vrot.slane %v5581_v28, 1 }
  0x3c   : > { %v5810_v2 = vsel %vm1522_vm0, %v1532_v57, %v1533_v58  ;;  %v5813_v3 = vsel %vm1522_vm0, %v1523_v59, %v1524_v62  ;;  %v2857_v8 = vrot.slane %v5557_v17, 2  ;;  %v2848_v39 = vrot.slane %v5554_v16, 2 }
  0x3d   : > { %v5827_v38 = vsel %vm1522_vm0, %v1541_v4, %v1542_v6  ;;  %v2849_v40 = vrot.slane %v5572_v23, 2  ;;  %v2875_v41 = vrot.slane %v5569_v22, 2  ;;  %v2876_v43 = vrot.slane %v5595_v36, 2 }
  0x3e   : > { %4935 = vrot.lane.b32.xlu1 %v4934_v14, %s5444_s7  ;;  %v2858_v14 = vrot.slane %v5592_v35, 2  ;;  %v2867_v44 = vrot.slane %v5581_v28, 2  ;;  %v8720_v57 = vrot.slane %v5544_v12, 2 }
  0x3f   : > { %4925 = vrot.lane.b32.xlu0 %v4924_v19, %s5443_s6  ;;  %v5824_v19 = vsel %vm1522_vm0, %v1550_v1, %v1551_v46  ;;  %v5840_v42 = vsel %vm2847_vm1, %v2848_v39, %v2849_v40  ;;  %v5850_v54 = vsel %vm2847_vm1, %v2875_v41, %v2876_v43 }
  0x40   : > { %v5929_v59 = vsel %vm2847_vm1, %v2867_v44, %v8720_v57 }
  0x42   : > { %640 = vrot.lane.b32.xlu1 %v5572_v23, %s5446_s9 }
  0x43   : > { %638 = vrot.lane.b32.xlu0 %v5554_v16, %s5446_s9 }
  0x46   : > { %644 = vrot.lane.b32.xlu1 %v5637_v15, %s5446_s9 }
  0x47   : > { %642 = vrot.lane.b32.xlu0 %v5538_v10, %s5446_s9 }
  0x4a   : > { %648 = vrot.lane.b32.xlu1 %v5592_v35, %s5446_s9 }
  0x4b   : > { %646 = vrot.lane.b32.xlu0 %v5557_v17, %s5446_s9 }
  0x4e   : > { %652 = vrot.lane.b32.xlu1 %v5647_v26, %s5446_s9 }
  0x4f   : > { %650 = vrot.lane.b32.xlu0 %v5541_v11, %s5446_s9 }
  0x52   : > { %656 = vrot.lane.b32.xlu1 %v5581_v28, %s5446_s9 }
  0x53   : > { %654 = vrot.lane.b32.xlu0 %v5566_v21, %s5446_s9 }
  0x56   : > { %660 = vrot.lane.b32.xlu1 %v5650_v27, %s5446_s9 }
  0x57   : > { %658 = vrot.lane.b32.xlu0 %v5544_v12, %s5446_s9 }
  0x5a   : > { %664 = vrot.lane.b32.xlu1 %v5595_v36, %s5446_s9 }
  0x5b   : > { %662 = vrot.lane.b32.xlu0 %v5569_v22, %s5446_s9 }
  0x5e   : > { %668 = vrot.lane.b32.xlu1 %v5653_v29, %s5446_s9 }
  0x5f   : > { %666 = vrot.lane.b32.xlu0 %v5547_v13, %s5446_s9 }
  0x62   : > { %1086 = vrot.lane.b32.xlu1 %v5557_v17, %s5447_s10  ;;  %v5836_v17 = vsel %vm2847_vm1, %v2857_v8, %v2858_v14 }
  0x63   : > { %1078 = vrot.lane.b32.xlu0 %v5554_v16, %s5447_s10  ;;  %v2866_v16 = vrot.slane %v5566_v21, 2 }
  0x66   : > { %1102 = vrot.lane.b32.xlu1 %v5569_v22, %s5447_s10  ;;  %v5853_v22 = vsel %vm2847_vm1, %v2866_v16, %v2867_v44 }
  0x67   : > { %1094 = vrot.lane.b32.xlu0 %v5566_v21, %s5447_s10  ;;  %v5878_v21 = vsel %vm1522_vm0, %v1533_v58, %v1535_v20  ;;  %v8722_v20 = vrot.slane %v5538_v10, 2 }
  0x6a   : > { %2415 = vrot.lane.b32.xlu1 %v5810_v2, %s5447_s10 }
  0x6b   : > { %2407 = vrot.lane.b32.xlu0 %v5813_v3, %s5447_s10 }
  0x6e   : > { %2431 = vrot.lane.b32.xlu1 %v5824_v19, %s5447_s10 }
  0x6f   : > { %2423 = vrot.lane.b32.xlu0 %v5827_v38, %s5447_s10 }
  0x72   : > { %3300 = vrot.lane.b32.xlu1 %v5836_v17, %s5446_s9 }
  0x73   : > { %3292 = vrot.lane.b32.xlu0 %v5840_v42, %s5446_s9 }
  0x76   : > { %3316 = vrot.lane.b32.xlu1 %v5850_v54, %s5446_s9 }
  0x77   : > { %3308 = vrot.lane.b32.xlu0 %v5853_v22, %s5446_s9 }
  0x7a   : > { %1088 = vrot.lane.b32.xlu1 %v5592_v35, %s5447_s10  ;;  %v5897_v35 = vsel %vm1522_vm0, %v1542_v6, %v1544_v32  ;;  %v8719_v32 = vrot.slane %v5547_v13, 2 }
  0x7b   : > { %1080 = vrot.lane.b32.xlu0 %v5572_v23, %s5447_s10  ;;  %v5883_v23 = vsel %vm1522_vm0, %v1524_v62, %v1526_v24  ;;  %8884 = vst [vmem:[#allocation14_spill] sm:$0xff] %v5897_v35 }
  0x7c   : > { %8883 = vst [vmem:[#allocation13_spill] sm:$0xff] %v5883_v23  ;;  %v5924_v58 = vsel %vm2847_vm1, %v2876_v43, %v8719_v32 }
  0x7e   : > { %1104 = vrot.lane.b32.xlu1 %v5595_v36, %s5447_s10  ;;  %v8721_v36 = vrot.slane %v5541_v11, 2 }
  0x7f   : > { %1096 = vrot.lane.b32.xlu0 %v5581_v28, %s5447_s10  ;;  %v5892_v28 = vsel %vm1522_vm0, %v1551_v46, %v1553_v31  ;;  %v5913_v31 = vsel %vm2847_vm1, %v2849_v40, %v8722_v20 }
  0x80   : > { %v5908_v24 = vsel %vm2847_vm1, %v2858_v14, %v8721_v36 }
  0x82   : > { %1975 = vrot.lane.b32.xlu1 %v5810_v2, %s5446_s9 }
  0x83   : > { %1967 = vrot.lane.b32.xlu0 %v5813_v3, %s5446_s9 }
  0x86   : > { %1991 = vrot.lane.b32.xlu1 %v5824_v19, %s5446_s9 }
  0x87   : > { %1983 = vrot.lane.b32.xlu0 %v5827_v38, %s5446_s9 }
  0x8a   : > { %2417 = vrot.lane.b32.xlu1 %v5878_v21, %s5447_s10 }
  0x8b   : > { %2409 = vrot.lane.b32.xlu0 %v5883_v23, %s5447_s10 }
  0x8e   : > { %2433 = vrot.lane.b32.xlu1 %v5892_v28, %s5447_s10 }
  0x8f   : > { %2425 = vrot.lane.b32.xlu0 %v5897_v35, %s5447_s10 }
  0x92   : > { %3302 = vrot.lane.b32.xlu1 %v5908_v24, %s5446_s9 }
  0x93   : > { %3294 = vrot.lane.b32.xlu0 %v5913_v31, %s5446_s9 }
  0x96   : > { %3318 = vrot.lane.b32.xlu1 %v5924_v58, %s5446_s9 }
  0x97   : > { %3310 = vrot.lane.b32.xlu0 %v5929_v59, %s5446_s9 }
  0x9a   : > { %v5935_v62 = vpop.permute.xlu1 %4890  ;;  %1977 = vrot.lane.b32.xlu1 %v5878_v21, %s5446_s9 }
  0x9b   : > { %8885 = vst [vmem:[#allocation15_spill] sm:$0xff] %v5935_v62  ;;  %1969 = vrot.lane.b32.xlu0 %v5883_v23, %s5446_s9  ;;  %v1592_v62 = vcombine.high %v5810_v2, %v5824_v19 }
  0x9c   : > { %v5941_v1 = vpop.permute.xlu0 %4880 }
  0x9d   : > { %8886 = vst [vmem:[#allocation16_spill] sm:$0xff] %v5941_v1 }
  0x9e   : > { %v5943_v46 = vpop.permute.xlu1 %4900  ;;  %1993 = vrot.lane.b32.xlu1 %v5892_v28, %s5446_s9 }
  0x9f   : > { %8887 = vst [vmem:[#allocation17_spill] sm:$0xff] %v5943_v46  ;;  %1985 = vrot.lane.b32.xlu0 %v5897_v35, %s5446_s9 }
  0xa1   : > { %v5949_v4 = vpop.permute.xlu0 %4885 }
  0xa2   : > { %8888 = vst [vmem:[#allocation18_spill] sm:$0xff] %v5949_v4 }
  0xa4   : > { %v5951_v6 = vpop.permute.xlu1 %4905 }
  0xa5   : > { %8889 = vst [vmem:[#allocation19_spill] sm:$0xff] %v5951_v6  ;;  %v5953_v8 = vpop.permute.xlu0 %4895 }
  0xa6   : > { %8890 = vst [vmem:[#allocation20_spill] sm:$0xff] %v5953_v8 }
  0xa8   : > { %v5955_v14 = vpop.permute.xlu1 %4910 }
  0xa9   : > { %8891 = vst [vmem:[#allocation21_spill] sm:$0xff] %v5955_v14  ;;  %v5957_v39 = vpop.permute.xlu0 %4915 }
  0xaa   : > { %8892 = vst [vmem:[#allocation22_spill] sm:$0xff] %v5957_v39  ;;  %v1576_v39 = vcombine.high %v5813_v3, %v5827_v38 }
  0xac   : > { %v5959_v40 = vpop.permute.xlu1 %4930 }
  0xad   : > { %8893 = vst [vmem:[#allocation23_spill] sm:$0xff] %v5959_v40  ;;  %v5961_v41 = vpop.permute.xlu0 %4920 }
  0xae   : > { %8894 = vst [vmem:[#allocation24_spill] sm:$0xff] %v5961_v41 }
  0xb0   : > { %v5963_v43 = vpop.permute.xlu1 %4935 }
  0xb1   : > { %8895 = vst [vmem:[#allocation25_spill] sm:$0xff] %v5963_v43  ;;  %v5965_v16 = vpop.permute.xlu0 %4925 }
  0xb2   : > { %8896 = vst [vmem:[#allocation26_spill] sm:$0xff] %v5965_v16 }
  0xb4   : > { %v641_v44 = vpop.permute.xlu1 %640 }
  0xb5   : > { %v639_v32 = vpop.permute.xlu0 %638 }
  0xb8   : > { %v5967_v57 = vpop.permute.xlu1 %644 }
  0xb9   : > { %8897 = vst [vmem:[#allocation27_spill] sm:$0xff] %v5967_v57  ;;  %v5969_v36 = vpop.permute.xlu0 %642 }
  0xba   : > { %8898 = vst [vmem:[#allocation28_spill] sm:$0xff] %v5969_v36 }
  0xbc   : > { %v649_v20 = vpop.permute.xlu1 %648 }
  0xbd   : > { %v647_v5 = vpop.permute.xlu0 %646 }
  0xc0   : > { %v5971_v61 = vpop.permute.xlu1 %652 }
  0xc1   : > { %8899 = vst [vmem:[#allocation29_spill] sm:$0xff] %v5971_v61  ;;  %v5973_v47 = vpop.permute.xlu0 %650 }
  0xc2   : > { %8900 = vst [vmem:[#allocation30_spill] sm:$0xff] %v5973_v47 }
  0xc4   : > { %v657_v0 = vpop.permute.xlu1 %656 }
  0xc5   : > { %v655_v40 = vpop.permute.xlu0 %654  ;;  %v754_v43 = vcombine.low %v641_v44, %v657_v0  ;;  %v755_v16 = vcombine.high %v641_v44, %v657_v0 }
  0xc6   : > { %v686_v57 = vcombine.low %v639_v32, %v655_v40  ;;  %v687_v14 = vcombine.high %v639_v32, %v655_v40 }
  0xc7   : > { %v769_v4 = vrot.slane %v755_v16, %v5535_v9 }
  0xc8   : > { %v5975_v25 = vpop.permute.xlu1 %660  ;;  %v694_v32 = vrot.slane %v686_v57, %v5535_v9  ;;  %v701_v40 = vrot.slane %v687_v14, %v5535_v9 }
  0xc9   : > { %8901 = vst [vmem:[#allocation31_spill] sm:$0xff] %v5975_v25  ;;  %v5977_v41 = vpop.permute.xlu0 %658  ;;  %v762_v25 = vrot.slane %v754_v43, %v5535_v9 }
  0xca   : > { %8902 = vst [vmem:[#allocation32_spill] sm:$0xff] %v5977_v41 }
  0xcc   : > { %v665_v63 = vpop.permute.xlu1 %664 }
  0xcd   : > { %v663_v61 = vpop.permute.xlu0 %662  ;;  %v770_v60 = vcombine.low %v649_v20, %v665_v63  ;;  %v771_v30 = vcombine.high %v649_v20, %v665_v63  ;;  %v1590_v63 = vrot.slane %v1576_v39, %v5535_v9 }
  0xce   : > { %v702_v7 = vcombine.low %v647_v5, %v663_v61  ;;  %v703_v8 = vcombine.high %v647_v5, %v663_v61  ;;  %v1606_v5 = vrot.slane %v1592_v62, %v5535_v9 }
  0xcf   : > { %v778_v0 = vrot.slane %v770_v60, %v5535_v9  ;;  %v785_v44 = vrot.slane %v771_v30, %v5535_v9  ;;  %v822_v60 = vcombine.low %v5969_v36, %v5977_v41 }
  0xd0   : > { %v710_v6 = vrot.slane %v702_v7, %v5535_v9  ;;  %v717_v46 = vrot.slane %v703_v8, %v5535_v9  ;;  %v1624_v35 = vcombine.high %v1590_v63, %v1606_v5 }
  0xd1   : > { %v5991_v1 = vpop.permute.xlu0 %666  ;;  %v787_v61 = vcombine.high %v762_v25, %v778_v0  ;;  %v803_v20 = vcombine.high %v769_v4, %v785_v44  ;;  %v830_v36 = vrot.slane %v822_v60, %v5535_v9 }
  0xd2   : > { %8903 = vst [vmem:[#allocation33_spill] sm:$0xff] %v5991_v1  ;;  %v718_v30 = vcombine.low %v694_v32, %v710_v6  ;;  %v719_v43 = vcombine.high %v694_v32, %v710_v6  ;;  %v735_v7 = vcombine.high %v701_v40, %v717_v46  ;;  %v734_v16 = vcombine.low %v701_v40, %v717_v46 }
  0xd3   : > { %v838_v57 = vcombine.low %v5973_v47, %v5991_v1  ;;  %v801_v8 = vrot.slane %v787_v61, %v5559_v18  ;;  %v817_v14 = vrot.slane %v803_v20, %v5559_v18  ;;  %v786_v61 = vcombine.low %v762_v25, %v778_v0 }
  0xd4   : > { %v733_v62 = vrot.slane %v719_v43, %v5559_v18  ;;  %v749_v39 = vrot.slane %v735_v7, %v5559_v18  ;;  %v6006_v46 = vrot.slane %v718_v30, %v5559_v18  ;;  %v6009_v32 = vrot.slane %v734_v16, %v5559_v18 }
  0xd5   : > { %v846_v23 = vrot.slane %v838_v57, %v5535_v9  ;;  %v4944_v41 = vpack.i.bf16 %v817_v14, %v801_v8  ;;  %v6014_v20 = vrot.slane %v1624_v35, %v5559_v18  ;;  %v8906_v43 = vmov 0.0  }
  0xd6   : > { %v4939_v6 = vpack.i.bf16 %v749_v39, %v733_v62  ;;  %8904 = vst [vmem:[#allocation34_spill] sm:$0xff] %v6006_v46  ;;  %8905 = vst [vmem:[#allocation35_spill] sm:$0xff] %v6009_v32  ;;  %v750_v60 = vcombine.high %v6006_v46, %v8906_v43  ;;  %v1623_v7 = vcombine.low %v1590_v63, %v1606_v5  ;;  %v2864_v46 = vrot.slane %v5736_v33, 2 }
  0xd7   : > { %v855_v40 = vcombine.high %v830_v36, %v846_v23  ;;  %4945 = vrot.lane.b32.xlu0 %v4944_v41, %s5443_s6  ;;  %v802_v57 = vcombine.low %v769_v4, %v785_v44  ;;  %v752_v30 = vcombine.high %v6009_v32, %v8906_v43  ;;  %v751_v47 = vcombine.high %v733_v62, %v8906_v43 }
  0xd8   : > { %4940 = vrot.lane.b32.xlu1 %v4939_v6, %s5443_s6  ;;  %v753_v35 = vcombine.high %v749_v39, %v8906_v43  ;;  %v6028_v0 = vrot.slane %v786_v61, %v5559_v18  ;;  %v854_v6 = vcombine.low %v830_v36, %v846_v23  ;;  %v6031_v4 = vrot.slane %v1623_v7, %v5559_v18 }
  0xd9   : > { %v6021_v16 = vrot.slane %v855_v40, %v5559_v18  ;;  %v4954_v41 = vpack.i.bf16 %v752_v30, %v750_v60  ;;  %v6036_v44 = vrot.slane %v802_v57, %v5559_v18  ;;  %v819_v40 = vcombine.high %v801_v8, %v8906_v43  ;;  %v6054_v57 = vpop.permute.xlu1 %668 }
  0xda   : > { %8908 = vst [vmem:[#allocation37_spill] sm:$0xff] %v6028_v0  ;;  %8909 = vst [vmem:[#allocation38_spill] sm:$0xff] %v6031_v4  ;;  %v818_v5 = vcombine.high %v6028_v0, %v8906_v43  ;;  %v4959_v63 = vpack.i.bf16 %v753_v35, %v751_v47  ;;  %v6043_v39 = vrot.slane %v854_v6, %v5559_v18  ;;  %v2853_v6 = vrot.slane %v5637_v15, 2 }
  0xdb   : > { %8907 = vst [vmem:[#allocation36_spill] sm:$0xff] %v6021_v16  ;;  %v4949_v25 = vpack.i.bf16 %v6014_v20, %v6021_v16  ;;  %4955 = vrot.lane.b32.xlu0 %v4954_v41, %s5445_s8  ;;  %8910 = vst [vmem:[#allocation39_spill] sm:$0xff] %v6036_v44  ;;  %v820_v62 = vcombine.high %v6036_v44, %v8906_v43  ;;  %v1641_v23 = vcombine.high %v6031_v4, %v8906_v43 }
  0xdc   : > { %8911 = vst [vmem:[#allocation40_spill] sm:$0xff] %v6043_v39  ;;  %v821_v61 = vcombine.high %v817_v14, %v8906_v43  ;;  %v886_v60 = vcombine.high %v6043_v39, %v8906_v43  ;;  %8912 = vst [vmem:[#allocation41_spill] sm:$0xff] %v6054_v57  ;;  %v6063_v14 = vpop.permute.xlu0 %1078  ;;  %v2855_v44 = vrot.slane %v5739_v34, 2  ;;  %v1591_v32 = vcombine.low %v5810_v2, %v5824_v19 }
  0xdd   : > { %4950 = vrot.lane.b32.xlu1 %v4949_v25, %s5443_s6  ;;  %v4964_v36 = vpack.i.bf16 %v820_v62, %v818_v5  ;;  %v6061_v8 = vpop.permute.xlu1 %1086  ;;  %v2862_v5 = vrot.slane %v5647_v26, 2  ;;  %v1575_v16 = vcombine.low %v5813_v3, %v5827_v38  ;;  %v2873_v1 = vrot.slane %v5756_v45, 2 }
  0xde   : > { %v4974_v47 = vpack.i.bf16 %v1641_v23, %v886_v60  ;;  %v4969_v7 = vpack.i.bf16 %v821_v61, %v819_v40  ;;  %v8913_v23 = vrot.slane %v5538_v10, 2  ;;  %v2871_v40 = vrot.slane %v5650_v27, 2 }
  0xdf   : > { %4960 = vrot.lane.b32.xlu0 %v4959_v63, %s5444_s7  ;;  %v8914_v61 = vrot.slane %v5541_v11, 2  ;;  %v6194_v57 = vsel %vm2847_vm1, %v2853_v6, %v2855_v44  ;;  %v6198_v34 = vsel %vm2847_vm1, %v2862_v5, %v2864_v46  ;;  %v2882_v33 = vrot.slane %v5742_v37, 2 }
  0xe0   : > { %v6073_v41 = vpop.permute.xlu0 %1094  ;;  %8919 = vst [vmem:[#allocation44_spill] sm:$0xff] %v6194_v57  ;;  %v6202_v2 = vrot.slane %v1591_v32, %v5535_v9  ;;  %v6205_v3 = vrot.slane %v1575_v16, %v5535_v9  ;;  %v2916_v19 = vcombine.low %v5836_v17, %v5850_v54  ;;  %v2917_v38 = vcombine.high %v5836_v17, %v5850_v54 }
  0xe1   : > { %4965 = vrot.lane.b32.xlu1 %v4964_v36, %s5445_s8  ;;  %v6071_v30 = vpop.permute.xlu1 %1102  ;;  %v6102_v36 = vsel %vm2847_vm1, %v8913_v23, %v2853_v6  ;;  %v6108_v60 = vsel %vm2847_vm1, %v8914_v61, %v2862_v5  ;;  %v2900_v46 = vcombine.low %v5840_v42, %v5853_v22  ;;  %v1727_v37 = vcombine.low %v5761_v48, %v5771_v50 }
  0xe2   : > { %v1728_v32 = vcombine.high %v5761_v48, %v5771_v50  ;;  %v1711_v16 = vcombine.low %v5766_v49, %v5776_v51  ;;  %v1780_v6 = vcombine.high %v5786_v53, %v5793_v56  ;;  %v1795_v5 = vcombine.low %v5783_v52, %v5790_v55 }
  0xe3   : > { %4975 = vrot.lane.b32.xlu0 %v4974_v47, %s5445_s8  ;;  %v8756_v47 = vrot.slane %v5653_v29, 2 }
  0xe4   : > { %v6083_v35 = vpop.permute.xlu0 %2407 }
  0xe5   : > { %4970 = vrot.lane.b32.xlu1 %v4969_v7, %s5444_s7  ;;  %v6081_v25 = vpop.permute.xlu1 %2415 }
  0xe7   : > { %1082 = vrot.lane.b32.xlu0 %v5538_v10, %s5447_s10  ;;  %v8915_v10 = vrot.slane %v5544_v12, 2 }
  0xe8   : > { %v6095_v62 = vpop.permute.xlu0 %2423 }
  0xe9   : > { %1090 = vrot.lane.b32.xlu1 %v5541_v11, %s5447_s10  ;;  %v6093_v63 = vpop.permute.xlu1 %2431  ;;  %v6118_v7 = vsel %vm2847_vm1, %v8915_v10, %v2871_v40  ;;  %v8916_v11 = vrot.slane %v5547_v13, 2 }
  0xeb   : > { %1098 = vrot.lane.b32.xlu0 %v5544_v12, %s5447_s10  ;;  %v6125_v23 = vsel %vm2847_vm1, %v8916_v11, %v8756_v47 }
  0xec   : > { %v6129_v39 = vpop.permute.xlu0 %3292 }
  0xed   : > { %1106 = vrot.lane.b32.xlu1 %v5547_v13, %s5447_s10  ;;  %v6127_v61 = vpop.permute.xlu1 %3300 }
  0xef   : > { %3732 = vrot.lane.b32.xlu0 %v5840_v42, %s5447_s10 }
  0xf0   : > { %v6139_v10 = vpop.permute.xlu0 %3308 }
  0xf1   : > { %3740 = vrot.lane.b32.xlu1 %v5836_v17, %s5447_s10  ;;  %v6137_v12 = vpop.permute.xlu1 %3316  ;;  %v1712_v17 = vcombine.high %v5766_v49, %v5776_v51 }
  0xf3   : > { %3748 = vrot.lane.b32.xlu0 %v5853_v22, %s5447_s10 }
  0xf4   : > { %v6149_v11 = vpop.permute.xlu0 %1080 }
  0xf5   : > { %3756 = vrot.lane.b32.xlu1 %v5850_v54, %s5447_s10  ;;  %v6147_v13 = vpop.permute.xlu1 %1088  ;;  %v1796_v54 = vcombine.high %v5783_v52, %v5790_v55 }
  0xf7   : > { %2411 = vrot.lane.b32.xlu0 %v5766_v49, %s5447_s10 }
  0xf9   : > { %2419 = vrot.lane.b32.xlu1 %v5761_v48, %s5447_s10 }
  0xfb   : > { %2427 = vrot.lane.b32.xlu0 %v5776_v51, %s5447_s10 }
  0xfd   : > { %2435 = vrot.lane.b32.xlu1 %v5771_v50, %s5447_s10 }
  0xff   : > { %3296 = vrot.lane.b32.xlu0 %v6102_v36, %s5446_s9 }
 0x101   : > { %3304 = vrot.lane.b32.xlu1 %v6108_v60, %s5446_s9 }
 0x103   : > { %3312 = vrot.lane.b32.xlu0 %v6118_v7, %s5446_s9 }
 0x105   : > { %3320 = vrot.lane.b32.xlu1 %v6125_v23, %s5446_s9 }
 0x107   : > { %1084 = vrot.lane.b32.xlu0 %v5637_v15, %s5447_s10  ;;  %v6157_v15 = vpop.permute.xlu1 %1104 }
 0x109   : > { %1092 = vrot.lane.b32.xlu1 %v5647_v26, %s5447_s10  ;;  %v6159_v26 = vpop.permute.xlu0 %1096 }
 0x10b   : > { %1100 = vrot.lane.b32.xlu0 %v5650_v27, %s5447_s10  ;;  %v6167_v27 = vpop.permute.xlu1 %1975 }
 0x10d   : > { %1108 = vrot.lane.b32.xlu1 %v5653_v29, %s5447_s10  ;;  %v6169_v47 = vpop.permute.xlu0 %1967 }
 0x10e   : > { %8917 = vst [vmem:[#allocation42_spill] sm:$0xff] %v6169_v47 }
 0x10f   : > { %1971 = vrot.lane.b32.xlu0 %v5766_v49, %s5446_s9  ;;  %v6177_v4 = vpop.permute.xlu1 %1991  ;;  %v1779_v49 = vcombine.low %v5786_v53, %v5793_v56 }
 0x111   : > { %1979 = vrot.lane.b32.xlu1 %v5761_v48, %s5446_s9  ;;  %v6179_v0 = vpop.permute.xlu0 %1983  ;;  %v6234_v48 = vsel %vm2847_vm1, %v2871_v40, %v2873_v1  ;;  %v6250_v1 = vrot.slane %v2916_v19, %v5535_v9  ;;  %v6253_v40 = vrot.slane %v2917_v38, %v5535_v9  ;;  %v6270_v19 = vrot.slane %v1712_v17, %v5535_v9 }
 0x112   : > { %8918 = vst [vmem:[#allocation43_spill] sm:$0xff] %v6179_v0  ;;  %v1803_v17 = vrot.slane %v1795_v5, %v5535_v9  ;;  %v2984_v5 = vcombine.low %v5908_v24, %v5924_v58 }
 0x113   : > { %1987 = vrot.lane.b32.xlu0 %v5776_v51, %s5446_s9  ;;  %v6211_v44 = vpop.permute.xlu1 %2417  ;;  %v8922_v51 = vrot.slane %v5653_v29, 2  ;;  %8923 = vst [vmem:[#allocation47_spill] sm:$0xff] %v6250_v1  ;;  %8924 = vst [vmem:[#allocation48_spill] sm:$0xff] %v6253_v40  ;;  %v6262_v29 = vrot.slane %v1728_v32, %v5535_v9 }
 0x114   : > { %8920 = vst [vmem:[#allocation45_spill] sm:$0xff] %v6211_v44  ;;  %v1787_v44 = vrot.slane %v1779_v49, %v5535_v9  ;;  %v2985_v49 = vcombine.high %v5908_v24, %v5924_v58 }
 0x115   : > { %1995 = vrot.lane.b32.xlu1 %v5771_v50, %s5446_s9  ;;  %v6213_v45 = vpop.permute.xlu0 %2409  ;;  %v2901_v50 = vcombine.high %v5840_v42, %v5853_v22  ;;  %v6256_v42 = vrot.slane %v2900_v46, %v5535_v9  ;;  %v6259_v22 = vrot.slane %v1727_v37, %v5535_v9  ;;  %v1810_v46 = vrot.slane %v1796_v54, %v5535_v9 }
 0x116   : > { %8921 = vst [vmem:[#allocation46_spill] sm:$0xff] %v6213_v45  ;;  %v6245_v45 = vsel %vm2847_vm1, %v8922_v51, %v2882_v33  ;;  %v6267_v33 = vrot.slane %v1711_v16, %v5535_v9  ;;  %v1794_v37 = vrot.slane %v1780_v6, %v5535_v9  ;;  %v1659_v16 = vcombine.low %v5878_v21, %v5892_v28  ;;  %v8929_v6 = vld [vmem:[#allocation14_spill] sm:$0xff] }
 0x117   : > { %3734 = vrot.lane.b32.xlu0 %v5913_v31, %s5447_s10  ;;  %8925 = vst [vmem:[#allocation49_spill] sm:$0xff] %v6256_v42  ;;  %v6272_v38 = vpop.permute.xlu1 %2433  ;;  %v6281_v32 = vrot.slane %v2901_v50, %v5535_v9  ;;  %v1660_v54 = vcombine.high %v5878_v21, %v5892_v28  ;;  %v2969_v21 = vcombine.high %v5913_v31, %v5929_v59 }
 0x118   : > { %8926 = vst [vmem:[#allocation50_spill] sm:$0xff] %v6272_v38  ;;  %v8930_v38 = vld [vmem:[#allocation13_spill] sm:$0xff]  ;;  %v1827_v28 = vcombine.low %v1794_v37, %v1810_v46  ;;  %v1828_v0 = vcombine.high %v1794_v37, %v1810_v46  ;;  %v6337_v46 = vrot.slane %v2985_v49, %v5535_v9 }
 0x119   : > { %3742 = vrot.lane.b32.xlu1 %v5908_v24, %s5447_s10  ;;  %v6274_v51 = vpop.permute.xlu0 %2425  ;;  %8928 = vst [vmem:[#allocation52_spill] sm:$0xff] %v6281_v32  ;;  %v1643_v47 = vcombine.low %v8930_v38, %v8929_v6  ;;  %v1644_v50 = vcombine.high %v8930_v38, %v8929_v6  ;;  %v1760_v38 = vcombine.high %v6270_v19, %v6262_v29 }
 0x11a   : > { %8927 = vst [vmem:[#allocation51_spill] sm:$0xff] %v6274_v51  ;;  %v2968_v51 = vcombine.low %v5913_v31, %v5929_v59  ;;  %v1744_v6 = vcombine.high %v6267_v33, %v6259_v22  ;;  %v1143_v24 = vcombine.high %v6061_v8, %v6071_v30  ;;  %v6318_v31 = vrot.slane %v1659_v16, %v5535_v9 }
 0x11b   : > { %3750 = vrot.lane.b32.xlu0 %v5929_v59, %s5447_s10  ;;  %v6321_v59 = vrot.slane %v1660_v54, %v5535_v9  ;;  %v6327_v1 = vrot.slane %v1644_v50, %v5535_v9  ;;  %v6329_v42 = vpop.permute.xlu1 %3302  ;;  %v6334_v32 = vrot.slane %v2984_v5, %v5535_v9  ;;  %v6345_v16 = vrot.slane %v2969_v21, %v5535_v9 }
 0x11c   : > { %v6340_v37 = vrot.slane %v2968_v51, %v5535_v9  ;;  %v6350_v54 = vrot.slane %v1760_v38, %v5559_v18  ;;  %v6353_v50 = vrot.slane %v1744_v6, %v5559_v18  ;;  %v6356_v5 = vrot.slane %v1827_v28, %v5559_v18 }
 0x11d   : > { %3758 = vrot.lane.b32.xlu1 %v5924_v58, %s5447_s10  ;;  %v1127_v58 = vcombine.high %v6063_v14, %v6073_v41  ;;  %v6331_v40 = vpop.permute.xlu0 %3294  ;;  %8931 = vst [vmem:[#allocation14_spill] sm:$0xff] %v6334_v32  ;;  %v6359_v51 = vrot.slane %v1143_v24, %v5535_v9  ;;  %v1691_v49 = vcombine.low %v6327_v1, %v6321_v59 }
 0x11e   : > { %8932 = vst [vmem:[#allocation13_spill] sm:$0xff] %v6340_v37  ;;  %8933 = vst [vmem:[#allocation53_spill] sm:$0xff] %v6350_v54  ;;  %v1142_v21 = vcombine.low %v6061_v8, %v6071_v30  ;;  %v1126_v28 = vcombine.low %v6063_v14, %v6073_v41  ;;  %v3052_v8 = vcombine.low %v6108_v60, %v6125_v23 }
 0x11f   : > { %2413 = vrot.lane.b32.xlu0 %v5786_v53, %s5447_s10  ;;  %8934 = vst [vmem:[#allocation54_spill] sm:$0xff] %v6353_v50  ;;  %8935 = vst [vmem:[#allocation55_spill] sm:$0xff] %v6356_v5  ;;  %v6393_v14 = vpop.permute.xlu1 %3318  ;;  %v6405_v41 = vcombine.high %v6353_v50, %v8906_v43 }
 0x121   : > { %2421 = vrot.lane.b32.xlu1 %v5783_v52, %s5447_s10  ;;  %v6395_v30 = vpop.permute.xlu0 %3310  ;;  %8940 = vst [vmem:[#allocation60_spill] sm:$0xff] %v6405_v41  ;;  %v1134_v41 = vrot.slane %v1126_v28, %v5535_v9 }
 0x123   : > { %2429 = vrot.lane.b32.xlu0 %v5793_v56, %s5447_s10 }
 0x125   : > { %2437 = vrot.lane.b32.xlu1 %v5790_v55, %s5447_s10 }
 0x127   : > { %3298 = vrot.lane.b32.xlu0 %v6194_v57, %s5446_s9 }
 0x129   : > { %3306 = vrot.lane.b32.xlu1 %v6198_v34, %s5446_s9 }
 0x12b   : > { %3314 = vrot.lane.b32.xlu0 %v6234_v48, %s5446_s9 }
 0x12d   : > { %3322 = vrot.lane.b32.xlu1 %v6245_v45, %s5446_s9 }
 0x12f   : > { %1973 = vrot.lane.b32.xlu0 %v5786_v53, %s5446_s9  ;;  %v1811_v53 = vcombine.low %v1787_v44, %v1803_v17 }
 0x131   : > { %1981 = vrot.lane.b32.xlu1 %v5783_v52, %s5446_s9  ;;  %v6324_v52 = vrot.slane %v1643_v47, %v5535_v9  ;;  %v1812_v47 = vcombine.high %v1787_v44, %v1803_v17  ;;  %v6365_v44 = vrot.slane %v1811_v53, %v5559_v18  ;;  %v1150_v17 = vrot.slane %v1142_v21, %v5535_v9 }
 0x132   : > { %v8944_v21 = vcombine.low %v6205_v3, %v6202_v2 }
 0x133   : > { %1989 = vrot.lane.b32.xlu0 %v5793_v56, %s5446_s9  ;;  %v6362_v56 = vrot.slane %v1127_v58, %v5535_v9  ;;  %8936 = vst [vmem:[#allocation56_spill] sm:$0xff] %v6365_v44  ;;  %v6389_v24 = vrot.slane %v1812_v47, %v5559_v18  ;;  %v6409_v58 = vcombine.high %v6356_v5, %v8906_v43 }
 0x134   : > { %v6417_v38 = vcombine.high %v6365_v44, %v8906_v43  ;;  %v3036_v47 = vcombine.low %v6102_v36, %v6118_v7  ;;  %v1608_v44 = vcombine.high %v6205_v3, %v6202_v2  ;;  %v6439_v28 = vrot.slane %v8944_v21, %v5559_v18  ;;  %v6456_v2 = vpop.permute.xlu1 %1977  ;;  %v6458_v3 = vpop.permute.xlu0 %1969 }
 0x135   : > { %1997 = vrot.lane.b32.xlu1 %v5790_v55, %s5446_s9  ;;  %v6368_v55 = vrot.slane %v1828_v0, %v5559_v18  ;;  %v6384_v0 = vcombine.high %v6014_v20, %v8906_v43  ;;  %8938 = vst [vmem:[#allocation58_spill] sm:$0xff] %v6389_v24  ;;  %v6401_v20 = vcombine.high %v6350_v54, %v8906_v43  ;;  %8941 = vst [vmem:[#allocation61_spill] sm:$0xff] %v6409_v58  ;;  %s8675_s9 = scalar_lea.hbm %s8717_s3, %s4797_s27 }
 0x136   : > { %v1174_v53 = vcombine.low %v6362_v56, %v6359_v51  ;;  %8942 = vst [vmem:[#allocation62_spill] sm:$0xff] %v6417_v38  ;;  %v3053_v58 = vcombine.high %v6108_v60, %v6125_v23  ;;  %8945 = vst [vmem:[#allocation64_spill] sm:$0xff] %v6439_v28  ;;  %v6443_v5 = vcombine.high %v6389_v24, %v8906_v43 }
 0x137   : > { %8937 = vst [vmem:[#allocation57_spill] sm:$0xff] %v6368_v55  ;;  %3736 = vrot.lane.b32.xlu0 %v6102_v36, %s5447_s10  ;;  %8939 = vst [vmem:[#allocation59_spill] sm:$0xff] %v6401_v20  ;;  %v6421_v6 = vcombine.high %v6368_v55, %v8906_v43  ;;  %v2455_v55 = vcombine.low %v6083_v35, %v6095_v62  ;;  %v6452_v38 = vrot.slane %v3052_v8, %v5535_v9 }
 0x138   : > { %8946 = vst [vmem:[#allocation65_spill] sm:$0xff] %v6443_v5  ;;  %v6461_v21 = vrot.slane %v1174_v53, %v5559_v18  ;;  %v2456_v5 = vcombine.high %v6083_v35, %v6095_v62  ;;  %v1158_v8 = vcombine.low %v1134_v41, %v1150_v17  ;;  %v6472_v24 = vrot.slane %v3053_v58, %v5535_v9 }
 0x139   : > { %3744 = vrot.lane.b32.xlu1 %v6108_v60, %s5447_s10  ;;  %8943 = vst [vmem:[#allocation63_spill] sm:$0xff] %v6421_v6  ;;  %v2471_v60 = vcombine.low %v6081_v25, %v6093_v63  ;;  %v2472_v6 = vcombine.high %v6081_v25, %v6093_v63  ;;  %8947 = vst [vmem:[#allocation66_spill] sm:$0xff] %v6452_v38  ;;  %v3357_v25 = vcombine.high %v6127_v61, %v6137_v12 }
 0x13a   : > { %8948 = vst [vmem:[#allocation67_spill] sm:$0xff] %v6461_v21  ;;  %v3341_v63 = vcombine.high %v6129_v39, %v6139_v10  ;;  %8949 = vst [vmem:[#allocation68_spill] sm:$0xff] %v6472_v24  ;;  %v3037_v53 = vcombine.high %v6102_v36, %v6118_v7  ;;  %v6477_v50 = vrot.slane %v3036_v47, %v5535_v9  ;;  %v6518_v47 = vpop.permute.xlu0 %1985 }
 0x13b   : > { %3752 = vrot.lane.b32.xlu0 %v6118_v7, %s5447_s10  ;;  %v1622_v35 = vrot.slane %v1608_v44, %v5559_v18  ;;  %v1639_v62 = vcombine.high %v6439_v28, %v8906_v43  ;;  %v6485_v20 = vrot.slane %v1691_v49, %v5559_v18  ;;  %v6491_v36 = vrot.slane %v2472_v6, %v5535_v9 }
 0x13c   : > { %8950 = vst [vmem:[#allocation69_spill] sm:$0xff] %v6477_v50  ;;  %v6494_v7 = vrot.slane %v2455_v55, %v5535_v9  ;;  %v6499_v44 = vrot.slane %v2456_v5, %v5535_v9  ;;  %v6502_v58 = vrot.slane %v3357_v25, %v5535_v9  ;;  %v1192_v49 = vcombine.high %v6461_v21, %v8906_v43  ;;  %v6516_v5 = vpop.permute.xlu1 %1993 }
 0x13d   : > { %3760 = vrot.lane.b32.xlu1 %v6125_v23, %s5447_s10  ;;  %v1175_v23 = vcombine.high %v6362_v56, %v6359_v51  ;;  %8951 = vst [vmem:[#allocation70_spill] sm:$0xff] %v6485_v20  ;;  %v1159_v51 = vcombine.high %v1134_v41, %v1150_v17  ;;  %v6488_v56 = vrot.slane %v2471_v60, %v5535_v9 }
 0x13e   : > { %v6505_v17 = vrot.slane %v3341_v63, %v5535_v9  ;;  %v6510_v6 = vrot.slane %v1158_v8, %v5559_v18  ;;  %v1211_v55 = vcombine.high %v6147_v13, %v6157_v15  ;;  %v1195_v41 = vcombine.high %v6149_v11, %v6159_v26 }
 0x13f   : > { %3738 = vrot.lane.b32.xlu0 %v6194_v57, %s5447_s10  ;;  %v1189_v60 = vrot.slane %v1175_v23, %v5559_v18  ;;  %v3356_v25 = vcombine.low %v6127_v61, %v6137_v12  ;;  %v3340_v63 = vcombine.low %v6129_v39, %v6139_v10  ;;  %v6526_v8 = vrot.slane %v3037_v53, %v5535_v9  ;;  %v8989_v57 = vld [vmem:[#allocation5_spill] sm:$0xff] }
 0x140   : > { %8952 = vst [vmem:[#allocation71_spill] sm:$0xff] %v6510_v6  ;;  %v1640_v21 = vcombine.high %v1622_v35, %v8906_v43  ;;  %v2487_v28 = vcombine.low %v6494_v7, %v6488_v56  ;;  %v1173_v61 = vrot.slane %v1159_v51, %v5559_v18  ;;  %v1692_v39 = vcombine.high %v6327_v1, %v6321_v59 }
 0x141   : > { %3746 = vrot.lane.b32.xlu1 %v6198_v34, %s5447_s10  ;;  %8953 = vst [vmem:[#allocation72_spill] sm:$0xff] %v6526_v8  ;;  %v2503_v12 = vcombine.low %v6499_v44, %v6491_v36  ;;  %v3388_v10 = vcombine.low %v6505_v17, %v6502_v58  ;;  %v4979_v53 = vpack.i.bf16 %v1192_v49, %v1639_v62 }
 0x142   : > { %v1709_v54 = vcombine.high %v6485_v20, %v8906_v43  ;;  %v6547_v23 = vrot.slane %v1211_v55, %v5535_v9  ;;  %v6550_v50 = vrot.slane %v1195_v41, %v5535_v9  ;;  %v4984_v51 = vpack.i.bf16 %v1189_v60, %v1622_v35 }
 0x143   : > { %3754 = vrot.lane.b32.xlu0 %v6234_v48, %s5447_s10  ;;  %v1190_v59 = vcombine.high %v6510_v6, %v8906_v43  ;;  %v6559_v32 = vrot.slane %v3356_v25, %v5535_v9  ;;  %v6562_v62 = vrot.slane %v3340_v63, %v5535_v9  ;;  %v4989_v49 = vpack.i.bf16 %v1640_v21, %v6384_v0 }
 0x144   : > { %v8956_v35 = vcombine.low %v6324_v52, %v6318_v31  ;;  %v6573_v41 = vrot.slane %v2487_v28, %v5559_v18  ;;  %v1706_v25 = vrot.slane %v1692_v39, %v5559_v18  ;;  %v1191_v63 = vcombine.high %v1173_v61, %v8906_v43 }
 0x145   : > { %3762 = vrot.lane.b32.xlu1 %v6245_v45, %s5447_s10  ;;  %v1193_v20 = vcombine.high %v1189_v60, %v8906_v43  ;;  %v3372_v0 = vcombine.low %v6562_v62, %v6559_v32  ;;  %v6585_v21 = vrot.slane %v3388_v10, %v5559_v18  ;;  %v1242_v6 = vcombine.low %v6550_v50, %v6547_v23  ;;  %v8963_v10 = vld [vmem:[#allocation42_spill] sm:$0xff]  ;;  %s4669_s10 = scalar_lea.sflag [#allocation3], %s189_s20 }
 0x146   : > { %v6570_v55 = vrot.slane %v8956_v35, %v5559_v18  ;;  %8958 = vst [vmem:[#allocation76_spill] sm:$0xff] %v6573_v41  ;;  %v8961_v35 = vld [vmem:[#allocation16_spill] sm:$0xff]  ;;  %v4994_v60 = vpack.i.bf16 %v1709_v54, %v1190_v59  ;;  %v3389_v39 = vcombine.high %v6505_v17, %v6502_v58 }
 0x147   : > { %4980 = vrot.lane.b32.xlu0 %v4979_v53, %s5445_s8  ;;  %v6580_v53 = vrot.slane %v2503_v12, %v5559_v18  ;;  %8960 = vst [vmem:[#allocation78_spill] sm:$0xff] %v6585_v21  ;;  %v2504_v12 = vcombine.high %v6499_v44, %v6491_v36  ;;  %v4999_v36 = vpack.i.bf16 %v1706_v25, %v1173_v61 }
 0x148   : > { %8957 = vst [vmem:[#allocation75_spill] sm:$0xff] %v6570_v55  ;;  %v1707_v28 = vcombine.high %v6570_v55, %v8906_v43  ;;  %v5004_v44 = vpack.i.bf16 %v1191_v63, %v1193_v20  ;;  %v1210_v55 = vcombine.low %v6147_v13, %v6157_v15  ;;  %v3406_v17 = vcombine.high %v6585_v21, %v8906_v43 }
 0x149   : > { %v6554_v1 = vpop.permute.xlu0 %4945  ;;  %4985 = vrot.lane.b32.xlu1 %v4984_v51, %s5443_s6  ;;  %8959 = vst [vmem:[#allocation77_spill] sm:$0xff] %v6580_v53  ;;  %v2519_v51 = vcombine.high %v6573_v41, %v8906_v43  ;;  %v2521_v58 = vcombine.high %v6580_v53, %v8906_v43  ;;  %v1194_v61 = vcombine.low %v6149_v11, %v6159_v26 }
 0x14a   : > { %v6552_v38 = vpop.permute.xlu1 %4940  ;;  %8955 = vst [vmem:[#allocation74_spill] sm:$0xff] %v6554_v1  ;;  %v2032_v1 = vcombine.high %v6167_v27, %v6177_v4  ;;  %v6623_v20 = vrot.slane %v1242_v6, %v5559_v18  ;;  %v2031_v63 = vcombine.low %v6167_v27, %v6177_v4  ;;  %v1676_v11 = vcombine.high %v6324_v52, %v6318_v31 }
 0x14b   : > { %8954 = vst [vmem:[#allocation73_spill] sm:$0xff] %v6552_v38  ;;  %v8962_v38 = vld [vmem:[#allocation43_spill] sm:$0xff]  ;;  %4990 = vrot.lane.b32.xlu0 %v4989_v49, %s5444_s7  ;;  %v6612_v49 = vrot.slane %v3372_v0, %v5559_v18  ;;  %v2488_v26 = vcombine.high %v6494_v7, %v6488_v56  ;;  %v5014_v27 = vpack.i.bf16 %v2519_v51, %v1707_v28 }
 0x14c   : > { %v2016_v37 = vcombine.high %v8963_v10, %v8962_v38  ;;  %8967 = vst [vmem:[#allocation79_spill] sm:$0xff] %v6623_v20  ;;  %v2015_v0 = vcombine.low %v8963_v10, %v8962_v38  ;;  %v6631_v15 = vrot.slane %v2032_v1, %v5535_v9  ;;  %v2518_v38 = vrot.slane %v2504_v12, %v5559_v18 }
 0x14d   : > { %4995 = vrot.lane.b32.xlu1 %v4994_v60, %s5445_s8  ;;  %v6607_v59 = vpop.permute.xlu0 %4955  ;;  %8966 = vst [vmem:[#allocation42_spill] sm:$0xff] %v6612_v49  ;;  %v8968_v60 = vld [vmem:[#allocation17_spill] sm:$0xff]  ;;  %v3403_v6 = vrot.slane %v3389_v39, %v5559_v18  ;;  %v5009_v10 = vpack.i.bf16 %v3406_v17, %v2521_v58  ;;  %v3404_v31 = vcombine.high %v6612_v49, %v8906_v43  ;;  %v8971_v39 = vld [vmem:[#allocation19_spill] sm:$0xff] }
 0x14e   : > { %8965 = vst [vmem:[#allocation43_spill] sm:$0xff] %v6607_v59  ;;  %v6634_v41 = vrot.slane %v2016_v37, %v5535_v9  ;;  %v6647_v37 = vrot.slane %v1210_v55, %v5535_v9  ;;  %v6654_v52 = vrot.slane %v1194_v61, %v5535_v9  ;;  %v6657_v56 = vrot.slane %v2031_v63, %v5535_v9  ;;  %v8972_v63 = vld [vmem:[#allocation52_spill] sm:$0xff] }
 0x14f   : > { %v6605_v54 = vpop.permute.xlu1 %4950  ;;  %5000 = vrot.lane.b32.xlu0 %v4999_v36, %s5443_s6  ;;  %v6660_v7 = vrot.slane %v2015_v0, %v5535_v9  ;;  %v1260_v55 = vcombine.high %v6623_v20, %v8906_v43  ;;  %v4907_v12 = vunpack.i.l.bf16 %v8971_v39  ;;  %v1690_v36 = vrot.slane %v1676_v11, %v5559_v18  ;;  %v8973_v0 = vld [vmem:[#allocation48_spill] sm:$0xff]  ;;  %v8977_v11 = vld [vmem:[#allocation50_spill] sm:$0xff]  ;;  %v8979_v20 = vld [vmem:[#allocation51_spill] sm:$0xff] }
 0x150   : > { %8964 = vst [vmem:[#allocation16_spill] sm:$0xff] %v6605_v54  ;;  %v2063_v1 = vcombine.low %v6634_v41, %v6631_v15  ;;  %v1243_v58 = vcombine.high %v6550_v50, %v6547_v23  ;;  %v2502_v17 = vrot.slane %v2488_v26, %v5559_v18  ;;  %v2522_v61 = vcombine.high %v2518_v38, %v8906_v43  ;;  %v8980_v50 = vld [vmem:[#allocation46_spill] sm:$0xff] }
 0x151   : > { %5005 = vrot.lane.b32.xlu1 %v5004_v44, %s5444_s7  ;;  %v6642_v4 = vpop.permute.xlu0 %4960  ;;  %v1710_v44 = vcombine.high %v1706_v25, %v8906_v43  ;;  %v8974_v51 = vcombine.low %v8972_v63, %v8973_v0  ;;  %v8978_v25 = vld [vmem:[#allocation45_spill] sm:$0xff]  ;;  %v2524_v23 = vcombine.high %v8980_v50, %v8979_v20  ;;  %v5019_v26 = vpack.i.bf16 %v3403_v6, %v2518_v38  ;;  %v8983_v54 = vld [vmem:[#allocation18_spill] sm:$0xff] }
 0x152   : > { %8969 = vst [vmem:[#allocation17_spill] sm:$0xff] %v6642_v4  ;;  %v2540_v49 = vcombine.high %v8978_v25, %v8977_v11  ;;  %v3373_v53 = vcombine.high %v6562_v62, %v6559_v32  ;;  %v1226_v21 = vcombine.low %v6654_v52, %v6647_v37  ;;  %v4908_v8 = vunpack.i.h.bf16 %v8971_v39  ;;  %v8985_v32 = vld [vmem:[#allocation8_spill] sm:$0xff] }
 0x153   : > { %v6662_v28 = vpop.permute.xlu1 %4965  ;;  %5010 = vrot.lane.b32.xlu0 %v5009_v10, %s5445_s8  ;;  %v6680_v13 = vrot.slane %v8974_v51, %v5559_v18  ;;  %v6683_v10 = vrot.slane %v2063_v1, %v5559_v18  ;;  %v2047_v51 = vcombine.low %v6660_v7, %v6657_v56  ;;  %v6706_v62 = vsel %vm595_vm2, %v8985_v32, %v4907_v12 }
 0x154   : > { %8970 = vst [vmem:[#allocation80_spill] sm:$0xff] %v6662_v28  ;;  %v5024_v28 = vpack.i.bf16 %v1260_v55, %v3404_v31  ;;  %v6711_v31 = vrot.slane %v1243_v58, %v5559_v18  ;;  %v6716_v39 = vrot.slane %v2540_v49, %v5535_v9  ;;  %v5029_v12 = vpack.i.bf16 %v2502_v17, %v1690_v36 }
 0x155   : > { %5015 = vrot.lane.b32.xlu1 %v5014_v27, %s5445_s8  ;;  %8975 = vst [vmem:[#allocation19_spill] sm:$0xff] %v6680_v13  ;;  %8976 = vst [vmem:[#allocation52_spill] sm:$0xff] %v6683_v10  ;;  %v6689_v27 = vpop.permute.xlu0 %4975  ;;  %v2966_v55 = vcombine.high %v6680_v13, %v8906_v43  ;;  %v6729_v58 = vrot.slane %v2047_v51, %v5559_v18  ;;  %v5034_v4 = vpack.i.bf16 %v2522_v61, %v1710_v44 }
 0x156   : > { %8981 = vst [vmem:[#allocation48_spill] sm:$0xff] %v6689_v27  ;;  %v8984_v27 = vld [vmem:[#allocation20_spill] sm:$0xff]  ;;  %v3387_v49 = vrot.slane %v3373_v53, %v5559_v18  ;;  %v3407_v13 = vcombine.high %v3403_v6, %v8906_v43  ;;  %v2064_v44 = vcombine.high %v6634_v41, %v6631_v15  ;;  %v2539_v61 = vcombine.low %v8978_v25, %v8977_v11 }
 0x157   : > { %v6697_v1 = vpop.permute.xlu1 %4970  ;;  %v4898_v38 = vunpack.i.h.bf16 %v8984_v27  ;;  %5020 = vrot.lane.b32.xlu0 %v5019_v26, %s5443_s6  ;;  %v4897_v24 = vunpack.i.l.bf16 %v8984_v27  ;;  %v6719_v26 = vrot.slane %v2524_v23, %v5535_v9  ;;  %v2081_v27 = vcombine.high %v6683_v10, %v8906_v43  ;;  %8987 = vst [vmem:[#allocation51_spill] sm:$0xff] %v6729_v58 }
 0x158   : > { %8982 = vst [vmem:[#allocation50_spill] sm:$0xff] %v6697_v1  ;;  %v1708_v23 = vcombine.high %v1690_v36, %v8906_v43  ;;  %v2949_v10 = vcombine.high %v8972_v63, %v8973_v0  ;;  %v8988_v1 = vld [vmem:[#allocation10_spill] sm:$0xff]  ;;  %v5044_v53 = vpack.i.bf16 %v6711_v31, %v3387_v49  ;;  %v3425_v41 = vcombine.high %v6329_v42, %v6393_v14 }
 0x159   : > { %5025 = vrot.lane.b32.xlu1 %v5024_v28, %s5445_s8  ;;  %v6721_v59 = vpop.permute.xlu0 %1082  ;;  %v6726_v28 = vrot.slane %v1226_v21, %v5559_v18  ;;  %v607_v21 = vsel %vm595_vm2, %v8988_v1, %v4908_v8  ;;  %v6743_v51 = vsel %vm595_vm2, %v8989_v57, %v4897_v24  ;;  %v8990_v36 = vld [vmem:[#allocation6_spill] sm:$0xff]  ;;  %v2523_v8 = vcombine.low %v8980_v50, %v8979_v20  ;;  %v8991_v1 = vld [vmem:[#allocation49_spill] sm:$0xff] }
 0x15a   : > { %v601_v6 = vsel %vm595_vm2, %v8990_v36, %v4898_v38  ;;  %v2571_v57 = vcombine.low %v6719_v26, %v6716_v39  ;;  %v5039_v63 = vpack.i.bf16 %v2966_v55, %v2081_v27  ;;  %v3409_v15 = vcombine.high %v6331_v40, %v6395_v30  ;;  %v8992_v38 = vld [vmem:[#allocation47_spill] sm:$0xff] }
 0x15b   : > { %8986 = vst [vmem:[#allocation45_spill] sm:$0xff] %v6726_v28  ;;  %v6731_v32 = vpop.permute.xlu1 %1090  ;;  %5030 = vrot.lane.b32.xlu0 %v5029_v12, %s5443_s6  ;;  %v1258_v0 = vcombine.high %v6726_v28, %v8906_v43  ;;  %v2079_v20 = vcombine.high %v6729_v58, %v8906_v43  ;;  %v5049_v11 = vpack.i.bf16 %v1708_v23, %v3407_v13  ;;  %v8999_v28 = vld [vmem:[#allocation30_spill] sm:$0xff]  ;;  %v9003_v58 = vunpack.i.l.bf16 %v8961_v35 }
 0x15c   : > { %v6771_v25 = vrot.slane %v2949_v10, %v5559_v18  ;;  %v2520_v50 = vcombine.high %v2502_v17, %v8906_v43  ;;  %v8993_v55 = vcombine.low %v8991_v1, %v8992_v38  ;;  %v1227_v27 = vcombine.high %v6654_v52, %v6647_v37 }
 0x15d   : > { %5035 = vrot.lane.b32.xlu1 %v5034_v4, %s5444_s7  ;;  %v6757_v24 = vpop.permute.xlu0 %1098  ;;  %v2048_v36 = vcombine.high %v6660_v7, %v6657_v56  ;;  %v2078_v13 = vrot.slane %v2064_v44, %v5559_v18  ;;  %v3405_v10 = vcombine.high %v3387_v49, %v8906_v43  ;;  %v6788_v17 = vrot.slane %v2539_v61, %v5535_v9  ;;  %v8996_v61 = vld [vmem:[#allocation32_spill] sm:$0xff] }
 0x15e   : > { %v6778_v12 = vrot.slane %v8993_v55, %v5559_v18  ;;  %v6791_v23 = vrot.slane %v2523_v8, %v5535_v9  ;;  %v3424_v37 = vcombine.low %v6329_v42, %v6393_v14  ;;  %v6801_v56 = vrot.slane %v3425_v41, %v5535_v9  ;;  %v8997_v8 = vld [vmem:[#allocation28_spill] sm:$0xff]  ;;  %v8998_v55 = vld [vmem:[#allocation33_spill] sm:$0xff] }
 0x15f   : > { %v6763_v4 = vpop.permute.xlu1 %1106  ;;  %5040 = vrot.lane.b32.xlu0 %v5039_v63, %s5445_s8  ;;  %v6794_v63 = vrot.slane %v2571_v57, %v5559_v18  ;;  %v3408_v7 = vcombine.low %v6331_v40, %v6395_v30  ;;  %v6806_v49 = vrot.slane %v3409_v15, %v5535_v9  ;;  %v823_v57 = vcombine.high %v8997_v8, %v8996_v61 }
 0x160   : > { %8994 = vst [vmem:[#allocation46_spill] sm:$0xff] %v6778_v12  ;;  %v839_v42 = vcombine.high %v8999_v28, %v8998_v55  ;;  %v2964_v14 = vcombine.high %v6778_v12, %v8906_v43  ;;  %v9000_v41 = vunpack.i.h.bf16 %v8983_v54  ;;  %v5059_v30 = vpack.i.bf16 %v6771_v25, %v2078_v13 }
 0x161   : > { %5045 = vrot.lane.b32.xlu1 %v5044_v53, %s5443_s6  ;;  %8995 = vst [vmem:[#allocation18_spill] sm:$0xff] %v6794_v63  ;;  %v6798_v52 = vpop.permute.xlu0 %3732  ;;  %v5054_v53 = vpack.i.bf16 %v2079_v20, %v1258_v0  ;;  %v5064_v15 = vpack.i.bf16 %v3405_v10, %v2520_v50  ;;  %v1241_v0 = vrot.slane %v1227_v27, %v5559_v18  ;;  %v9001_v10 = vld [vmem:[#allocation21_spill] sm:$0xff]  ;;  %v9002_v55 = vunpack.i.h.bf16 %v8961_v35 }
 0x162   : > { %v608_v40 = vsel %vm597_vm3, %v607_v21, %v9000_v41  ;;  %v6824_v20 = vrot.slane %v2048_v36, %v5559_v18  ;;  %v2555_v28 = vcombine.low %v6791_v23, %v6788_v17  ;;  %v6831_v61 = vrot.slane %v3424_v37, %v5535_v9 }
 0x163   : > { %v6808_v44 = vpop.permute.xlu1 %3740  ;;  %5050 = vrot.lane.b32.xlu0 %v5049_v11, %s5444_s7  ;;  %v2572_v11 = vcombine.high %v6719_v26, %v6716_v39  ;;  %v6838_v50 = vrot.slane %v3408_v7, %v5535_v9  ;;  %v3456_v27 = vcombine.low %v6806_v49, %v6801_v56  ;;  %v2100_v36 = vcombine.high %v6456_v2, %v6516_v5 }
 0x164   : > { %v2084_v39 = vcombine.high %v6458_v3, %v6518_v47  ;;  %v4913_v37 = vunpack.i.h.bf16 %v9001_v10  ;;  %v6850_v8 = vrot.slane %v839_v42, %v5535_v9  ;;  %v2933_v7 = vcombine.high %v8991_v1, %v8992_v38 }
 0x165   : > { %5055 = vrot.lane.b32.xlu1 %v5054_v53, %s5445_s8  ;;  %v6833_v21 = vpop.permute.xlu0 %3748  ;;  %v2589_v53 = vcombine.high %v6794_v63, %v8906_v43  ;;  %v602_v41 = vsel %vm597_vm3, %v601_v6, %v9002_v55  ;;  %v6859_v63 = vrot.slane %v823_v57, %v5535_v9  ;;  %v5074_v12 = vpack.i.bf16 %v6824_v20, %v1241_v0 }
 0x166   : > { %v1261_v42 = vcombine.high %v6711_v31, %v8906_v43  ;;  %v6870_v1 = vrot.slane %v2555_v28, %v5559_v18  ;;  %v6875_v57 = vrot.slane %v2572_v11, %v5559_v18  ;;  %v3440_v55 = vcombine.low %v6838_v50, %v6831_v61 }
 0x167   : > { %v6846_v26 = vpop.permute.xlu1 %3756  ;;  %5060 = vrot.lane.b32.xlu0 %v5059_v30, %s5443_s6  ;;  %v598_v30 = vsel %vm597_vm3, %v6743_v51, %v9003_v58  ;;  %v5069_v6 = vpack.i.bf16 %v2589_v53, %v2964_v14  ;;  %v6881_v31 = vrot.slane %v3456_v27, %v5559_v18  ;;  %v6884_v35 = vrot.slane %v2100_v36, %v5535_v9 }
 0x168   : > { %9004 = vst [vmem:[#allocation20_spill] sm:$0xff] %v6870_v1  ;;  %v6887_v58 = vrot.slane %v2084_v39, %v5535_v9  ;;  %v870_v28 = vcombine.low %v6859_v63, %v6850_v8  ;;  %v9007_v11 = vunpack.i.l.bf16 %v8983_v54  ;;  %v3120_v27 = vcombine.low %v6198_v34, %v6245_v45 }
 0x169   : > { %5065 = vrot.lane.b32.xlu1 %v5064_v15, %s5444_s7  ;;  %v6872_v38 = vpop.permute.xlu0 %2411  ;;  %v2082_v15 = vcombine.high %v2078_v13, %v8906_v43  ;;  %9006 = vst [vmem:[#allocation10_spill] sm:$0xff] %v6881_v31  ;;  %v2947_v13 = vrot.slane %v2933_v7, %v5559_v18  ;;  %v9008_v36 = vunpack.i.h.bf16 %v8968_v60  ;;  %v6916_v54 = vsel %vm599_vm4, %v608_v40, %v4913_v37 }
 0x16a   : > { %9005 = vst [vmem:[#allocation8_spill] sm:$0xff] %v6872_v38  ;;  %v6900_v53 = vsel %vm597_vm3, %v6706_v62, %v9007_v11  ;;  %9012 = vst [vmem:[#allocation49_spill] sm:$0xff] %v6916_v54  ;;  %v2967_v38 = vcombine.high %v6771_v25, %v8906_v43  ;;  %v2587_v40 = vcombine.high %v6870_v1, %v8906_v43 }
 0x16b   : > { %v6889_v51 = vpop.permute.xlu1 %2419  ;;  %5070 = vrot.lane.b32.xlu0 %v5069_v6, %s5445_s8  ;;  %v6908_v39 = vsel %vm599_vm4, %v602_v41, %v9008_v36  ;;  %v9010_v6 = vunpack.i.l.bf16 %v8968_v60  ;;  %v5084_v11 = vpack.i.bf16 %v6875_v57, %v2947_v13  ;;  %v5079_v14 = vpack.i.bf16 %v2082_v15, %v1261_v42  ;;  %v9016_v36 = vld [vmem:[#allocation27_spill] sm:$0xff] }
 0x16c   : > { %9009 = vst [vmem:[#allocation5_spill] sm:$0xff] %v6908_v39  ;;  %v6925_v41 = vrot.slane %v3440_v55, %v5559_v18  ;;  %v2131_v60 = vcombine.low %v6887_v58, %v6884_v35  ;;  %v3474_v37 = vcombine.high %v6881_v31, %v8906_v43  ;;  %v6936_v42 = vrot.slane %v870_v28, %v5559_v18  ;;  %v9015_v55 = vld [vmem:[#allocation31_spill] sm:$0xff] }
 0x16d   : > { %5075 = vrot.lane.b32.xlu1 %v5074_v12, %s5443_s6  ;;  %v6913_v7 = vsel %vm599_vm4, %v598_v30, %v9010_v6  ;;  %v6918_v62 = vpop.permute.xlu0 %2427  ;;  %v1259_v12 = vcombine.high %v1241_v0, %v8906_v43  ;;  %v2556_v25 = vcombine.high %v6791_v23, %v6788_v17  ;;  %v2965_v15 = vcombine.high %v2947_v13, %v8906_v43  ;;  %v9017_v23 = vld [vmem:[#allocation41_spill] sm:$0xff] }
 0x16e   : > { %9011 = vst [vmem:[#allocation6_spill] sm:$0xff] %v6913_v7  ;;  %9013 = vst [vmem:[#allocation47_spill] sm:$0xff] %v6925_v41  ;;  %v890_v6 = vcombine.low %v9016_v36, %v9015_v55  ;;  %v3457_v1 = vcombine.high %v6806_v49, %v6801_v56  ;;  %v2099_v28 = vcombine.low %v6456_v2, %v6516_v5 }
 0x16f   : > { %v6929_v30 = vpop.permute.xlu1 %2435  ;;  %9014 = vst [vmem:[#allocation32_spill] sm:$0xff] %v6936_v42  ;;  %5080 = vrot.lane.b32.xlu0 %v5079_v14, %s5444_s7  ;;  %v2083_v31 = vcombine.low %v6458_v3, %v6518_v47  ;;  %v891_v17 = vcombine.high %v9016_v36, %v9015_v55  ;;  %v9018_v14 = vld [vmem:[#allocation29_spill] sm:$0xff]  ;;  %v5089_v54 = vpack.i.bf16 %v1259_v12, %v2967_v38 }
 0x170   : > { %v906_v13 = vcombine.low %v9018_v14, %v9017_v23  ;;  %v2080_v56 = vcombine.high %v6824_v20, %v8906_v43  ;;  %v6962_v49 = vrot.slane %v2131_v60, %v5559_v18  ;;  %v5094_v3 = vpack.i.bf16 %v2587_v40, %v3474_v37 }
 0x171   : > { %5085 = vrot.lane.b32.xlu1 %v5084_v11, %s5443_s6  ;;  %v6957_v0 = vpop.permute.xlu0 %3296  ;;  %v3472_v5 = vcombine.high %v6925_v41, %v8906_v43  ;;  %v9020_v47 = vcombine.low %v6270_v19, %v6262_v29  ;;  %v907_v38 = vcombine.high %v9018_v14, %v9017_v23  ;;  %v888_v20 = vcombine.high %v6936_v42, %v8906_v43  ;;  %v9055_v41 = vld [vmem:[#allocation72_spill] sm:$0xff] }
 0x172   : > { %9019 = vst [vmem:[#allocation28_spill] sm:$0xff] %v6962_v49  ;;  %v6980_v12 = vrot.slane %v2556_v25, %v5559_v18  ;;  %v9022_v60 = vcombine.low %v6267_v33, %v6259_v22  ;;  %v6989_v29 = vrot.slane %v2099_v28, %v5535_v9  ;;  %v6992_v19 = vrot.slane %v2083_v31, %v5535_v9 }
 0x173   : > { %v6964_v2 = vpop.permute.xlu1 %3304  ;;  %v6972_v11 = vrot.slane %v9020_v47, %v5559_v18  ;;  %5090 = vrot.lane.b32.xlu0 %v5089_v54, %s5444_s7  ;;  %v3471_v54 = vrot.slane %v3457_v1, %v5559_v18  ;;  %v9024_v37 = vcombine.low %v6345_v16, %v6337_v46  ;;  %v7003_v22 = vrot.slane %v890_v6, %v5535_v9 }
 0x174   : > { %v6986_v40 = vrot.slane %v9022_v60, %v5559_v18  ;;  %v7006_v33 = vrot.slane %v891_v17, %v5535_v9  ;;  %v7009_v55 = vrot.slane %v3120_v27, %v5535_v9  ;;  %v5099_v36 = vpack.i.bf16 %v2965_v15, %v2080_v56 }
 0x175   : > { %9021 = vst [vmem:[#allocation33_spill] sm:$0xff] %v6972_v11  ;;  %5095 = vrot.lane.b32.xlu1 %v5094_v3, %s5445_s8  ;;  %v7000_v25 = vrot.slane %v9024_v37, %v5559_v18  ;;  %v7011_v31 = vpop.permute.xlu0 %3312  ;;  %v7014_v1 = vrot.slane %v906_v13, %v5535_v9  ;;  %v5104_v23 = vpack.i.bf16 %v888_v20, %v3472_v5 }
 0x176   : > { %9023 = vst [vmem:[#allocation30_spill] sm:$0xff] %v6986_v40  ;;  %v1777_v14 = vcombine.high %v6972_v11, %v8906_v43  ;;  %v2149_v6 = vcombine.high %v6962_v49, %v8906_v43  ;;  %v7023_v17 = vrot.slane %v907_v38, %v5535_v9  ;;  %v3441_v27 = vcombine.high %v6838_v50, %v6831_v61  ;;  %v9054_v49 = vld [vmem:[#allocation68_spill] sm:$0xff] }
 0x177   : > { %9025 = vst [vmem:[#allocation21_spill] sm:$0xff] %v7000_v25  ;;  %v7016_v28 = vpop.permute.xlu1 %3320  ;;  %5100 = vrot.lane.b32.xlu0 %v5099_v36, %s5444_s7  ;;  %v2590_v15 = vcombine.high %v6875_v57, %v8906_v43  ;;  %v1775_v13 = vcombine.high %v6986_v40, %v8906_v43  ;;  %v2115_v56 = vcombine.low %v6992_v19, %v6989_v29 }
 0x178   : > { %v5109_v3 = vpack.i.bf16 %v6980_v12, %v3471_v54  ;;  %v3475_v5 = vcombine.high %v3471_v54, %v8906_v43  ;;  %v3034_v61 = vcombine.high %v7000_v25, %v8906_v43  ;;  %v1278_v50 = vcombine.low %v6731_v32, %v6763_v4  ;;  %v9026_v54 = vld [vmem:[#allocation44_spill] sm:$0xff] }
 0x179   : > { %5105 = vrot.lane.b32.xlu1 %v5104_v23, %s5445_s8  ;;  %v1279_v57 = vcombine.high %v6731_v32, %v6763_v4  ;;  %v1262_v47 = vcombine.low %v6721_v59, %v6757_v24  ;;  %v1263_v38 = vcombine.high %v6721_v59, %v6757_v24  ;;  %v7047_v20 = vpop.permute.xlu0 %1084  ;;  %v871_v60 = vcombine.high %v6859_v63, %v6850_v8  ;;  %v9027_v63 = vld [vmem:[#allocation13_spill] sm:$0xff]  ;;  %v9028_v8 = vld [vmem:[#allocation14_spill] sm:$0xff] }
 0x17a   : > { %v3104_v37 = vcombine.low %v9026_v54, %v6234_v48  ;;  %v2132_v36 = vcombine.high %v6887_v58, %v6884_v35  ;;  %v5114_v32 = vpack.i.bf16 %v2149_v6, %v1777_v14  ;;  %v922_v4 = vcombine.low %v7003_v22, %v7014_v1 }
 0x17b   : > { %v7055_v23 = vpop.permute.xlu1 %1092  ;;  %v938_v59 = vcombine.low %v7006_v33, %v7023_v17  ;;  %v3105_v24 = vcombine.high %v9026_v54, %v6234_v48  ;;  %5110 = vrot.lane.b32.xlu0 %v5109_v3, %s5443_s6  ;;  %v9029_v40 = vcombine.low %v9027_v63, %v9028_v8  ;;  %v7071_v35 = vrot.slane %v2115_v56, %v5559_v18 }
 0x17c   : > { %v5119_v58 = vpack.i.bf16 %v3475_v5, %v2590_v15  ;;  %v5124_v14 = vpack.i.bf16 %v1775_v13, %v3034_v61  ;;  %v3455_v6 = vrot.slane %v3441_v27, %v5559_v18  ;;  %v7076_v42 = vrot.slane %v1278_v50, %v5535_v9 }
 0x17d   : > { %v7068_v11 = vrot.slane %v9029_v40, %v5559_v18  ;;  %9031 = vst [vmem:[#allocation27_spill] sm:$0xff] %v7071_v35  ;;  %5115 = vrot.lane.b32.xlu1 %v5114_v32, %s5445_s8  ;;  %v7079_v48 = vrot.slane %v1279_v57, %v5535_v9  ;;  %v7082_v3 = vrot.slane %v1262_v47, %v5535_v9  ;;  %v7087_v56 = vpop.permute.xlu0 %1100 }
 0x17e   : > { %v7085_v40 = vrot.slane %v1263_v38, %v5535_v9  ;;  %v9032_v15 = vcombine.high %v6198_v34, %v6245_v45  ;;  %v7096_v27 = vrot.slane %v3104_v37, %v5535_v9  ;;  %v885_v61 = vrot.slane %v871_v60, %v5559_v18 }
 0x17f   : > { %9030 = vst [vmem:[#allocation31_spill] sm:$0xff] %v7068_v11  ;;  %v7098_v5 = vpop.permute.xlu1 %1108  ;;  %v7102_v50 = vrot.slane %v2132_v36, %v5559_v18  ;;  %v923_v57 = vcombine.high %v7003_v22, %v7014_v1  ;;  %v7107_v47 = vrot.slane %v3105_v24, %v5535_v9  ;;  %5120 = vrot.lane.b32.xlu0 %v5119_v58, %s5444_s7  ;;  %v9035_v36 = vld [vmem:[#allocation53_spill] sm:$0xff] }
 0x180   : > { %v7093_v13 = vrot.slane %v9032_v15, %v5535_v9  ;;  %v3017_v34 = vcombine.high %v6345_v16, %v6337_v46  ;;  %v3001_v45 = vcombine.high %v9027_v63, %v9028_v8  ;;  %v7115_v38 = vrot.slane %v922_v4, %v5559_v18  ;;  %v9036_v63 = vld [vmem:[#allocation36_spill] sm:$0xff] }
 0x181   : > { %v939_v60 = vcombine.high %v7006_v33, %v7023_v17  ;;  %v7120_v54 = vrot.slane %v938_v59, %v5559_v18  ;;  %5125 = vrot.lane.b32.xlu1 %v5124_v14, %s5445_s8  ;;  %v3032_v22 = vcombine.high %v7068_v11, %v8906_v43  ;;  %v1294_v46 = vcombine.low %v7082_v3, %v7076_v42  ;;  %v7129_v1 = vpop.permute.xlu0 %1971 }
 0x182   : > { %9033 = vst [vmem:[#allocation41_spill] sm:$0xff] %v7115_v38  ;;  %v1310_v16 = vcombine.low %v7085_v40, %v7079_v48  ;;  %v5129_v37 = vpack.i.bf16 %v885_v61, %v3455_v6  ;;  %v2147_v33 = vcombine.high %v7071_v35, %v8906_v43  ;;  %v5134_v32 = vpack.i.bf16 %v7102_v50, %v9035_v36 }
 0x183   : > { %9034 = vst [vmem:[#allocation29_spill] sm:$0xff] %v7120_v54  ;;  %v7133_v17 = vpop.permute.xlu1 %1979  ;;  %v2588_v4 = vcombine.high %v6980_v12, %v8906_v43  ;;  %v3473_v59 = vcombine.high %v3455_v6, %v8906_v43  ;;  %v889_v24 = vcombine.high %v885_v61, %v8906_v43  ;;  %v7143_v8 = vcombine.high %v9036_v63, %v8906_v43 }
 0x184   : > { %5130 = vrot.lane.b32.xlu0 %v5129_v37, %s5443_s6  ;;  %v3031_v58 = vrot.slane %v3017_v34, %v5559_v18  ;;  %v7148_v14 = vrot.slane %v3001_v45, %v5559_v18  ;;  %v9037_v15 = vunpack.i.l.bf16 %v9001_v10  ;;  %v2116_v6 = vcombine.high %v6992_v19, %v6989_v29 }
 0x185   : > { %5135 = vrot.lane.b32.xlu1 %v5134_v32, %s5443_s6  ;;  %v7161_v61 = vcombine.high %v7120_v54, %v8906_v43  ;;  %v7165_v34 = vcombine.high %v7115_v38, %v8906_v43  ;;  %v7168_v45 = vrot.slane %v939_v60, %v5559_v18  ;;  %v7176_v29 = vrot.slane %v1310_v16, %v5559_v18  ;;  %v7178_v19 = vpop.permute.xlu0 %1987  ;;  %v9043_v60 = vld [vmem:[#allocation59_spill] sm:$0xff]  ;;  %v9046_v16 = vld [vmem:[#allocation60_spill] sm:$0xff] }
 0x186   : > { %v7154_v12 = vsel %vm599_vm4, %v6900_v53, %v9037_v15  ;;  %v7173_v53 = vrot.slane %v1294_v46, %v5559_v18  ;;  %v5139_v37 = vpack.i.bf16 %v3032_v22, %v2147_v33  ;;  %v5144_v63 = vpack.i.bf16 %v3473_v59, %v2588_v4  ;;  %v9045_v46 = vld [vmem:[#allocation54_spill] sm:$0xff] }
 0x187   : > { %9038 = vst [vmem:[#allocation44_spill] sm:$0xff] %v7154_v12  ;;  %9039 = vst [vmem:[#allocation13_spill] sm:$0xff] %v7165_v34  ;;  %v7182_v32 = vpop.permute.xlu1 %1995  ;;  %v5154_v15 = vpack.i.bf16 %v9043_v60, %v889_v24  ;;  %v7186_v38 = vrot.slane %v923_v57, %v5559_v18  ;;  %v5149_v10 = vpack.i.bf16 %v9045_v46, %v3031_v58  ;;  %v9047_v57 = vld [vmem:[#allocation61_spill] sm:$0xff]  ;;  %v9048_v24 = vld [vmem:[#allocation62_spill] sm:$0xff] }
 0x188   : > { %9040 = vst [vmem:[#allocation14_spill] sm:$0xff] %v7168_v45  ;;  %9041 = vst [vmem:[#allocation53_spill] sm:$0xff] %v7173_v53  ;;  %5140 = vrot.lane.b32.xlu0 %v5139_v37, %s5445_s8  ;;  %v3035_v22 = vcombine.high %v3031_v58, %v8906_v43  ;;  %v7195_v33 = vcombine.high %v7148_v14, %v8906_v43  ;;  %v2130_v4 = vrot.slane %v2116_v6, %v5559_v18  ;;  %v9057_v12 = vld [vmem:[#allocation69_spill] sm:$0xff] }
 0x189   : > { %9042 = vst [vmem:[#allocation36_spill] sm:$0xff] %v7176_v29  ;;  %9044 = vst [vmem:[#allocation59_spill] sm:$0xff] %v7186_v38  ;;  %5145 = vrot.lane.b32.xlu1 %v5144_v63, %s5444_s7  ;;  %v3797_v58 = vcombine.high %v6808_v44, %v6846_v26  ;;  %v3781_v36 = vcombine.high %v6798_v52, %v6833_v21  ;;  %v7209_v54 = vpop.permute.xlu0 %3734  ;;  %v1326_v6 = vcombine.high %v7173_v53, %v8906_v43 }
 0x18a   : > { %9050 = vst [vmem:[#allocation54_spill] sm:$0xff] %v7209_v54  ;;  %v1328_v63 = vcombine.high %v7176_v29, %v8906_v43  ;;  %v3493_v37 = vcombine.high %v6964_v2, %v7016_v28  ;;  %v3477_v46 = vcombine.high %v6957_v0, %v7011_v31  ;;  %v7223_v35 = vcombine.high %v7168_v45, %v8906_v43 }
 0x18b   : > { %v7219_v59 = vpop.permute.xlu1 %3742  ;;  %v1295_v53 = vcombine.high %v7082_v3, %v7076_v42  ;;  %v7232_v29 = vcombine.high %v7186_v38, %v8906_v43  ;;  %v3085_v54 = vcombine.high %v9055_v41, %v9054_v49  ;;  %v1311_v39 = vcombine.high %v7085_v40, %v7079_v48  ;;  %v9058_v42 = vld [vmem:[#allocation8_spill] sm:$0xff] }
 0x18c   : > { %9051 = vst [vmem:[#allocation60_spill] sm:$0xff] %v7219_v59  ;;  %5150 = vrot.lane.b32.xlu0 %v5149_v10, %s5443_s6  ;;  %v9056_v59 = vld [vmem:[#allocation66_spill] sm:$0xff]  ;;  %v2608_v25 = vcombine.high %v6889_v51, %v6929_v30  ;;  %v2592_v3 = vcombine.high %v9058_v42, %v6918_v62  ;;  %v5164_v10 = vpack.i.bf16 %v7148_v14, %v2130_v4 }
 0x18d   : > { %9053 = vst [vmem:[#allocation61_spill] sm:$0xff] %v7232_v29  ;;  %v3069_v7 = vcombine.high %v9057_v12, %v9056_v59  ;;  %5155 = vrot.lane.b32.xlu1 %v5154_v15, %s5444_s7  ;;  %v7247_v38 = vrot.slane %v3797_v58, %v5535_v9  ;;  %v7250_v11 = vrot.slane %v3781_v36, %v5535_v9  ;;  %v7252_v45 = vpop.permute.xlu0 %3750 }
 0x18e   : > { %v5159_v60 = vpack.i.bf16 %v1326_v6, %v1328_v63  ;;  %v2150_v48 = vcombine.high %v7102_v50, %v8906_v43  ;;  %v7257_v40 = vrot.slane %v3493_v37, %v5535_v9  ;;  %v7260_v34 = vrot.slane %v3477_v46, %v5535_v9 }
 0x18f   : > { %v7262_v15 = vpop.permute.xlu1 %3758  ;;  %v2148_v14 = vcombine.high %v2130_v4, %v8906_v43  ;;  %v9059_v36 = vcombine.low %v9055_v41, %v9054_v49  ;;  %v1309_v50 = vrot.slane %v1295_v53, %v5559_v18  ;;  %v9061_v37 = vcombine.low %v9057_v12, %v9056_v59 }
 0x190   : > { %5160 = vrot.lane.b32.xlu0 %v5159_v60, %s5445_s8  ;;  %v7280_v6 = vrot.slane %v3085_v54, %v5559_v18  ;;  %v7283_v4 = vrot.slane %v3069_v7, %v5559_v18  ;;  %v3780_v41 = vcombine.low %v6798_v52, %v6833_v21  ;;  %v7288_v49 = vrot.slane %v2608_v25, %v5535_v9  ;;  %v9064_v52 = vld [vmem:[#allocation63_spill] sm:$0xff] }
 0x191   : > { %v7269_v58 = vrot.slane %v9059_v36, %v5559_v18  ;;  %v7277_v46 = vrot.slane %v9061_v37, %v5559_v18  ;;  %v7291_v53 = vrot.slane %v2592_v3, %v5535_v9  ;;  %5165 = vrot.lane.b32.xlu1 %v5164_v10, %s5443_s6  ;;  %v1325_v12 = vrot.slane %v1311_v39, %v5559_v18  ;;  %v7299_v59 = vpop.permute.xlu0 %2413  ;;  %v9066_v10 = vld [vmem:[#allocation43_spill] sm:$0xff] }
 0x192   : > { %9063 = vst [vmem:[#allocation72_spill] sm:$0xff] %v7283_v4  ;;  %v3796_v54 = vcombine.low %v6808_v44, %v6846_v26  ;;  %v3828_v7 = vcombine.low %v7250_v11, %v7247_v38  ;;  %v5169_v60 = vpack.i.bf16 %v3035_v22, %v2150_v48  ;;  %v3524_v25 = vcombine.low %v7260_v34, %v7257_v40 }
 0x193   : > { %9060 = vst [vmem:[#allocation62_spill] sm:$0xff] %v7269_v58  ;;  %9062 = vst [vmem:[#allocation68_spill] sm:$0xff] %v7277_v46  ;;  %v7305_v63 = vpop.permute.xlu1 %2421  ;;  %v5184_v3 = vpack.i.bf16 %v7195_v33, %v2148_v14  ;;  %v7310_v39 = vcombine.high %v7269_v58, %v8906_v43  ;;  %v4958_v36 = vunpack.i.h.bf16 %v9066_v10  ;;  %v4957_v22 = vunpack.i.l.bf16 %v9066_v10 }
 0x194   : > { %5170 = vrot.lane.b32.xlu0 %v5169_v60, %s5444_s7  ;;  %v7319_v48 = vcombine.high %v7277_v46, %v8906_v43  ;;  %v7323_v33 = vcombine.high %v7280_v6, %v8906_v43  ;;  %v7326_v14 = vrot.slane %v3780_v41, %v5535_v9  ;;  %v2639_v37 = vcombine.low %v7291_v53, %v7288_v49 }
 0x195   : > { %v9069_v10 = vpack.i.bf16 %v9046_v16, %v7143_v8  ;;  %v5179_v60 = vpack.i.bf16 %v1309_v50, %v1325_v12  ;;  %v7336_v26 = vcombine.high %v7283_v4, %v8906_v43  ;;  %v7339_v21 = vrot.slane %v3796_v54, %v5535_v9  ;;  %v7345_v58 = vpop.permute.xlu0 %2429  ;;  %v9072_v8 = vld [vmem:[#allocation73_spill] sm:$0xff] }
 0x196   : > { %9067 = vst [vmem:[#allocation66_spill] sm:$0xff] %v7319_v48  ;;  %9068 = vst [vmem:[#allocation69_spill] sm:$0xff] %v7323_v33  ;;  %v3492_v41 = vcombine.low %v6964_v2, %v7016_v28  ;;  %v3476_v46 = vcombine.low %v6957_v0, %v7011_v31  ;;  %v7348_v33 = vrot.slane %v3828_v7, %v5559_v18  ;;  %v4943_v16 = vunpack.i.h.bf16 %v9072_v8  ;;  %v9075_v2 = vld [vmem:[#allocation35_spill] sm:$0xff]  ;;  %v9076_v0 = vld [vmem:[#allocation34_spill] sm:$0xff] }
 0x197   : > { %5175 = vrot.lane.b32.xlu1 %v9069_v10, %s5444_s7  ;;  %9070 = vst [vmem:[#allocation8_spill] sm:$0xff] %v7336_v26  ;;  %v9073_v10 = vld [vmem:[#allocation74_spill] sm:$0xff]  ;;  %v7354_v54 = vrot.slane %v3524_v25, %v5559_v18  ;;  %v7356_v4 = vpop.permute.xlu1 %2437  ;;  %v1057_v28 = vsel %vm595_vm2, %v9075_v2, %v4958_v36  ;;  %v1054_v31 = vsel %vm595_vm2, %v9076_v0, %v4957_v22  ;;  %v9077_v26 = vld [vmem:[#allocation17_spill] sm:$0xff] }
 0x198   : > { %9071 = vst [vmem:[#allocation63_spill] sm:$0xff] %v7348_v33  ;;  %v2607_v7 = vcombine.low %v6889_v51, %v6929_v30  ;;  %v2591_v44 = vcombine.low %v9058_v42, %v6918_v62  ;;  %5180 = vrot.lane.b32.xlu0 %v5179_v60, %s5443_s6  ;;  %v4963_v29 = vunpack.i.h.bf16 %v9077_v26  ;;  %v7369_v25 = vrot.slane %v2639_v37, %v5559_v18  ;;  %v9080_v37 = vld [vmem:[#allocation16_spill] sm:$0xff] }
 0x199   : > { %9074 = vst [vmem:[#allocation43_spill] sm:$0xff] %v7354_v54  ;;  %v1327_v36 = vcombine.high %v1309_v50, %v8906_v43  ;;  %v1329_v2 = vcombine.high %v1325_v12, %v8906_v43  ;;  %v3812_v22 = vcombine.low %v7326_v14, %v7339_v21  ;;  %v7377_v51 = vrot.slane %v3492_v41, %v5535_v9  ;;  %v7382_v30 = vpop.permute.xlu0 %3298  ;;  %v9081_v50 = vld [vmem:[#allocation80_spill] sm:$0xff] }
 0x19a   : > { %9078 = vst [vmem:[#allocation73_spill] sm:$0xff] %v7369_v25  ;;  %v7380_v62 = vrot.slane %v3476_v46, %v5535_v9  ;;  %9079 = vst [vmem:[#allocation74_spill] sm:$0xff] %v7382_v30  ;;  %v3846_v42 = vcombine.high %v7348_v33, %v8906_v43  ;;  %v3542_v12 = vcombine.high %v7354_v54, %v8906_v43  ;;  %v4962_v46 = vunpack.i.l.bf16 %v9077_v26 }
 0x19b   : > { %5185 = vrot.lane.b32.xlu1 %v5184_v3, %s5444_s7  ;;  %v4942_v3 = vunpack.i.l.bf16 %v9072_v8  ;;  %v7388_v60 = vpop.permute.xlu1 %3306  ;;  %v3153_v41 = vcombine.high %v7107_v47, %v7093_v13  ;;  %v7396_v0 = vrot.slane %v2607_v7, %v5535_v9  ;;  %v7399_v48 = vrot.slane %v2591_v44, %v5535_v9 }
 0x19c   : > { %4065 = vrot.lane.b32.xlu0 %v3846_v42, %s5445_s8  ;;  %v1058_v8 = vsel %vm597_vm3, %v1057_v28, %v4943_v16  ;;  %v4968_v33 = vunpack.i.h.bf16 %v9081_v50  ;;  %v9082_v54 = vpack.i.bf16 %v9047_v57, %v7161_v61  ;;  %v2657_v26 = vcombine.high %v7369_v25, %v8906_v43 }
 0x19d   : > { %v1055_v7 = vsel %vm597_vm3, %v1054_v31, %v4942_v3  ;;  %v3137_v44 = vcombine.high %v7096_v27, %v7009_v55  ;;  %v3508_v42 = vcombine.low %v7380_v62, %v7377_v51  ;;  %v7415_v30 = vpop.permute.xlu0 %3314  ;;  %v5194_v16 = vpack.i.bf16 %v1327_v36, %v1329_v2 }
 0x19e   : > { %v7418_v28 = vrot.slane %v3812_v22, %v5559_v18  ;;  %v7421_v61 = vsel %vm599_vm4, %v1058_v8, %v4963_v29  ;;  %v3829_v57 = vcombine.high %v7250_v11, %v7247_v38  ;;  %v5199_v31 = vpack.i.bf16 %v3542_v12, %v2657_v26 }
 0x19f   : > { %5190 = vrot.lane.b32.xlu1 %v9082_v54, %s5445_s8  ;;  %v7425_v54 = vpop.permute.xlu1 %3322  ;;  %v9084_v3 = vcombine.low %v7107_v47, %v7093_v13  ;;  %v7434_v36 = vrot.slane %v3153_v41, %v5559_v18  ;;  %v4967_v2 = vunpack.i.l.bf16 %v9081_v50  ;;  %v2623_v29 = vcombine.low %v7399_v48, %v7396_v0  ;;  %v9088_v47 = vld [vmem:[#allocation39_spill] sm:$0xff] }
 0x1a0   : > { %9083 = vst [vmem:[#allocation35_spill] sm:$0xff] %v7418_v28  ;;  %5195 = vrot.lane.b32.xlu0 %v5194_v16, %s5444_s7  ;;  %v7441_v11 = vsel %vm599_vm4, %v1055_v7, %v4962_v46  ;;  %v9086_v38 = vcombine.low %v7096_v27, %v7009_v55  ;;  %v1063_v22 = vsel %vm595_vm2, %v9088_v47, %v4968_v33 }
 0x1a1   : > { %v7431_v25 = vrot.slane %v9084_v3, %v5559_v18  ;;  %v3525_v50 = vcombine.high %v7260_v34, %v7257_v40  ;;  %v7456_v41 = vrot.slane %v3137_v44, %v5559_v18  ;;  %v7459_v46 = vrot.slane %v3508_v42, %v5559_v18  ;;  %v7465_v33 = vpop.permute.xlu0 %1973  ;;  %v9091_v42 = vld [vmem:[#allocation37_spill] sm:$0xff] }
 0x1a2   : > { %v7447_v13 = vrot.slane %v9086_v38, %v5559_v18  ;;  %v2168_v55 = vcombine.high %v7133_v17, %v7182_v32  ;;  %v2152_v27 = vcombine.high %v7129_v1, %v7178_v19  ;;  %v3844_v34 = vcombine.high %v7418_v28, %v8906_v43  ;;  %v9100_v28 = vld [vmem:[#allocation14_spill] sm:$0xff] }
 0x1a3   : > { %9085 = vst [vmem:[#allocation34_spill] sm:$0xff] %v7431_v25  ;;  %5200 = vrot.lane.b32.xlu1 %v5199_v31, %s5445_s8  ;;  %9089 = vst [vmem:[#allocation80_spill] sm:$0xff] %v7456_v41  ;;  %v1347_v40 = vcombine.high %v7055_v23, %v7098_v5  ;;  %v1331_v8 = vcombine.high %v7047_v20, %v7087_v56  ;;  %v7473_v26 = vpop.permute.xlu1 %1981  ;;  %v3843_v7 = vrot.slane %v3829_v57, %v5559_v18  ;;  %v9092_v31 = vld [vmem:[#allocation50_spill] sm:$0xff] }
 0x1a4   : > { %9087 = vst [vmem:[#allocation17_spill] sm:$0xff] %v7447_v13  ;;  %9090 = vst [vmem:[#allocation39_spill] sm:$0xff] %v7459_v46  ;;  %v1060_v16 = vsel %vm595_vm2, %v9091_v42, %v4967_v2  ;;  %v4973_v3 = vunpack.i.h.bf16 %v9092_v31  ;;  %v4972_v38 = vunpack.i.l.bf16 %v9092_v31  ;;  %v7482_v47 = vrot.slane %v2623_v29, %v5559_v18  ;;  %4053 = vrot.lane.b32.xlu0 %v3844_v34, %s5445_s8  ;;  %v9096_v31 = vld [vmem:[#allocation13_spill] sm:$0xff] }
 0x1a5   : > { %v2640_v12 = vcombine.high %v7291_v53, %v7288_v49  ;;  %v1330_v57 = vcombine.low %v7047_v20, %v7087_v56  ;;  %v7491_v44 = vrot.slane %v3525_v50, %v5559_v18  ;;  %v9094_v2 = vunpack.i.h.bf16 %v9073_v10  ;;  %v7504_v53 = vpop.permute.xlu0 %1989 }
 0x1a6   : > { %9093 = vst [vmem:[#allocation37_spill] sm:$0xff] %v7482_v47  ;;  %v1346_v29 = vcombine.low %v7055_v23, %v7098_v5  ;;  %v7499_v34 = vrot.slane %v2168_v55, %v5535_v9  ;;  %v7502_v49 = vrot.slane %v2152_v27, %v5535_v9  ;;  %v3540_v20 = vcombine.high %v7459_v46, %v8906_v43  ;;  %v9095_v55 = vld [vmem:[#allocation48_spill] sm:$0xff] }
 0x1a7   : > { %4069 = vrot.lane.b32.xlu1 %v3843_v7, %s5443_s6  ;;  %v1064_v42 = vsel %vm597_vm3, %v1063_v22, %v9094_v2  ;;  %v7509_v56 = vrot.slane %v1347_v40, %v5535_v9  ;;  %v7512_v50 = vrot.slane %v1331_v8, %v5535_v9  ;;  %v2167_v23 = vcombine.low %v7133_v17, %v7182_v32  ;;  %v7518_v22 = vpop.permute.xlu1 %1997  ;;  %v9099_v32 = vld [vmem:[#allocation57_spill] sm:$0xff] }
 0x1a8   : > { %v2151_v5 = vcombine.low %v7129_v1, %v7178_v19  ;;  %v4978_v27 = vunpack.i.h.bf16 %v9095_v55  ;;  %v9097_v2 = vpack.i.bf16 %v9048_v24, %v9096_v31  ;;  %v2655_v40 = vcombine.high %v7482_v47, %v8906_v43  ;;  %v9112_v47 = vld [vmem:[#allocation49_spill] sm:$0xff] }
 0x1a9   : > { %v1065_v8 = vsel %vm599_vm4, %v1064_v42, %v4973_v3  ;;  %v9098_v46 = vunpack.i.l.bf16 %v9073_v10  ;;  %v3813_v1 = vcombine.high %v7326_v14, %v7339_v21  ;;  %v3509_v19 = vcombine.high %v7380_v62, %v7377_v51  ;;  %v7545_v21 = vpop.permute.xlu0 %3736 }
 0x1aa   : > { %5205 = vrot.lane.b32.xlu0 %v9097_v2, %s5445_s8  ;;  %v9101_v24 = vpack.i.bf16 %v9099_v32, %v9100_v28  ;;  %v2654_v31 = vrot.slane %v2640_v12, %v5559_v18  ;;  %v1354_v3 = vrot.slane %v1346_v29, %v5535_v9  ;;  %v1338_v10 = vrot.slane %v1330_v57, %v5535_v9 }
 0x1ab   : > { %v1061_v17 = vsel %vm597_vm3, %v1060_v16, %v9098_v46  ;;  %v2199_v46 = vcombine.low %v7502_v49, %v7499_v34  ;;  %v5214_v14 = vpack.i.bf16 %v3540_v20, %v2655_v40  ;;  %v1378_v51 = vcombine.low %v7512_v50, %v7509_v56  ;;  %v7555_v12 = vpop.permute.xlu1 %3744  ;;  %v9103_v20 = vld [vmem:[#allocation38_spill] sm:$0xff] }
 0x1ac   : > { %5210 = vrot.lane.b32.xlu1 %v9101_v24, %s5443_s6  ;;  %v1062_v2 = vsel %vm599_vm4, %v1061_v17, %v4972_v38  ;;  %v7550_v62 = vrot.slane %v2167_v23, %v5535_v9  ;;  %v7553_v28 = vrot.slane %v2151_v5, %v5535_v9  ;;  %v5219_v16 = vpack.i.bf16 %v7491_v44, %v2654_v31 }
 0x1ad   : > { %v7561_v38 = vcombine.high %v7431_v25, %v8906_v43  ;;  %v4183_v57 = vrot.slane %v1065_v8, 4  ;;  %v7565_v42 = vcombine.high %v7447_v13, %v8906_v43  ;;  %v7569_v29 = vcombine.high %v7456_v41, %v8906_v43  ;;  %v7583_v24 = vpop.permute.xlu0 %3752 }
 0x1ae   : > { %5215 = vrot.lane.b32.xlu0 %v5214_v14, %s5445_s8  ;;  %v1946_v23 = vsel %vm595_vm2, %v9103_v20, %v4978_v27  ;;  %v2624_v5 = vcombine.high %v7399_v48, %v7396_v0  ;;  %v4182_v40 = vrot.slane %v1062_v2, 4  ;;  %v7578_v8 = vcombine.high %v7434_v36, %v8906_v43  ;;  %v9107_v20 = vld [vmem:[#allocation5_spill] sm:$0xff] }
 0x1af   : > { %9102 = vst [vmem:[#allocation50_spill] sm:$0xff] %v7569_v29  ;;  %v1362_v17 = vcombine.low %v1338_v10, %v1354_v3  ;;  %v7581_v32 = vrot.slane %v2199_v46, %v5559_v18  ;;  %v3827_v14 = vrot.slane %v3813_v1, %v5559_v18  ;;  %v9106_v27 = vrot.slane %v7421_v61, 4 }
 0x1b0   : > { %5220 = vrot.lane.b32.xlu1 %v5219_v16, %s5443_s6  ;;  %9104 = vst [vmem:[#allocation13_spill] sm:$0xff] %v7578_v8  ;;  %v7593_v0 = vrot.slane %v1378_v51, %v5559_v18  ;;  %v2183_v2 = vcombine.low %v7553_v28, %v7550_v62  ;;  %v7597_v16 = vpop.permute.xlu1 %3760  ;;  %v3847_v46 = vcombine.high %v3843_v7, %v8906_v43  ;;  %v9109_v61 = vunpack.i.h.bf16 %v9080_v37 }
 0x1b1   : > { %9105 = vst [vmem:[#allocation57_spill] sm:$0xff] %v7581_v32  ;;  %v7590_v48 = vsel %vm4268_vm5, %v9107_v20, %v9106_v27  ;;  %v3523_v13 = vrot.slane %v3509_v19, %v5559_v18  ;;  %v2200_v1 = vcombine.high %v7502_v49, %v7499_v34  ;;  %v9110_v51 = vrot.slane %v7441_v11, 4  ;;  %v9111_v20 = vld [vmem:[#allocation6_spill] sm:$0xff] }
 0x1b2   : > { %9108 = vst [vmem:[#allocation14_spill] sm:$0xff] %v7593_v0  ;;  %4057 = vrot.lane.b32.xlu0 %v3827_v14, %s5443_s6  ;;  %v7607_v27 = vsel %vm597_vm3, %v1946_v23, %v9109_v61  ;;  %v7617_v7 = vsel %vm4268_vm5, %v9112_v47, %v4183_v57  ;;  %v1363_v19 = vcombine.high %v1338_v10, %v1354_v3  ;;  %v9113_v23 = vld [vmem:[#allocation44_spill] sm:$0xff]  ;;  %v9118_v10 = vld [vmem:[#allocation54_spill] sm:$0xff] }
 0x1b3   : > { %v7613_v25 = vsel %vm4268_vm5, %v9111_v20, %v9110_v51  ;;  %v1379_v34 = vcombine.high %v7512_v50, %v7509_v56  ;;  %v2638_v49 = vrot.slane %v2624_v5, %v5559_v18  ;;  %v7625_v61 = vsel %vm4268_vm5, %v9113_v23, %v4182_v40  ;;  %v7630_v51 = vpop.permute.xlu0 %3738  ;;  %v9121_v20 = vld [vmem:[#allocation58_spill] sm:$0xff]  ;;  %v9122_v23 = vld [vmem:[#allocation59_spill] sm:$0xff] }
 0x1b4   : > { %4073 = vrot.lane.b32.xlu1 %v3847_v46, %s5444_s7  ;;  %9114 = vst [vmem:[#allocation38_spill] sm:$0xff] %v7625_v61  ;;  %v7628_v11 = vrot.slane %v1362_v17, %v5559_v18  ;;  %9116 = vst [vmem:[#allocation6_spill] sm:$0xff] %v7630_v51  ;;  %v2217_v47 = vcombine.high %v7581_v32, %v8906_v43  ;;  %v3543_v3 = vcombine.high %v7491_v44, %v8906_v43  ;;  %v7644_v5 = vpop.permute.xlu1 %3746  ;;  %v9120_v46 = vld [vmem:[#allocation60_spill] sm:$0xff] }
 0x1b5   : > { %v7637_v56 = vcombine.high %v3827_v14, %v8906_v43  ;;  %v7640_v50 = vrot.slane %v2183_v2, %v5559_v18  ;;  %v3848_v57 = vcombine.low %v9118_v10, %v7252_v45  ;;  %9119 = vst [vmem:[#allocation44_spill] sm:$0xff] %v7644_v5  ;;  %v1396_v40 = vcombine.high %v7593_v0, %v8906_v43 }
 0x1b6   : > { %9115 = vst [vmem:[#allocation5_spill] sm:$0xff] %v7628_v11  ;;  %v7649_v17 = vcombine.high %v3523_v13, %v8906_v43  ;;  %v3864_v44 = vcombine.low %v9120_v46, %v7262_v15  ;;  %v3865_v14 = vcombine.high %v9120_v46, %v7262_v15  ;;  %v3849_v2 = vcombine.high %v9118_v10, %v7252_v45 }
 0x1b7   : > { %9117 = vst [vmem:[#allocation49_spill] sm:$0xff] %v7640_v50  ;;  %v9123_v32 = vpack.i.bf16 %v9121_v20, %v9122_v23  ;;  %v7662_v37 = vrot.slane %v2200_v1, %v5559_v18  ;;  %v9124_v0 = vpack.i.bf16 %v9064_v52, %v7223_v35  ;;  %v2658_v55 = vcombine.high %v2654_v31, %v8906_v43  ;;  %v7680_v1 = vpop.permute.xlu0 %3754 }
 0x1b8   : > { %v7670_v15 = vrot.slane %v1379_v34, %v5559_v18  ;;  %v7673_v45 = vcombine.high %v2638_v49, %v8906_v43  ;;  %v7676_v10 = vrot.slane %v1363_v19, %v5559_v18  ;;  %9125 = vst [vmem:[#allocation54_spill] sm:$0xff] %v7680_v1  ;;  %v5239_v46 = vpack.i.bf16 %v3523_v13, %v2638_v49  ;;  %v7687_v31 = vpop.permute.xlu1 %3762 }
 0x1b9   : > { %5225 = vrot.lane.b32.xlu0 %v9123_v32, %s5443_s6  ;;  %5230 = vrot.lane.b32.xlu1 %v9124_v0, %s5444_s7  ;;  %v2184_v32 = vcombine.high %v7553_v28, %v7550_v62  ;;  %v5234_v20 = vpack.i.bf16 %v2217_v47, %v1396_v40  ;;  %v1394_v35 = vcombine.high %v7628_v11, %v8906_v43 }
 0x1ba   : > { %v7685_v52 = vrot.slane %v3848_v57, %v5535_v9  ;;  %9126 = vst [vmem:[#allocation60_spill] sm:$0xff] %v7687_v31  ;;  %v5244_v0 = vpack.i.bf16 %v3543_v3, %v2658_v55  ;;  %v7691_v19 = vcombine.high %v7640_v50, %v8906_v43  ;;  %v7696_v28 = vrot.slane %v3864_v44, %v5535_v9  ;;  %v9129_v50 = vld [vmem:[#allocation64_spill] sm:$0xff] }
 0x1bb   : > { %v7699_v13 = vrot.slane %v3865_v14, %v5535_v9  ;;  %v7702_v34 = vrot.slane %v3849_v2, %v5535_v9  ;;  %v7707_v55 = vcombine.high %v7662_v37, %v8906_v43  ;;  %v2676_v49 = vcombine.high %v7305_v63, %v7356_v4  ;;  %v4981_v40 = vpop.permute.xlu0 %4980 }
 0x1bc   : > { %v2660_v47 = vcombine.high %v7299_v59, %v7345_v58  ;;  %v7718_v57 = vcombine.high %v7670_v15, %v8906_v43  ;;  %v5249_v44 = vpack.i.bf16 %v1394_v35, %v7310_v39  ;;  %v5259_v14 = vpack.i.bf16 %v7662_v37, %v7670_v15  ;;  %v4986_v62 = vpop.permute.xlu1 %4985  ;;  %v9128_v39 = vld [vmem:[#allocation66_spill] sm:$0xff] }
 0x1bd   : > { %5235 = vrot.lane.b32.xlu0 %v5234_v20, %s5445_s8  ;;  %5240 = vrot.lane.b32.xlu1 %v5239_v46, %s5443_s6  ;;  %v7724_v2 = vrot.slane %v2184_v32, %v5559_v18  ;;  %v7728_v23 = vcombine.high %v7676_v10, %v8906_v43  ;;  %v3561_v46 = vcombine.high %v7388_v60, %v7425_v54  ;;  %v9127_v20 = vld [vmem:[#allocation74_spill] sm:$0xff]  ;;  %v4982_v11 = vunpack.i.l.bf16 %v4981_v40 }
 0x1be   : > { %v3545_v3 = vcombine.high %v9127_v20, %v7415_v30  ;;  %v5264_v35 = vpack.i.bf16 %v9128_v39, %v7691_v19  ;;  %v3896_v15 = vcombine.low %v7702_v34, %v7699_v13  ;;  %v2659_v32 = vcombine.low %v7299_v59, %v7345_v58 }
 0x1bf   : > { %v2675_v29 = vcombine.low %v7305_v63, %v7356_v4  ;;  %v7748_v8 = vrot.slane %v2676_v49, %v5535_v9  ;;  %v7751_v19 = vrot.slane %v2660_v47, %v5535_v9  ;;  %v4987_v39 = vunpack.i.l.bf16 %v4986_v62  ;;  %v4991_v4 = vpop.permute.xlu0 %4990 }
 0x1c0   : > { %v3560_v58 = vcombine.low %v7388_v60, %v7425_v54  ;;  %v3544_v59 = vcombine.low %v9127_v20, %v7415_v30  ;;  %v1943_v37 = vsel %vm595_vm2, %v9129_v50, %v4982_v11  ;;  %v7761_v63 = vrot.slane %v3561_v46, %v5535_v9  ;;  %v7766_v47 = vpop.permute.xlu1 %4995  ;;  %v9130_v46 = vld [vmem:[#allocation65_spill] sm:$0xff] }
 0x1c1   : > { %5245 = vrot.lane.b32.xlu0 %v5244_v0, %s5444_s7  ;;  %5250 = vrot.lane.b32.xlu1 %v5249_v44, %s5445_s8  ;;  %v4983_v0 = vunpack.i.h.bf16 %v4981_v40  ;;  %v7764_v49 = vrot.slane %v3545_v3, %v5535_v9  ;;  %v4993_v44 = vunpack.i.h.bf16 %v4991_v4  ;;  %v4992_v51 = vunpack.i.l.bf16 %v4991_v4  ;;  %v9131_v20 = vld [vmem:[#allocation61_spill] sm:$0xff] }
 0x1c2   : > { %v7771_v30 = vrot.slane %v2659_v32, %v5535_v9  ;;  %v4997_v54 = vunpack.i.l.bf16 %v7766_v47  ;;  %v7777_v11 = vrot.slane %v3896_v15, %v5559_v18  ;;  %v7780_v50 = vrot.slane %v2675_v29, %v5535_v9  ;;  %v9133_v15 = vld [vmem:[#allocation67_spill] sm:$0xff] }
 0x1c3   : > { %v2707_v3 = vcombine.low %v7751_v19, %v7748_v8  ;;  %v4988_v40 = vunpack.i.h.bf16 %v4986_v62  ;;  %v9132_v32 = vpack.i.bf16 %v9130_v46, %v9131_v20  ;;  %v1944_v4 = vsel %vm597_vm3, %v1943_v37, %v4987_v39  ;;  %v9134_v20 = vld [vmem:[#allocation71_spill] sm:$0xff] }
 0x1c4   : > { %v7790_v60 = vrot.slane %v3544_v59, %v5535_v9  ;;  %v1497_v29 = vsel %vm595_vm2, %v9133_v15, %v4983_v0  ;;  %v1948_v1 = vsel %vm599_vm4, %v7607_v27, %v4992_v51  ;;  %v1945_v62 = vsel %vm599_vm4, %v1944_v4, %v4993_v44  ;;  %v5006_v39 = vpop.permute.xlu1 %5005 }
 0x1c5   : > { %4061 = vrot.lane.b32.xlu0 %v7637_v56, %s5444_s7  ;;  %5255 = vrot.lane.b32.xlu1 %v9132_v32, %s5444_s7  ;;  %v7792_v56 = vpop.permute.xlu0 %5000  ;;  %v7800_v5 = vrot.slane %v3560_v58, %v5535_v9  ;;  %v3592_v46 = vcombine.low %v7764_v49, %v7761_v63  ;;  %v2220_v37 = vcombine.high %v7465_v33, %v7504_v53  ;;  %v5008_v51 = vunpack.i.h.bf16 %v5006_v39 }
 0x1c6   : > { %v5002_v59 = vunpack.i.l.bf16 %v7792_v56  ;;  %v2236_v0 = vcombine.high %v7473_v26, %v7518_v22  ;;  %v1494_v27 = vsel %vm595_vm2, %v9134_v20, %v4997_v54  ;;  %v5007_v44 = vunpack.i.l.bf16 %v5006_v39 }
 0x1c7   : > { %v1498_v58 = vsel %vm597_vm3, %v1497_v29, %v4988_v40  ;;  %v4205_v32 = vrot.slane %v1948_v1, 4  ;;  %v4204_v15 = vrot.slane %v1945_v62, 4  ;;  %v2235_v31 = vcombine.low %v7473_v26, %v7518_v22 }
 0x1c8   : > { %v1495_v4 = vsel %vm597_vm3, %v1494_v27, %v5002_v59  ;;  %v2219_v41 = vcombine.low %v7465_v33, %v7504_v53  ;;  %v1499_v54 = vsel %vm599_vm4, %v1498_v58, %v5007_v44  ;;  %v7826_v1 = vrot.slane %v3592_v46, %v5559_v18  ;;  %v7828_v40 = vpop.permute.xlu1 %5015  ;;  %v9140_v58 = vld [vmem:[#allocation72_spill] sm:$0xff] }
 0x1c9   : > { %5260 = vrot.lane.b32.xlu0 %v5259_v14, %s5443_s6  ;;  %5265 = vrot.lane.b32.xlu1 %v5264_v35, %s5445_s8  ;;  %v7819_v61 = vpop.permute.xlu0 %5010  ;;  %v1496_v14 = vsel %vm599_vm4, %v1495_v4, %v5008_v51  ;;  %v3897_v35 = vcombine.high %v7702_v34, %v7699_v13  ;;  %v4278_v29 = vsel %vm4268_vm5, %v1499_v54, %v4205_v32 }
 0x1ca   : > { %v4277_v26 = vsel %vm4268_vm5, %v1496_v14, %v4204_v15  ;;  %v2691_v33 = vcombine.low %v7771_v30, %v7780_v50  ;;  %v3576_v53 = vcombine.low %v7790_v60, %v7800_v5  ;;  %v9135_v22 = vpack.i.bf16 %v7649_v17, %v7673_v45  ;;  %v9141_v15 = vld [vmem:[#allocation69_spill] sm:$0xff]  ;;  %v9142_v14 = vld [vmem:[#allocation8_spill] sm:$0xff] }
 0x1cb   : > { %v4798_v13 = vpack.c.bf16 %v4278_v29, %v7590_v48  ;;  %v4800_v34 = vpack.c.bf16 %v4277_v26, %v7613_v25  ;;  %v7843_v62 = vrot.slane %v2707_v3, %v5559_v18  ;;  %v3593_v46 = vcombine.high %v7764_v49, %v7761_v63 }
 0x1cc   : > { %v2250_v39 = vrot.slane %v2236_v0, %v5535_v9  ;;  %v2234_v59 = vrot.slane %v2220_v37, %v5535_v9  ;;  %v9136_v20 = vpack.i.bf16 %v7676_v10, %v7280_v6  ;;  %v2708_v48 = vcombine.high %v7751_v19, %v7748_v8  ;;  %v7867_v6 = vpop.permute.xlu1 %5025 }
 0x1cd   : > { %5270 = vrot.lane.b32.xlu0 %v9135_v22, %s5444_s7  ;;  %v7856_v25 = vrot.slane %v2235_v31, %v5535_v9  ;;  %v7859_v17 = vrot.slane %v2219_v41, %v5535_v9  ;;  %4799 = vmatprep.subr.bf16.mxu0 %v4798_v13  ;;  %v7861_v45 = vpop.permute.xlu0 %5020  ;;  %v3914_v63 = vcombine.high %v7777_v11, %v8906_v43 }
 0x1ce   : > { %5275 = vrot.lane.b32.xlu1 %v9136_v20, %s5443_s6  ;;  %v2692_v49 = vcombine.high %v7771_v30, %v7780_v50  ;;  %4801 = vmatpush1.bf16.msra.mxu0 %v4800_v34  ;;  %v3610_v8 = vcombine.high %v7826_v1, %v8906_v43  ;;  %v9137_v41 = vcombine.low %v7685_v52, %v7696_v28 }
 0x1cf   : > { %v7879_v31 = vcombine.high %v7724_v2, %v8906_v43  ;;  %v3577_v19 = vcombine.high %v7790_v60, %v7800_v5  ;;  %v7884_v30 = vrot.slane %v3576_v53, %v5559_v18  ;;  %v3911_v50 = vrot.slane %v3897_v35, %v5559_v18 }
 0x1d0   : > { %v7875_v10 = vrot.slane %v9137_v41, %v5559_v18  ;;  %v9138_v3 = vcombine.high %v7685_v52, %v7696_v28  ;;  %v7895_v0 = vrot.slane %v2691_v33, %v5559_v18  ;;  %v2267_v27 = vcombine.low %v2234_v59, %v2250_v39 }
 0x1d1   : > { %4089 = vrot.lane.b32.xlu0 %v3914_v63, %s5445_s8  ;;  %v9139_v5 = vpack.i.bf16 %v7707_v55, %v7718_v57  ;;  %v2725_v60 = vcombine.high %v7843_v62, %v8906_v43  ;;  %v7904_v51 = vrot.slane %v3593_v46, %v5559_v18  ;;  %v2251_v52 = vcombine.low %v7859_v17, %v7856_v25  ;;  %v7908_v44 = vpop.permute.xlu0 %5030  ;;  %v7915_v55 = vpop.permute.xlu1 %5035 }
 0x1d2   : > { %v7892_v37 = vrot.slane %v9138_v3, %v5559_v18  ;;  %v2268_v28 = vcombine.high %v2234_v59, %v2250_v39  ;;  %v5284_v32 = vpack.i.bf16 %v9140_v58, %v7724_v2  ;;  %v7913_v4 = vrot.slane %v2708_v48, %v5559_v18 }
 0x1d3   : > { %5280 = vrot.lane.b32.xlu1 %v9139_v5, %s5444_s7  ;;  %v5289_v57 = vpack.i.bf16 %v3610_v8, %v2725_v60  ;;  %v5294_v54 = vpack.i.bf16 %v7728_v23, %v9141_v15  ;;  %v5299_v35 = vpack.i.bf16 %v9142_v14, %v7879_v31  ;;  %v7922_v29 = vrot.slane %v2692_v49, %v5559_v18  ;;  %v9143_v14 = vld [vmem:[#allocation70_spill] sm:$0xff]  ;;  %v9147_v60 = vld [vmem:[#allocation75_spill] sm:$0xff] }
 0x1d4   : > { %v3912_v2 = vcombine.high %v7875_v10, %v8906_v43  ;;  %v3608_v26 = vcombine.high %v7884_v30, %v8906_v43  ;;  %v7930_v33 = vcombine.high %v3911_v50, %v8906_v43  ;;  %v7933_v53 = vrot.slane %v3577_v19, %v5559_v18 }
 0x1d5   : > { %5285 = vrot.lane.b32.xlu0 %v5284_v32, %s5443_s6  ;;  %v7936_v23 = vrot.slane %v2267_v27, %v5559_v18  ;;  %v2723_v22 = vcombine.high %v7895_v0, %v8906_v43  ;;  %v7943_v13 = vcombine.high %v7892_v37, %v8906_v43  ;;  %v7947_v34 = vcombine.high %v7904_v51, %v8906_v43  ;;  %v7954_v59 = vpop.permute.xlu0 %5040  ;;  %v7967_v8 = vpop.permute.xlu1 %5045 }
 0x1d6   : > { %v2252_v46 = vcombine.high %v7859_v17, %v7856_v25  ;;  %v7952_v39 = vrot.slane %v2251_v52, %v5559_v18  ;;  %v7958_v20 = vcombine.high %v7913_v4, %v8906_v43  ;;  %v7961_v48 = vrot.slane %v2268_v28, %v5559_v18 }
 0x1d7   : > { %5290 = vrot.lane.b32.xlu1 %v5289_v57, %s5445_s8  ;;  %v3916_v63 = vcombine.low %v7545_v21, %v7583_v24  ;;  %v3917_v49 = vcombine.high %v7545_v21, %v7583_v24  ;;  %v5309_v25 = vpack.i.bf16 %v7904_v51, %v7913_v4  ;;  %v7973_v17 = vcombine.high %v7922_v29, %v8906_v43 }
 0x1d8   : > { %v3932_v41 = vcombine.low %v7555_v12, %v7597_v16  ;;  %v3933_v31 = vcombine.high %v7555_v12, %v7597_v16  ;;  %v5304_v19 = vpack.i.bf16 %v3608_v26, %v2723_v22  ;;  %v5319_v21 = vpack.i.bf16 %v7933_v53, %v7922_v29 }
 0x1d9   : > { %5295 = vrot.lane.b32.xlu0 %v5294_v54, %s5444_s7  ;;  %v4998_v24 = vunpack.i.h.bf16 %v7766_v47  ;;  %v7986_v3 = vcombine.high %v7936_v23, %v8906_v43  ;;  %v5324_v27 = vpack.i.bf16 %v7947_v34, %v7958_v20  ;;  %v7992_v12 = vcombine.high %v7933_v53, %v8906_v43  ;;  %v5051_v5 = vpop.permute.xlu0 %5050  ;;  %v8012_v32 = vpop.permute.xlu1 %5055 }
 0x1da   : > { %v5003_v16 = vunpack.i.h.bf16 %v7792_v56  ;;  %v7999_v47 = vcombine.high %v7952_v39, %v8906_v43  ;;  %v8002_v51 = vrot.slane %v2252_v46, %v5559_v18  ;;  %v8005_v52 = vrot.slane %v3916_v63, %v5535_v9 }
 0x1db   : > { %4077 = vrot.lane.b32.xlu1 %v3912_v2, %s5445_s8  ;;  %v8008_v28 = vrot.slane %v3917_v49, %v5535_v9  ;;  %v5013_v58 = vunpack.i.h.bf16 %v7819_v61  ;;  %v5012_v56 = vunpack.i.l.bf16 %v7819_v61  ;;  %v8015_v4 = vrot.slane %v3932_v41, %v5535_v9  ;;  %v9144_v41 = vld [vmem:[#allocation78_spill] sm:$0xff] }
 0x1dc   : > { %v8018_v57 = vrot.slane %v3933_v31, %v5535_v9  ;;  %v5018_v15 = vunpack.i.h.bf16 %v7828_v40  ;;  %v5017_v54 = vunpack.i.l.bf16 %v7828_v40  ;;  %v1952_v2 = vsel %vm595_vm2, %v9143_v14, %v4998_v24  ;;  %v9145_v24 = vld [vmem:[#allocation77_spill] sm:$0xff]  ;;  %v9146_v14 = vld [vmem:[#allocation76_spill] sm:$0xff] }
 0x1dd   : > { %4093 = vrot.lane.b32.xlu0 %v3911_v50, %s5443_s6  ;;  %v5023_v26 = vunpack.i.h.bf16 %v7861_v45  ;;  %v5022_v61 = vunpack.i.l.bf16 %v7861_v45  ;;  %v5314_v22 = vpack.i.bf16 %v7561_v38, %v7986_v3  ;;  %v5038_v46 = vunpack.i.h.bf16 %v7915_v55  ;;  %v5061_v49 = vpop.permute.xlu0 %5060  ;;  %v8041_v3 = vpop.permute.xlu1 %5065 }
 0x1de   : > { %v5037_v63 = vunpack.i.l.bf16 %v7915_v55  ;;  %v1953_v40 = vsel %vm597_vm3, %v1952_v2, %v5003_v16  ;;  %v3711_v31 = vsel %vm595_vm2, %v9144_v41, %v5013_v58  ;;  %v2826_v45 = vsel %vm595_vm2, %v9145_v24, %v5012_v56 }
 0x1df   : > { %5300 = vrot.lane.b32.xlu1 %v5299_v35, %s5444_s7  ;;  %v5028_v35 = vunpack.i.h.bf16 %v7867_v6  ;;  %v5027_v38 = vunpack.i.l.bf16 %v7867_v6  ;;  %v2823_v55 = vsel %vm595_vm2, %v9146_v14, %v5018_v15  ;;  %v1949_v16 = vsel %vm595_vm2, %v9147_v60, %v5017_v54 }
 0x1e0   : > { %v5033_v2 = vunpack.i.h.bf16 %v7908_v44  ;;  %v5032_v50 = vunpack.i.l.bf16 %v7908_v44  ;;  %v2827_v58 = vsel %vm597_vm3, %v2826_v45, %v5022_v61  ;;  %v3712_v56 = vsel %vm597_vm3, %v3711_v31, %v5023_v26  ;;  %v9149_v45 = vld [vmem:[#allocation42_spill] sm:$0xff] }
 0x1e1   : > { %5305 = vrot.lane.b32.xlu0 %v5304_v19, %s5445_s8  ;;  %v5043_v6 = vunpack.i.h.bf16 %v7954_v59  ;;  %v5042_v41 = vunpack.i.l.bf16 %v7954_v59  ;;  %v8056_v15 = vsel %vm599_vm4, %v2827_v58, %v5038_v46  ;;  %v5053_v60 = vunpack.i.h.bf16 %v5051_v5  ;;  %v8058_v24 = vpop.permute.xlu0 %5070  ;;  %v9148_v19 = vld [vmem:[#allocation79_spill] sm:$0xff]  ;;  %v9151_v58 = vld [vmem:[#allocation52_spill] sm:$0xff] }
 0x1e2   : > { %v5052_v54 = vunpack.i.l.bf16 %v5051_v5  ;;  %v1954_v44 = vsel %vm599_vm4, %v1953_v40, %v5037_v63  ;;  %v1503_v61 = vsel %vm595_vm2, %v9148_v19, %v5028_v35  ;;  %v3708_v26 = vsel %vm595_vm2, %v9149_v45, %v5027_v38  ;;  %v9150_v35 = vld [vmem:[#allocation19_spill] sm:$0xff] }
 0x1e3   : > { %5310 = vrot.lane.b32.xlu1 %v5309_v25, %s5443_s6  ;;  %v5048_v31 = vunpack.i.h.bf16 %v7967_v8  ;;  %v5047_v59 = vunpack.i.l.bf16 %v7967_v8  ;;  %v8067_v25 = vpop.permute.xlu1 %5075  ;;  %v2824_v46 = vsel %vm597_vm3, %v2823_v55, %v5033_v2  ;;  %v1950_v5 = vsel %vm597_vm3, %v1949_v16, %v5032_v50 }
 0x1e4   : > { %v5058_v14 = vunpack.i.h.bf16 %v8012_v32  ;;  %v5057_v63 = vunpack.i.l.bf16 %v8012_v32  ;;  %v4229_v40 = vrot.slane %v8056_v15, 4  ;;  %v3271_v38 = vsel %vm595_vm2, %v9150_v35, %v5043_v6 }
 0x1e5   : > { %4081 = vrot.lane.b32.xlu0 %v7892_v37, %s5443_s6  ;;  %v2386_v8 = vsel %vm595_vm2, %v9151_v58, %v5042_v41  ;;  %v4207_v55 = vrot.slane %v1954_v44, 4  ;;  %v1951_v50 = vsel %vm599_vm4, %v1950_v5, %v5053_v60  ;;  %v3713_v16 = vsel %vm599_vm4, %v3712_v56, %v5052_v54  ;;  %v5081_v19 = vpop.permute.xlu0 %5080  ;;  %v9152_v41 = vld [vmem:[#allocation51_spill] sm:$0xff] }
 0x1e6   : > { %v5063_v32 = vunpack.i.h.bf16 %v5061_v49  ;;  %v5062_v2 = vunpack.i.l.bf16 %v5061_v49  ;;  %v3709_v37 = vsel %vm597_vm3, %v3708_v26, %v5047_v59  ;;  %v5083_v45 = vunpack.i.h.bf16 %v5081_v19 }
 0x1e7   : > { %4097 = vrot.lane.b32.xlu1 %v7930_v33, %s5444_s7  ;;  %v8085_v15 = vpop.permute.xlu1 %5085  ;;  %v5082_v6 = vunpack.i.l.bf16 %v5081_v19  ;;  %v1504_v35 = vsel %vm597_vm3, %v1503_v61, %v5048_v31  ;;  %v2383_v58 = vsel %vm595_vm2, %v9152_v41, %v5058_v14  ;;  %v9153_v33 = vld [vmem:[#allocation45_spill] sm:$0xff]  ;;  %v5068_v60 = vunpack.i.h.bf16 %v8041_v3 }
 0x1e8   : > { %v1500_v44 = vsel %vm595_vm2, %v9153_v33, %v5057_v63  ;;  %v5077_v56 = vunpack.i.l.bf16 %v8067_v25  ;;  %v4206_v49 = vrot.slane %v1951_v50, 4  ;;  %v4253_v54 = vrot.slane %v3713_v16, 4 }
 0x1e9   : > { %5315 = vrot.lane.b32.xlu0 %v5314_v22, %s5445_s8  ;;  %v5067_v26 = vunpack.i.l.bf16 %v8041_v3  ;;  %v1505_v61 = vsel %vm599_vm4, %v1504_v35, %v5082_v6  ;;  %v2387_v31 = vsel %vm597_vm3, %v2386_v8, %v5062_v2  ;;  %v3272_v59 = vsel %vm597_vm3, %v3271_v38, %v5063_v32  ;;  %v5091_v14 = vpop.permute.xlu0 %5090  ;;  %v9155_v35 = vld [vmem:[#allocation38_spill] sm:$0xff] }
 0x1ea   : > { %v5072_v5 = vunpack.i.l.bf16 %v8058_v24  ;;  %v4280_v22 = vsel %vm4268_vm5, %v1505_v61, %v4207_v55  ;;  %v2388_v63 = vsel %vm599_vm4, %v2387_v31, %v5083_v45  ;;  %v5093_v3 = vunpack.i.h.bf16 %v5091_v14 }
 0x1eb   : > { %5320 = vrot.lane.b32.xlu1 %v5319_v21, %s5443_s6  ;;  %v8106_v50 = vpop.permute.xlu1 %5095  ;;  %v5092_v16 = vunpack.i.l.bf16 %v5091_v14  ;;  %v4806_v29 = vpack.c.bf16 %v4280_v22, %v7617_v7  ;;  %v3710_v53 = vsel %vm599_vm4, %v3709_v37, %v5068_v60  ;;  %v5078_v21 = vunpack.i.h.bf16 %v8067_v25  ;;  %v9154_v25 = vld [vmem:[#allocation46_spill] sm:$0xff]  ;;  %v9159_v22 = vld [vmem:[#allocation60_spill] sm:$0xff] }
 0x1ec   : > { %v1501_v8 = vsel %vm597_vm3, %v1500_v44, %v5077_v56  ;;  %v5087_v38 = vunpack.i.l.bf16 %v8085_v15  ;;  %v2825_v55 = vsel %vm599_vm4, %v2824_v46, %v5067_v26  ;;  %v3268_v2 = vsel %vm595_vm2, %v9154_v25, %v5072_v5 }
 0x1ed   : > { %5325 = vrot.lane.b32.xlu0 %v5324_v27, %s5444_s7  ;;  %v3273_v32 = vsel %vm599_vm4, %v3272_v59, %v5092_v16  ;;  %4807 = vmatprep.subr.bf16.mxu1 %v4806_v29  ;;  %v1502_v7 = vsel %vm599_vm4, %v1501_v8, %v5093_v3  ;;  %v5101_v19 = vpop.permute.xlu0 %5100  ;;  %v4286_v37 = vsel %vm4268_vm5, %v2388_v63, %v4229_v40  ;;  %v4252_v41 = vrot.slane %v3710_v53, 4  ;;  %v9160_v63 = vld [vmem:[#allocation44_spill] sm:$0xff]  ;;  %v9161_v16 = vld [vmem:[#allocation54_spill] sm:$0xff] }
 0x1ee   : > { %v4294_v45 = vsel %vm4268_vm5, %v3273_v32, %v4253_v54  ;;  %v4279_v34 = vsel %vm4268_vm5, %v1502_v7, %v4206_v49  ;;  %v5103_v27 = vunpack.i.h.bf16 %v5101_v19  ;;  %v5102_v46 = vunpack.i.l.bf16 %v5101_v19  ;;  %v9162_v29 = vld [vmem:[#allocation6_spill] sm:$0xff] }
 0x1ef   : > { %4085 = vrot.lane.b32.xlu1 %v7943_v13, %s5444_s7  ;;  %v8127_v20 = vpop.permute.xlu1 %5105  ;;  %v4802_v6 = vpack.c.bf16 %v4294_v45, %v4286_v37  ;;  %v4808_v13 = vpack.c.bf16 %v4279_v34, %v9155_v35  ;;  %v4228_v33 = vrot.slane %v2825_v55, 4  ;;  %v2384_v44 = vsel %vm597_vm3, %v2383_v58, %v5078_v21  ;;  %v9163_v21 = vld [vmem:[#allocation13_spill] sm:$0xff]  ;;  %v9164_v7 = vld [vmem:[#allocation50_spill] sm:$0xff] }
 0x1f0   : > { %v3269_v60 = vsel %vm597_vm3, %v3268_v2, %v5087_v38  ;;  %v9156_v40 = vpack.i.bf16 %v7565_v42, %v7999_v47  ;;  %v2385_v56 = vsel %vm599_vm4, %v2384_v44, %v5102_v46  ;;  %v9157_v54 = vpack.i.bf16 %v7434_v36, %v7961_v48 }
 0x1f1   : > { %v3270_v49 = vsel %vm599_vm4, %v3269_v60, %v5103_v27  ;;  %4803 = vmatprep.subr.bf16.mxu0 %v4802_v6  ;;  %v5339_v58 = vpack.i.bf16 %v7992_v12, %v7973_v17  ;;  %v3964_v26 = vcombine.low %v8008_v28, %v8018_v57  ;;  %4809 = vmatpush1.bf16.msra.mxu1 %v4808_v13  ;;  %v8146_v61 = vpop.permute.xlu0 %5110  ;;  %v9158_v17 = vld [vmem:[#allocation80_spill] sm:$0xff] }
 0x1f2   : > { %5330 = vrot.lane.b32.xlu0 %v9156_v40, %s5445_s8  ;;  %v4285_v42 = vsel %vm4268_vm5, %v2385_v56, %v4228_v33  ;;  %v4293_v47 = vsel %vm4268_vm5, %v3270_v49, %v4252_v41  ;;  %v2286_v31 = vcombine.high %v7961_v48, %v8906_v43  ;;  %v3948_v36 = vcombine.low %v8005_v52, %v8015_v4 }
 0x1f3   : > { %5335 = vrot.lane.b32.xlu1 %v9157_v54, %s5443_s6  ;;  %v8154_v59 = vpop.permute.xlu1 %5115  ;;  %v5344_v12 = vpack.i.bf16 %v9158_v17, %v8002_v51  ;;  %v4804_v5 = vpack.c.bf16 %v4293_v47, %v4285_v42  ;;  %v2284_v14 = vcombine.high %v8002_v51, %v8906_v43  ;;  %v4001_v3 = vcombine.high %v9160_v63, %v9159_v22 }
 0x1f4   : > { %v3985_v53 = vcombine.high %v9162_v29, %v9161_v16  ;;  %v5349_v8 = vpack.i.bf16 %v9163_v21, %v2286_v31  ;;  %v8170_v38 = vrot.slane %v3964_v26, %v5559_v18  ;;  %v4000_v51 = vcombine.low %v9160_v63, %v9159_v22 }
 0x1f5   : > { %4805 = vmatpush1.bf16.msra.mxu0 %v4804_v5  ;;  %v8166_v48 = vpop.permute.xlu0 %5120  ;;  %v3984_v55 = vcombine.low %v9162_v29, %v9161_v16  ;;  %v5354_v25 = vpack.i.bf16 %v9164_v7, %v2284_v14  ;;  %v8180_v2 = vrot.slane %v3948_v36, %v5559_v18  ;;  %v4015_v19 = vrot.slane %v4001_v3, %v5535_v9  ;;  %v9165_v14 = vld [vmem:[#allocation18_spill] sm:$0xff] }
 0x1f6   : > { %5340 = vrot.lane.b32.xlu0 %v5339_v58, %s5444_s7  ;;  %v3999_v37 = vrot.slane %v3985_v53, %v5535_v9  ;;  %v3949_v45 = vcombine.high %v8005_v52, %v8015_v4  ;;  %v3965_v34 = vcombine.high %v8008_v28, %v8018_v57  ;;  %v3982_v46 = vcombine.high %v8170_v38, %v8906_v43  ;;  %v9166_v53 = vld [vmem:[#allocation10_spill] sm:$0xff] }
 0x1f7   : > { %5345 = vrot.lane.b32.xlu1 %v5344_v12, %s5443_s6  ;;  %v8176_v32 = vpop.permute.xlu1 %5125  ;;  %v4008_v6 = vrot.slane %v4000_v51, %v5535_v9  ;;  %v3992_v35 = vrot.slane %v3984_v55, %v5535_v9  ;;  %v3980_v41 = vcombine.high %v8180_v2, %v8906_v43  ;;  %v5073_v56 = vunpack.i.h.bf16 %v8058_v24 }
 0x1f8   : > { %v4032_v33 = vcombine.low %v3999_v37, %v4015_v19  ;;  %v3979_v28 = vrot.slane %v3965_v34, %v5559_v18  ;;  %v3963_v4 = vrot.slane %v3949_v45, %v5559_v18  ;;  %v4033_v60 = vcombine.high %v3999_v37, %v4015_v19 }
 0x1f9   : > { %v8190_v27 = vpop.permute.xlu0 %5130  ;;  %v4016_v57 = vcombine.low %v3992_v35, %v4008_v6  ;;  %v4017_v9 = vcombine.high %v3992_v35, %v4008_v6  ;;  %v5088_v49 = vunpack.i.h.bf16 %v8085_v15  ;;  %v5097_v54 = vunpack.i.l.bf16 %v8106_v50  ;;  %v9168_v6 = vld [vmem:[#allocation47_spill] sm:$0xff] }
 0x1fa   : > { %5350 = vrot.lane.b32.xlu0 %v5349_v8, %s5444_s7  ;;  %v8210_v40 = vrot.slane %v4032_v33, %v5559_v18  ;;  %v3983_v26 = vcombine.high %v3979_v28, %v8906_v43  ;;  %v3981_v42 = vcombine.high %v3963_v4, %v8906_v43  ;;  %v5098_v47 = vunpack.i.h.bf16 %v8106_v50 }
 0x1fb   : > { %5355 = vrot.lane.b32.xlu1 %v5354_v25, %s5444_s7  ;;  %v8196_v13 = vpop.permute.xlu1 %5135  ;;  %v5112_v31 = vunpack.i.l.bf16 %v8146_v61  ;;  %v5122_v36 = vunpack.i.l.bf16 %v8166_v48  ;;  %v8226_v24 = vrot.slane %v4016_v57, %v5559_v18  ;;  %v5123_v15 = vunpack.i.h.bf16 %v8166_v48  ;;  %v9170_v57 = vld [vmem:[#allocation21_spill] sm:$0xff] }
 0x1fc   : > { %v4050_v12 = vcombine.high %v8210_v40, %v8906_v43  ;;  %v4047_v5 = vrot.slane %v4033_v60, %v5559_v18  ;;  %v4031_v50 = vrot.slane %v4017_v9, %v5559_v18  ;;  %v2832_v22 = vsel %vm595_vm2, %v9165_v14, %v5073_v56  ;;  %v9167_v18 = vld [vmem:[#allocation20_spill] sm:$0xff] }
 0x1fd   : > { %v8202_v52 = vpop.permute.xlu0 %5140  ;;  %v5107_v63 = vunpack.i.l.bf16 %v8127_v20  ;;  %v5118_v3 = vunpack.i.h.bf16 %v8154_v59  ;;  %v5113_v16 = vunpack.i.h.bf16 %v8146_v61  ;;  %v2833_v29 = vsel %vm597_vm3, %v2832_v22, %v5088_v49 }
 0x1fe   : > { %4113 = vrot.lane.b32.xlu0 %v3982_v46, %s5445_s8  ;;  %v3717_v48 = vsel %vm595_vm2, %v9166_v53, %v5097_v54  ;;  %v5127_v21 = vunpack.i.l.bf16 %v8176_v32  ;;  %v2829_v51 = vsel %vm595_vm2, %v9167_v18, %v5098_v47  ;;  %v2834_v7 = vsel %vm599_vm4, %v2833_v29, %v5122_v36  ;;  %v9171_v18 = vld [vmem:[#allocation31_spill] sm:$0xff] }
 0x1ff   : > { %4101 = vrot.lane.b32.xlu1 %v3980_v41, %s5445_s8  ;;  %v8206_v44 = vpop.permute.xlu1 %5145  ;;  %v3718_v55 = vsel %vm597_vm3, %v3717_v48, %v5112_v31  ;;  %v4048_v61 = vcombine.high %v8226_v24, %v8906_v43  ;;  %v5448_v19 = vmov 0   ;;  %v5138_v45 = vunpack.i.h.bf16 %v8196_v13  ;;  %v9169_v41 = vld [vmem:[#allocation28_spill] sm:$0xff] }
 0x200   : > { %5359 = vset.pattern.permute.xlu0 %v5448_v19  ;;  %v3719_v37 = vsel %vm599_vm4, %v3718_v55, %v5123_v15  ;;  %v5132_v34 = vunpack.i.l.bf16 %v8190_v27  ;;  %v3714_v35 = vsel %vm595_vm2, %v9168_v6, %v5107_v63  ;;  %v2392_v33 = vsel %vm595_vm2, %v9169_v41, %v5118_v3 }
 0x201   : > { %v8216_v58 = vpop.permute.xlu0 %5150  ;;  %v3277_v9 = vsel %vm595_vm2, %v9170_v57, %v5127_v21  ;;  %v4231_v60 = vrot.slane %v2834_v7, 4  ;;  %v5148_v56 = vunpack.i.h.bf16 %v8206_v44  ;;  %v5147_v49 = vunpack.i.l.bf16 %v8206_v44  ;;  %v9172_v7 = vld [vmem:[#allocation27_spill] sm:$0xff] }
 0x202   : > { %4117 = vrot.lane.b32.xlu0 %v3979_v28, %s5443_s6  ;;  %v5152_v46 = vunpack.i.l.bf16 %v8216_v58  ;;  %v2830_v28 = vsel %vm597_vm3, %v2829_v51, %v5113_v16  ;;  %v2393_v15 = vsel %vm597_vm3, %v2392_v33, %v5138_v45  ;;  %v5142_v14 = vunpack.i.l.bf16 %v8202_v52 }
 0x203   : > { %4105 = vrot.lane.b32.xlu1 %v3963_v4, %s5443_s6  ;;  %v8223_v17 = vpop.permute.xlu1 %5155  ;;  %v4051_v4 = vcombine.high %v4047_v5, %v8906_v43  ;;  %v2831_v29 = vsel %vm599_vm4, %v2830_v28, %v5147_v49  ;;  %v4049_v55 = vcombine.high %v4031_v50, %v8906_v43 }
 0x204   : > { %v3278_v22 = vsel %vm597_vm3, %v3277_v9, %v5152_v46  ;;  %v4230_v45 = vrot.slane %v2831_v29, 4 }
 0x205   : > { %v8244_v8 = vpop.permute.xlu0 %5160 }
 0x206   : > { %4121 = vrot.lane.b32.xlu0 %v3983_v26, %s5444_s7  ;;  %v4255_v26 = vrot.slane %v3719_v37, 4 }
 0x207   : > { %4109 = vrot.lane.b32.xlu1 %v3981_v42, %s5444_s7  ;;  %v5166_v25 = vpop.permute.xlu1 %5165  ;;  %v5143_v42 = vunpack.i.h.bf16 %v8202_v52 }
 0x208   : > { %v5168_v63 = vunpack.i.h.bf16 %v5166_v25  ;;  %v5167_v44 = vunpack.i.l.bf16 %v5166_v25  ;;  %v2389_v25 = vsel %vm595_vm2, %v9172_v7, %v5142_v14  ;;  %v9174_v14 = vld [vmem:[#allocation22_spill] sm:$0xff]  ;;  %v9179_v7 = vld [vmem:[#allocation9_spill] sm:$0xff] }
 0x209   : > { %v5171_v54 = vpop.permute.xlu0 %5170 }
 0x20a   : > { %4137 = vrot.lane.b32.xlu0 %v4050_v12, %s5445_s8  ;;  %v5173_v31 = vunpack.i.h.bf16 %v5171_v54  ;;  %v5172_v36 = vunpack.i.l.bf16 %v5171_v54  ;;  %v3715_v12 = vsel %vm597_vm3, %v3714_v35, %v5132_v34  ;;  %v2390_v46 = vsel %vm597_vm3, %v2389_v25, %v5167_v44 }
 0x20b   : > { %4125 = vrot.lane.b32.xlu1 %v4048_v61, %s5445_s8  ;;  %v8269_v47 = vpop.permute.xlu1 %5175  ;;  %v3716_v53 = vsel %vm599_vm4, %v3715_v12, %v5148_v56 }
 0x20c   : > { %v2394_v3 = vsel %vm599_vm4, %v2393_v15, %v5172_v36  ;;  %v3279_v16 = vsel %vm599_vm4, %v3278_v22, %v5173_v31  ;;  %v4254_v34 = vrot.slane %v3716_v53, 4  ;;  %v9173_v36 = vld [vmem:[#allocation48_spill] sm:$0xff]  ;;  %v4918_v22 = vunpack.i.h.bf16 %v9174_v14 }
 0x20d   : > { %v8281_v48 = vpop.permute.xlu0 %5180  ;;  %v4288_v52 = vsel %vm4268_vm5, %v2394_v3, %v4231_v60  ;;  %v4296_v21 = vsel %vm4268_vm5, %v3279_v16, %v4255_v26  ;;  %v4977_v15 = vunpack.i.l.bf16 %v9173_v36  ;;  %v9176_v16 = vld [vmem:[#allocation40_spill] sm:$0xff] }
 0x20e   : > { %4141 = vrot.lane.b32.xlu0 %v4047_v5, %s5443_s6  ;;  %v3274_v5 = vsel %vm595_vm2, %v9171_v18, %v5143_v42  ;;  %v4810_v37 = vpack.c.bf16 %v4296_v21, %v4288_v52  ;;  %v9177_v21 = vld [vmem:[#allocation15_spill] sm:$0xff]  ;;  %v613_v25 = vsel %vm595_vm2, %v9179_v7, %v4918_v22 }
 0x20f   : > { %4129 = vrot.lane.b32.xlu1 %v4031_v50, %s5443_s6  ;;  %v5186_v51 = vpop.permute.xlu1 %5185  ;;  %v3275_v6 = vsel %vm597_vm3, %v3274_v5, %v5168_v63  ;;  %v4302_v50 = vld [vmem:[%s8716_s2] sm:$0xff]  ;;  %v9175_v63 = vld [vmem:[#allocation63_spill] sm:$0xff]  ;;  %v1066_v29 = vsel %vm595_vm2, %v9176_v16, %v4977_v15  ;;  %v4893_v18 = vunpack.i.h.bf16 %v9177_v21  ;;  %v9178_v5 = vld [vmem:[#allocation16_spill] sm:$0xff]  ;;  %s4687_s6 = sshll.u32 %s8653_s23, 4  ;;  %s4688_s6 = int_to_ptr.vmem [resolvable:$true] %s4687_s6 }
 0x210   : > { %v5188_v61 = vunpack.i.h.bf16 %v5186_v51  ;;  %v5187_v19 = vunpack.i.l.bf16 %v5186_v51  ;;  %4811 = vmatprep.subr.bf16.mxu1 %v4810_v37  ;;  %v4952_v51 = vunpack.i.l.bf16 %v9178_v5  ;;  %v5117_v37 = vunpack.i.l.bf16 %v8154_v59  ;;  %v9182_v15 = vld [vmem:[#allocation30_spill] sm:$0xff]  ;;  %v9184_v5 = vld [vmem:[#allocation53_spill] sm:$0xff]  ;;  %s5376_s11 = scalar_lea.vmem %s4688_s6, 1024  ;;  %p5383_p0 = scmp.lt.s32.totalorder %s4688_s6, %s5381_s13 }
 0x211   : > { %v4066_v33 = vpop.permute.xlu0 %4065  ;;  %v5162_v59 = vunpack.i.l.bf16 %v8244_v8  ;;  %p5377_p11 = scmp.ne.s32.totalorder %s4688_s6, %s5376_s11  ;;  %p5384_p1 = scmp.lt.s32.totalorder %s5382_s14, %s5376_s11 }
 0x212   : > { %4145 = vrot.lane.b32.xlu0 %v4051_v4, %s5444_s7  ;;  %v2391_v35 = vsel %vm599_vm4, %v2390_v46, %v5187_v19  ;;  %v3276_v41 = vsel %vm599_vm4, %v3275_v6, %v5188_v61  ;;  %v4151_v44 = vsel %vm595_vm2, %v9175_v63, %v4066_v33  ;;  %v4917_v61 = vunpack.i.l.bf16 %v9174_v14 }
 0x213   : > { %4133 = vrot.lane.b32.xlu1 %v4049_v55, %s5444_s7  ;;  %v8299_v28 = vpop.permute.xlu1 %5190  ;;  %v4287_v4 = vsel %vm4268_vm5, %v2391_v35, %v4230_v45  ;;  %v4295_v57 = vsel %vm4268_vm5, %v3276_v41, %v4254_v34  ;;  %v5108_v19 = vunpack.i.h.bf16 %v8127_v20  ;;  %v5128_v45 = vunpack.i.h.bf16 %v8176_v32  ;;  %p5378_p12 = pnand %p5377_p11, %p5513_p5  ;;  %p5385_p2 = por %p5384_p1, %p5383_p0 }
 0x214   : > { %v4812_v9 = vpack.c.bf16 %v4295_v57, %v4287_v4  ;;  %v5137_v34 = vunpack.i.l.bf16 %v8196_v13  ;;  %v5133_v46 = vunpack.i.h.bf16 %v8190_v27  ;;  %v1067_v6 = vsel %vm597_vm3, %v1066_v29, %v4952_v51  ;;  %v9180_v57 = vld [vmem:[#allocation32_spill] sm:$0xff] }
 0x215   : > { %v8303_v60 = vpop.permute.xlu0 %5195  ;;  %v5158_v35 = vunpack.i.h.bf16 %v8223_v17  ;;  %v5157_v41 = vunpack.i.l.bf16 %v8223_v17  ;;  %v5153_v20 = vunpack.i.h.bf16 %v8216_v58  ;;  %v5163_v32 = vunpack.i.h.bf16 %v8244_v8  ;;  %p5379_p13 = pneg %p5378_p12 }
 0x216   : > { %4305 = vperm.xlu0 %5359, %v4302_v50   ;;  %4813 = vmatpush1.bf16.msra.mxu1 %v4812_v9  ;;  %v5178_v13 = vunpack.i.h.bf16 %v8269_v47  ;;  %v5177_v27 = vunpack.i.l.bf16 %v8269_v47  ;;  %v5182_v4 = vunpack.i.l.bf16 %v8281_v48  ;;  %v1069_v9 = vsel %vm595_vm2, %v9180_v57, %v5108_v19  ;;  %v9185_v19 = vld [vmem:[#allocation7_spill] sm:$0xff] }
 0x217   : > { %v8305_v56 = vpop.permute.xlu1 %5200  ;;  %v5183_v58 = vunpack.i.h.bf16 %v8281_v48  ;;  %v5197_v36 = vunpack.i.l.bf16 %v8303_v60  ;;  %v1955_v14 = vsel %vm595_vm2, %v9182_v15, %v5128_v45  ;;  %v1070_v22 = vsel %vm597_vm3, %v1069_v9, %v5133_v46  ;;  %v9183_v48 = vld [vmem:[#allocation36_spill] sm:$0xff]  ;;  %p5386_p3 = pnand %p5385_p2, %p5379_p13 }
 0x218   : > { %v5198_v47 = vunpack.i.h.bf16 %v8303_v60  ;;  %v1956_v29 = vsel %vm597_vm3, %v1955_v14, %v5153_v20  ;;  %v1506_v51 = vsel %vm595_vm2, %v9184_v5, %v5163_v32  ;;  %v9186_v45 = vld [vmem:[#allocation24_spill] sm:$0xff] }
 0x219   : > { %v8307_v49 = vpop.permute.xlu0 %4053  ;;  %v1957_v60 = vsel %vm599_vm4, %v1956_v29, %v5178_v13  ;;  %v1507_v46 = vsel %vm597_vm3, %v1506_v51, %v5183_v58  ;;  %v4892_v13 = vunpack.i.l.bf16 %v9177_v21 }
 0x21a   : > { %v1508_v32 = vsel %vm599_vm4, %v1507_v46, %v5198_v47  ;;  %v9190_v46 = vld [vmem:[#allocation11_spill] sm:$0xff] }
 0x21b   : > { %v4070_v54 = vpop.permute.xlu1 %4069 }
 0x21c   : > { %v4152_v53 = vsel %vm597_vm3, %v4151_v44, %v4070_v54  ;;  %v9181_v54 = vld [vmem:[#allocation33_spill] sm:$0xff]  ;;  %v1071_v44 = vsel %vm599_vm4, %v1070_v22, %v5157_v41  ;;  %v4922_v41 = vunpack.i.l.bf16 %v9186_v45 }
 0x21d   : > { %v8309_v26 = vpop.permute.xlu0 %5205  ;;  %v1958_v17 = vsel %vm595_vm2, %v9181_v54, %v5117_v37  ;;  %v610_v37 = vsel %vm595_vm2, %v9185_v19, %v4917_v61  ;;  %v4185_v20 = vrot.slane %v1071_v44, 4  ;;  %v614_v61 = vsel %vm597_vm3, %v613_v25, %v4893_v18  ;;  %v8403_v25 = vld [vmem:[%s8715_s1] sm:$0xff] }
 0x21e   : > { %v1959_v8 = vsel %vm597_vm3, %v1958_v17, %v5137_v34  ;;  %v4923_v34 = vunpack.i.h.bf16 %v9186_v45  ;;  %v611_v54 = vsel %vm597_vm3, %v610_v37, %v4892_v13  ;;  %v9187_v17 = vld [vmem:[#allocation35_spill] sm:$0xff]  ;;  %v5203_v19 = vunpack.i.h.bf16 %v8305_v56  ;;  %v9189_v45 = vld [vmem:[#allocation12_spill] sm:$0xff] }
 0x21f   : > { %v8311_v42 = vpop.permute.xlu1 %5210  ;;  %v1960_v16 = vsel %vm599_vm4, %v1959_v8, %v5158_v35  ;;  %v4148_v58 = vsel %vm595_vm2, %v9187_v17, %v8307_v49  ;;  %v612_v21 = vsel %vm599_vm4, %v611_v54, %v4922_v41  ;;  %v5202_v37 = vunpack.i.l.bf16 %v8305_v56  ;;  %v9191_v41 = vld [vmem:[#allocation25_spill] sm:$0xff]  ;;  %v9195_v17 = vld [vmem:[#allocation43_spill] sm:$0xff] }
 0x220   : > { %v9194_v56 = vld [vmem:[#allocation29_spill] sm:$0xff] }
 0x221   : > { %v8313_v31 = vpop.permute.xlu0 %5215 }
 0x223   : > { %v8316_v12 = vpop.permute.xlu1 %5220 }
 0x225   : > { %v8321_v3 = vpop.permute.xlu0 %4057 }
 0x226   : > { %v4149_v14 = vsel %vm597_vm3, %v4148_v58, %v8321_v3  ;;  %v3723_v58 = vsel %vm595_vm2, %v9195_v17, %v5203_v19  ;;  %v9199_v17 = vld [vmem:[#allocation57_spill] sm:$0xff] }
 0x227   : > { %v4074_v52 = vpop.permute.xlu1 %4073 }
 0x228   : > { %v4153_v55 = vsel %vm599_vm4, %v4152_v53, %v4074_v52  ;;  %v1509_v53 = vsel %vm595_vm2, %v9183_v48, %v5162_v59  ;;  %v4209_v59 = vrot.slane %v1960_v16, 4  ;;  %v9188_v48 = vld [vmem:[#allocation23_spill] sm:$0xff] }
 0x229   : > { %4780 = vmatprep.subr.msk.mxu0 %vm4268_vm5, %v4153_v55  ;;  %v1068_v55 = vsel %vm599_vm4, %v1067_v6, %v5177_v27  ;;  %v1510_v7 = vsel %vm597_vm3, %v1509_v53, %v5182_v4  ;;  %v4208_v4 = vrot.slane %v1957_v60, 4  ;;  %v4933_v53 = vunpack.i.h.bf16 %v9188_v48 }
 0x22a   : > { %v1511_v35 = vsel %vm599_vm4, %v1510_v7, %v5197_v36  ;;  %v4184_v27 = vrot.slane %v1068_v55, 4  ;;  %v615_v36 = vsel %vm599_vm4, %v614_v61, %v4923_v34  ;;  %v4932_v5 = vunpack.i.l.bf16 %v9188_v48 }
 0x22b   : > { %v8339_v50 = vpop.permute.xlu0 %5225  ;;  %v8345_v33 = vpop.permute.xlu1 %5230  ;;  %v4282_v9 = vsel %vm4268_vm5, %v1511_v35, %v4209_v59  ;;  %v4281_v15 = vsel %vm4268_vm5, %v1508_v32, %v4208_v4  ;;  %v4274_v18 = vsel %vm4268_vm5, %v615_v36, %v4185_v20  ;;  %v5193_v55 = vunpack.i.h.bf16 %v8299_v28  ;;  %v9192_v59 = vld [vmem:[#allocation26_spill] sm:$0xff] }
 0x22c   : > { %v4814_v47 = vpack.c.bf16 %v4282_v9, %v4274_v18  ;;  %v4273_v44 = vsel %vm4268_vm5, %v612_v21, %v4184_v27  ;;  %v5192_v60 = vunpack.i.l.bf16 %v8299_v28  ;;  %v8429_v34 = vsel %vm595_vm2, %v9189_v45, %v4933_v53  ;;  %v9193_v27 = vld [vmem:[#allocation55_spill] sm:$0xff] }
 0x22d   : > { %v4816_v16 = vpack.c.bf16 %v4281_v15, %v4273_v44  ;;  %v8433_v35 = vsel %vm595_vm2, %v9190_v46, %v4932_v5  ;;  %v4928_v32 = vunpack.i.h.bf16 %v9192_v59  ;;  %v4927_v28 = vunpack.i.l.bf16 %v9192_v59 }
 0x22e   : > { %v8442_v4 = vsel %vm595_vm2, %v9193_v27, %v5193_v55  ;;  %v8446_v61 = vsel %vm595_vm2, %v9194_v56, %v5192_v60  ;;  %v5223_v9 = vunpack.i.h.bf16 %v8316_v12  ;;  %v5222_v36 = vunpack.i.l.bf16 %v8316_v12  ;;  %v9198_v27 = vld [vmem:[#allocation37_spill] sm:$0xff] }
 0x22f   : > { %v8362_v63 = vpop.permute.xlu0 %5235  ;;  %v8369_v52 = vpop.permute.xlu1 %5240  ;;  %v5218_v15 = vunpack.i.h.bf16 %v8313_v31  ;;  %v5217_v18 = vunpack.i.l.bf16 %v8313_v31  ;;  %v5208_v44 = vunpack.i.h.bf16 %v8309_v26  ;;  %v5213_v5 = vunpack.i.h.bf16 %v8311_v42 }
 0x230   : > { %v5242_v48 = vunpack.i.l.bf16 %v8369_v52  ;;  %v3724_v55 = vsel %vm597_vm3, %v3723_v58, %v5223_v9  ;;  %v5243_v9 = vunpack.i.h.bf16 %v8369_v52 }
 0x231   : > { %v2835_v56 = vsel %vm595_vm2, %v9198_v27, %v5217_v18 }
 0x232   : > { %v2836_v20 = vsel %vm597_vm3, %v2835_v56, %v5242_v48 }
 0x233   : > { %v8383_v6 = vpop.permute.xlu0 %5245  ;;  %v8386_v57 = vpop.permute.xlu1 %5250 }
 0x234   : > { %v5248_v21 = vunpack.i.h.bf16 %v8383_v6  ;;  %v5252_v60 = vunpack.i.l.bf16 %v8386_v57 }
 0x236   : > { %v3725_v45 = vsel %vm599_vm4, %v3724_v55, %v5248_v21  ;;  %v9200_v55 = vld [vmem:[#allocation62_spill] sm:$0xff] }
 0x237   : > { %v4062_v8 = vpop.permute.xlu0 %4061  ;;  %v8405_v22 = vpop.permute.xlu1 %5255  ;;  %v3283_v18 = vsel %vm595_vm2, %v9200_v55, %v5252_v60  ;;  %v5212_v55 = vunpack.i.l.bf16 %v8311_v42 }
 0x238   : > { %v4150_v49 = vsel %vm599_vm4, %v4149_v14, %v4062_v8  ;;  %v9196_v14 = vld [vmem:[#allocation73_spill] sm:$0xff] }
 0x239   : > { %4781 = vmatpush1.msk.msra.mxu0 %vm4268_vm5, %v4150_v49  ;;  %v2838_v8 = vsel %vm595_vm2, %v9196_v14, %v5202_v37  ;;  %v5238_v49 = vunpack.i.h.bf16 %v8362_v63  ;;  %v9197_v37 = vld [vmem:[#allocation39_spill] sm:$0xff] }
 0x23a   : > { %4815 = vmatprep.subr.bf16.mxu0 %v4814_v47  ;;  %4782 = vmatmul.mubr.msk.f32.vlgmr.msra.gmra.mrb[0].mxu0 %vm4308_vm6, %v8403_v25  ;;  %v5247_v47 = vunpack.i.l.bf16 %v8383_v6  ;;  %v2839_v6 = vsel %vm597_vm3, %v2838_v8, %v5222_v36 }
 0x23b   : > { %v8412_v3 = vpop.permute.xlu0 %5260  ;;  %4817 = vmatpush1.bf16.msra.mxu0 %v4816_v16  ;;  %4542 = vmatprep.mubr.f32.mxu0 %v8906_v43  ;;  %v8415_v29 = vpop.permute.xlu1 %5265  ;;  %v5207_v16 = vunpack.i.l.bf16 %v8309_v26  ;;  %v3720_v26 = vsel %vm595_vm2, %v9197_v37, %v5218_v15  ;;  %v2398_v58 = vsel %vm595_vm2, %v9199_v17, %v5238_v49  ;;  %v4257_v37 = vrot.slane %v3725_v45, 4 }
 0x23c   : > { %v5263_v12 = vunpack.i.h.bf16 %v8412_v3  ;;  %v2840_v14 = vsel %vm599_vm4, %v2839_v6, %v5247_v47  ;;  %v5268_v48 = vunpack.i.h.bf16 %v8415_v29 }
 0x23d   : > { %v4233_v47 = vrot.slane %v2840_v14, 4 }
 0x23e   : > { %v2399_v36 = vsel %vm597_vm3, %v2398_v58, %v5263_v12  ;;  %v5267_v12 = vunpack.i.l.bf16 %v8415_v29  ;;  %v9201_v29 = vld [vmem:[#allocation56_spill] sm:$0xff] }
 0x23f   : > { %v8419_v51 = vpop.permute.xlu0 %5270 }
 0x240   : > { %v8423_v7 = vpop.permute.xlu1 %5275  ;;  %v5273_v15 = vunpack.i.h.bf16 %v8419_v51  ;;  %v5272_v21 = vunpack.i.l.bf16 %v8419_v51  ;;  %v3721_v51 = vsel %vm597_vm3, %v3720_v26, %v5243_v9 }
 0x241   : > { %v5277_v46 = vunpack.i.l.bf16 %v8423_v7 }
 0x242   : > { %v2837_v45 = vsel %vm599_vm4, %v2836_v20, %v5272_v21  ;;  %v9204_v21 = vld [vmem:[#allocation49_spill] sm:$0xff] }
 0x243   : > { %v8437_v13 = vpop.permute.xlu0 %4089  ;;  %v3284_v6 = vsel %vm597_vm3, %v3283_v18, %v5277_v46  ;;  %v1961_v46 = vsel %vm595_vm2, %v9201_v29, %v5208_v44  ;;  %v9202_v18 = vld [vmem:[#allocation41_spill] sm:$0xff]  ;;  %v1965_v44 = vsel %vm597_vm3, %v8442_v4, %v5213_v5  ;;  %v5233_v4 = vunpack.i.h.bf16 %v8345_v33 }
 0x244   : > { %v1072_v26 = vsel %vm595_vm2, %v9202_v18, %v5207_v16  ;;  %v5227_v16 = vunpack.i.l.bf16 %v8339_v50  ;;  %v5237_v5 = vunpack.i.l.bf16 %v8362_v63  ;;  %v1076_v18 = vsel %vm597_vm3, %v8446_v61, %v5212_v55 }
 0x245   : > { %v8449_v54 = vpop.permute.xlu1 %5280  ;;  %v4157_v63 = vsel %vm595_vm2, %v7777_v11, %v8437_v13  ;;  %v4937_v13 = vunpack.i.l.bf16 %v9191_v41 }
 0x246   : > { %v5283_v31 = vunpack.i.h.bf16 %v8449_v54 }
 0x247   : > { %v5286_v53 = vpop.permute.xlu0 %5285 }
 0x248   : > { %v2400_v52 = vsel %vm599_vm4, %v2399_v36, %v5283_v31  ;;  %v5288_v56 = vunpack.i.h.bf16 %v5286_v53  ;;  %v5287_v17 = vunpack.i.l.bf16 %v5286_v53  ;;  %v3722_v31 = vsel %vm599_vm4, %v3721_v51, %v5273_v15 }
 0x249   : > { %v8469_v19 = vpop.permute.xlu1 %5290  ;;  %v4290_v36 = vsel %vm4268_vm5, %v2400_v52, %v4233_v47  ;;  %v2395_v15 = vsel %vm595_vm2, %v9204_v21, %v5267_v12  ;;  %v4232_v47 = vrot.slane %v2837_v45, 4  ;;  %v5232_v12 = vunpack.i.l.bf16 %v8345_v33 }
 0x24a   : > { %v2396_v51 = vsel %vm597_vm3, %v2395_v15, %v5287_v17  ;;  %v5228_v45 = vunpack.i.h.bf16 %v8339_v50  ;;  %v5258_v50 = vunpack.i.h.bf16 %v8405_v22  ;;  %v5282_v33 = vunpack.i.l.bf16 %v8449_v54 }
 0x24b   : > { %v8486_v8 = vpop.permute.xlu0 %5295  ;;  %v1077_v61 = vsel %vm599_vm4, %v1076_v18, %v5232_v12 }
 0x24c   : > { %v5297_v49 = vunpack.i.l.bf16 %v8486_v8 }
 0x24d   : > { %v8491_v27 = vpop.permute.xlu1 %4077 }
 0x24e   : > { %v3285_v60 = vsel %vm599_vm4, %v3284_v6, %v5297_v49  ;;  %v9203_v49 = vld [vmem:[#allocation68_spill] sm:$0xff]  ;;  %v4154_v59 = vsel %vm595_vm2, %v7875_v10, %v8491_v27 }
 0x24f   : > { %v4094_v58 = vpop.permute.xlu0 %4093  ;;  %v4298_v14 = vsel %vm4268_vm5, %v3285_v60, %v4257_v37  ;;  %v3280_v20 = vsel %vm595_vm2, %v9203_v49, %v5268_v48  ;;  %v4256_v37 = vrot.slane %v3722_v31, 4  ;;  %v1073_v49 = vsel %vm597_vm3, %v1072_v26, %v5227_v16 }
 0x250   : > { %v4818_v9 = vpack.c.bf16 %v4298_v14, %v4290_v36  ;;  %v3281_v42 = vsel %vm597_vm3, %v3280_v20, %v5288_v56  ;;  %v5257_v14 = vunpack.i.l.bf16 %v8405_v22  ;;  %v5278_v20 = vunpack.i.h.bf16 %v8423_v7  ;;  %v9205_v7 = vld [vmem:[#allocation14_spill] sm:$0xff] }
 0x251   : > { %v5301_v53 = vpop.permute.xlu1 %5300  ;;  %v5298_v22 = vunpack.i.h.bf16 %v8486_v8  ;;  %v1966_v26 = vsel %vm599_vm4, %v1965_v44, %v5233_v4  ;;  %v1515_v54 = vsel %vm595_vm2, %v9205_v7, %v5237_v5  ;;  %v617_v44 = vsel %vm597_vm3, %v8433_v35, %v4927_v28 }
 0x252   : > { %v5303_v6 = vunpack.i.h.bf16 %v5301_v53  ;;  %v5302_v52 = vunpack.i.l.bf16 %v5301_v53  ;;  %4819 = vmatprep.subr.bf16.mxu0 %v4818_v9  ;;  %v5253_v53 = vunpack.i.h.bf16 %v8386_v57  ;;  %v5262_v9 = vunpack.i.l.bf16 %v8412_v3 }
 0x253   : > { %v8519_v36 = vpop.permute.xlu0 %5305  ;;  %v1962_v57 = vsel %vm597_vm3, %v1961_v46, %v5228_v45  ;;  %v4158_v3 = vsel %vm597_vm3, %v4157_v63, %v4094_v58  ;;  %v1074_v15 = vsel %vm599_vm4, %v1073_v49, %v5257_v14  ;;  %v620_v58 = vsel %vm597_vm3, %v8429_v34, %v4928_v32 }
 0x254   : > { %v2397_v60 = vsel %vm599_vm4, %v2396_v51, %v5302_v52  ;;  %v3282_v48 = vsel %vm599_vm4, %v3281_v42, %v5303_v6  ;;  %v9206_v6 = vld [vmem:[#allocation5_spill] sm:$0xff]  ;;  %v1963_v46 = vsel %vm599_vm4, %v1962_v57, %v5258_v50  ;;  %v1516_v8 = vsel %vm597_vm3, %v1515_v54, %v5262_v9 }
 0x255   : > { %v8523_v31 = vpop.permute.xlu1 %5310  ;;  %v4289_v56 = vsel %vm4268_vm5, %v2397_v60, %v4232_v47  ;;  %v4297_v17 = vsel %vm4268_vm5, %v3282_v48, %v4256_v37  ;;  %v1512_v52 = vsel %vm595_vm2, %v9206_v6, %v5253_v53  ;;  %v4187_v47 = vrot.slane %v1077_v61, 4 }
 0x256   : > { %v4820_v29 = vpack.c.bf16 %v4297_v17, %v4289_v56  ;;  %v1513_v37 = vsel %vm597_vm3, %v1512_v52, %v5278_v20  ;;  %v1517_v42 = vsel %vm599_vm4, %v1516_v8, %v5282_v33  ;;  %v4211_v16 = vrot.slane %v1966_v26, 4 }
 0x257   : > { %v4082_v21 = vpop.permute.xlu0 %4081  ;;  %v4186_v60 = vrot.slane %v1074_v15, 4  ;;  %v1514_v48 = vsel %vm599_vm4, %v1513_v37, %v5298_v22  ;;  %v4210_v45 = vrot.slane %v1963_v46, 4  ;;  %v9207_v56 = vunpack.i.h.bf16 %v9191_v41  ;;  %v9208_v46 = vld [vmem:[#allocation34_spill] sm:$0xff] }
 0x258   : > { %4821 = vmatpush1.bf16.msra.mxu0 %v4820_v29  ;;  %v4284_v32 = vsel %vm4268_vm5, %v1517_v42, %v4211_v16  ;;  %v618_v17 = vsel %vm599_vm4, %v617_v44, %v4937_v13  ;;  %v5293_v5 = vunpack.i.h.bf16 %v8469_v19  ;;  %v5292_v14 = vunpack.i.l.bf16 %v8469_v19 }
 0x259   : > { %v4098_v55 = vpop.permute.xlu1 %4097  ;;  %v621_v34 = vsel %vm599_vm4, %v620_v58, %v9207_v56  ;;  %v4283_v28 = vsel %vm4268_vm5, %v1514_v48, %v4210_v45  ;;  %v4155_v41 = vsel %vm597_vm3, %v4154_v59, %v4082_v21  ;;  %v4275_v18 = vsel %vm4268_vm5, %v618_v17, %v4186_v60  ;;  %v9209_v60 = vld [vmem:[#allocation17_spill] sm:$0xff] }
 0x25a   : > { %v4159_v11 = vsel %vm599_vm4, %v4158_v3, %v4098_v55  ;;  %v4276_v35 = vsel %vm4268_vm5, %v621_v34, %v4187_v47  ;;  %v5308_v53 = vunpack.i.h.bf16 %v8519_v36  ;;  %v5307_v50 = vunpack.i.l.bf16 %v8519_v36 }
 0x25b   : > { %4783 = vmatprep.subr.msk.mxu1 %vm4268_vm5, %v4159_v11  ;;  %v5316_v51 = vpop.permute.xlu0 %5315  ;;  %v4822_v27 = vpack.c.bf16 %v4284_v32, %v4276_v35  ;;  %v5313_v9 = vunpack.i.h.bf16 %v8523_v31  ;;  %v5312_v49 = vunpack.i.l.bf16 %v8523_v31  ;;  %v4824_v20 = vpack.c.bf16 %v4283_v28, %v4275_v18 }
 0x25c   : > { %v3729_v36 = vsel %vm595_vm2, %v7826_v1, %v5293_v5  ;;  %v2844_v21 = vsel %vm595_vm2, %v7843_v62, %v5292_v14  ;;  %v3726_v31 = vsel %vm595_vm2, %v7884_v30, %v5308_v53  ;;  %v2841_v57 = vsel %vm595_vm2, %v7895_v0, %v5307_v50 }
 0x25d   : > { %v5321_v12 = vpop.permute.xlu1 %5320  ;;  %v5318_v22 = vunpack.i.h.bf16 %v5316_v51  ;;  %v5317_v3 = vunpack.i.l.bf16 %v5316_v51  ;;  %v2845_v55 = vsel %vm597_vm3, %v2844_v21, %v5312_v49  ;;  %v3730_v26 = vsel %vm597_vm3, %v3729_v36, %v5313_v9 }
 0x25e   : > { %v5323_v1 = vunpack.i.h.bf16 %v5321_v12  ;;  %v5322_v7 = vunpack.i.l.bf16 %v5321_v12 }
 0x25f   : > { %v5326_v4 = vpop.permute.xlu0 %5325  ;;  %v3289_v8 = vsel %vm595_vm2, %v9208_v46, %v5318_v22  ;;  %v2404_v58 = vsel %vm595_vm2, %v7936_v23, %v5317_v3 }
 0x260   : > { %v5328_v19 = vunpack.i.h.bf16 %v5326_v4  ;;  %v5327_v33 = vunpack.i.l.bf16 %v5326_v4  ;;  %v2842_v42 = vsel %vm597_vm3, %v2841_v57, %v5322_v7  ;;  %v3727_v51 = vsel %vm597_vm3, %v3726_v31, %v5323_v1 }
 0x261   : > { %v4086_v29 = vpop.permute.xlu1 %4085 }
 0x262   : > { %v4156_v10 = vsel %vm599_vm4, %v4155_v41, %v4086_v29  ;;  %v3731_v62 = vsel %vm599_vm4, %v3730_v26, %v5328_v19  ;;  %v2846_v54 = vsel %vm599_vm4, %v2845_v55, %v5327_v33 }
 0x263   : > { %4784 = vmatpush1.msk.msra.mxu1 %vm4268_vm5, %v4156_v10  ;;  %v4259_v44 = vrot.slane %v3731_v62, 4  ;;  %v4235_v16 = vrot.slane %v2846_v54, 4 }
 0x264   : > { %4823 = vmatprep.subr.bf16.mxu1 %v4822_v27  ;;  %v5331_v63 = vpop.permute.xlu0 %5330  ;;  %4785 = vmatmul.mubr.msk.f32.vlgmr.msra.gmra.mrb[0].mxu1 %vm4308_vm6, %v8403_v25 }
 0x265   : > { %v5336_v61 = vpop.permute.xlu1 %5335  ;;  %4825 = vmatpush1.bf16.msra.mxu1 %v4824_v20  ;;  %4613 = vmatprep.mubr.f32.mxu1 %v8906_v43  ;;  %v5333_v15 = vunpack.i.h.bf16 %v5331_v63  ;;  %v5332_v43 = vunpack.i.l.bf16 %v5331_v63 }
 0x266   : > { %v5338_v13 = vunpack.i.h.bf16 %v5336_v61  ;;  %v5337_v30 = vunpack.i.l.bf16 %v5336_v61 }
 0x267   : > { %v3286_v48 = vsel %vm595_vm2, %v9209_v60, %v5333_v15  ;;  %v2401_v12 = vsel %vm595_vm2, %v7952_v39, %v5332_v43 }
 0x268   : > { %v5341_v11 = vpop.permute.xlu0 %5340  ;;  %v2405_v23 = vsel %vm597_vm3, %v2404_v58, %v5337_v30  ;;  %v3290_v32 = vsel %vm597_vm3, %v3289_v8, %v5338_v13 }
 0x269   : > { %v5346_v6 = vpop.permute.xlu1 %5345  ;;  %v5343_v52 = vunpack.i.h.bf16 %v5341_v11  ;;  %v5342_v0 = vunpack.i.l.bf16 %v5341_v11 }
 0x26a   : > { %v5348_v47 = vunpack.i.h.bf16 %v5346_v6  ;;  %v5347_v37 = vunpack.i.l.bf16 %v5346_v6 }
 0x26b   : > { %v2843_v45 = vsel %vm599_vm4, %v2842_v42, %v5342_v0  ;;  %v3728_v56 = vsel %vm599_vm4, %v3727_v51, %v5343_v52 }
 0x26c   : > { %v5351_v34 = vpop.permute.xlu0 %5350  ;;  %v2402_v35 = vsel %vm597_vm3, %v2401_v12, %v5347_v37  ;;  %v3287_v28 = vsel %vm597_vm3, %v3286_v48, %v5348_v47  ;;  %v4234_v41 = vrot.slane %v2843_v45, 4  ;;  %v4258_v39 = vrot.slane %v3728_v56, 4 }
 0x26d   : > { %v5356_v17 = vpop.permute.xlu1 %5355  ;;  %v5353_v59 = vunpack.i.h.bf16 %v5351_v34  ;;  %v5352_v4 = vunpack.i.l.bf16 %v5351_v34 }
 0x26e   : > { %v5358_v5 = vunpack.i.h.bf16 %v5356_v17  ;;  %v5357_v14 = vunpack.i.l.bf16 %v5356_v17 }
 0x26f   : > { %v2406_v29 = vsel %vm599_vm4, %v2405_v23, %v5352_v4  ;;  %v3291_v18 = vsel %vm599_vm4, %v3290_v32, %v5353_v59 }
 0x270   : > { %v2403_v53 = vsel %vm599_vm4, %v2402_v35, %v5357_v14  ;;  %v3288_v50 = vsel %vm599_vm4, %v3287_v28, %v5358_v5  ;;  %v4114_v10 = vpop.permute.xlu0 %4113  ;;  %v4292_v27 = vsel %vm4268_vm5, %v2406_v29, %v4235_v16  ;;  %v4300_v9 = vsel %vm4268_vm5, %v3291_v18, %v4259_v44 }
 0x271   : > { %v4102_v49 = vpop.permute.xlu1 %4101  ;;  %v4826_v20 = vpack.c.bf16 %v4300_v9, %v4292_v27  ;;  %v4291_v19 = vsel %vm4268_vm5, %v2403_v53, %v4234_v41  ;;  %v4299_v33 = vsel %vm4268_vm5, %v3288_v50, %v4258_v39  ;;  %v4163_v61 = vsel %vm595_vm2, %v8170_v38, %v4114_v10 }
 0x272   : > { %v4828_v63 = vpack.c.bf16 %v4299_v33, %v4291_v19  ;;  %v4160_v31 = vsel %vm595_vm2, %v8180_v2, %v4102_v49 }
 0x273   : > { %4827 = vmatprep.subr.bf16.mxu1 %v4826_v20 }
 0x274   : > { %v4118_v36 = vpop.permute.xlu0 %4117  ;;  %4829 = vmatpush1.bf16.msra.mxu1 %v4828_v63 }
 0x275   : > { %v4106_v21 = vpop.permute.xlu1 %4105  ;;  %v4164_v57 = vsel %vm597_vm3, %v4163_v61, %v4118_v36 }
 0x276   : > { %v4161_v3 = vsel %vm597_vm3, %v4160_v31, %v4106_v21 }
 0x278   : > { %v4122_v22 = vpop.permute.xlu0 %4121 }
 0x279   : > { %v4110_v55 = vpop.permute.xlu1 %4109  ;;  %v4165_v26 = vsel %vm599_vm4, %v4164_v57, %v4122_v22 }
 0x27a   : > { %v4162_v1 = vsel %vm599_vm4, %v4161_v3, %v4110_v55  ;;  %4786 = vmatprep.subr.msk.mxu0 %vm4268_vm5, %v4165_v26 }
 0x27b   : > { %4787 = vmatpush1.msk.msra.mxu0 %vm4268_vm5, %v4162_v1 }
 0x27c   : > { %v4138_v7 = vpop.permute.xlu0 %4137  ;;  %4788 = vmatmul.mubr.msk.f32.vlgmr.msra.gmra.mrb[2].mxu0 %vm4308_vm6, %v8403_v25 }
 0x27d   : > { %v4126_v38 = vpop.permute.xlu1 %4125  ;;  %v4169_v54 = vsel %vm595_vm2, %v8210_v40, %v4138_v7 }
 0x27e   : > { %v4166_v15 = vsel %vm595_vm2, %v8226_v24, %v4126_v38 }
 0x280   : > { %v4142_v2 = vpop.permute.xlu0 %4141 }
 0x281   : > { %v4130_v62 = vpop.permute.xlu1 %4129  ;;  %v4170_v43 = vsel %vm597_vm3, %v4169_v54, %v4142_v2 }
 0x282   : > { %v4167_v13 = vsel %vm597_vm3, %v4166_v15, %v4130_v62 }
 0x284   : > { %v4146_v11 = vpop.permute.xlu0 %4145 }
 0x285   : > { %v4134_v30 = vpop.permute.xlu1 %4133  ;;  %v4171_v6 = vsel %vm599_vm4, %v4170_v43, %v4146_v11 }
 0x286   : > { %v4168_v52 = vsel %vm599_vm4, %v4167_v13, %v4134_v30  ;;  %4789 = vmatprep.subr.msk.mxu1 %vm4268_vm5, %v4171_v6 }
 0x287   : > { %4790 = vmatpush1.msk.msra.mxu1 %vm4268_vm5, %v4168_v52 }
 0x288   : > { %4791 = vmatmul.mubr.msk.f32.vlgmr.msra.gmra.mrb[2].mxu1 %vm4308_vm6, %v8403_v25 }
 0x295   : > { %v4306_v40 = vpop.permute.xlu0 %4305 }
 0x30d   : > { %v4402_v24 = vpop.f32.mrb[0].mxu0 }
 0x30e   : > { %v4403_v0 = vadd.f32 %v4402_v24, %v4306_v40  ;;  %v4404_v46 = vpop.f32.mrb[1].mxu0 }
 0x30f   : > { %v4405_v8 = vadd.f32 %v4404_v46, %v4306_v40 }
 0x310   : > { %4620 = vst [vmem:[%s8653_s23] sm:$0xff] %v4403_v0 }
 0x311   : > { %4621 = vst [vmem:[%s8653_s23 + $0x8] sm:$0xff] %v4405_v8  ;;  %v4628_v42 = vadd.f32 %v4405_v8, %v4403_v0 }
 0x337   : > { %v4473_v58 = vpop.f32.mrb[0].mxu1 }
 0x338   : > { %v4474_v25 = vadd.f32 %v4473_v58, %v4306_v40  ;;  %v4475_v47 = vpop.f32.mrb[1].mxu1 }
 0x339   : > { %v4476_v37 = vadd.f32 %v4475_v47, %v4306_v40 }
 0x33a   : > { %4622 = vst [vmem:[%s8653_s23 + $0x10] sm:$0xff] %v4474_v25  ;;  %v4629_v44 = vadd.f32 %v4628_v42, %v4474_v25 }
 0x33b   : > { %4623 = vst [vmem:[%s8653_s23 + $0x18] sm:$0xff] %v4476_v37 }
 0x33c   : > { %v4630_v12 = vadd.f32 %v4629_v44, %v4476_v37 }
 0x34f   : > { %v4544_v51 = vpop.f32.mrb[2].mxu0 }
 0x350   : > { %v4545_v16 = vadd.f32 %v4544_v51, %v4306_v40  ;;  %v4546_v60 = vpop.f32.mrb[3].mxu0 }
 0x351   : > { %v4547_v48 = vadd.f32 %v4546_v60, %v4306_v40 }
 0x352   : > { %4624 = vst [vmem:[%s8653_s23 + $0x20] sm:$0xff] %v4545_v16  ;;  %v4631_v45 = vadd.f32 %v4630_v12, %v4545_v16 }
 0x353   : > { %4625 = vst [vmem:[%s8653_s23 + $0x28] sm:$0xff] %v4547_v48 }
 0x354   : > { %v4632_v34 = vadd.f32 %v4631_v45, %v4547_v48 }
 0x35b   : > { %v4615_v56 = vpop.f32.mrb[2].mxu1 }
 0x35c   : > { %v4616_v23 = vadd.f32 %v4615_v56, %v4306_v40  ;;  %v4617_v32 = vpop.f32.mrb[3].mxu1 }
 0x35d   : > { %v4618_v17 = vadd.f32 %v4617_v32, %v4306_v40 }
 0x35e   : > { %4626 = vst [vmem:[%s8653_s23 + $0x30] sm:$0xff] %v4616_v23  ;;  %v4633_v59 = vadd.f32 %v4632_v34, %v4616_v23 }
 0x35f   : > { %4627 = vst [vmem:[%s8653_s23 + $0x38] sm:$0xff] %v4618_v17 }
 0x360   : > { %v4634_v4 = vadd.f32 %v4633_v59, %v4618_v17 }
 0x362   : > { %4635 = vadd.xlane.f32.xlu1 %v4634_v4 }
 0x3ef   : > { %v4636_v35 = vpop.xlane.xlu1 %4635 }
 0x3f0   : > { %v4638_v28 = vmul.f32 0.0009765625, %v4636_v35 }
 0x3f2   : > { %v4639_v5 = vsub.f32 %v4403_v0, %v4638_v28  ;;  %v4640_v14 = vsub.f32 %v4405_v8, %v4638_v28  ;;  %v4641_v41 = vsub.f32 %v4474_v25, %v4638_v28  ;;  %4665 = vst.msk [vmem:[%s8667_s5] sm:$0xff] %vm4664_vm7, %v4638_v28  ;;  %v4642_v39 = vsub.f32 %v4476_v37, %v4638_v28 }
 0x3f3   : > { %v4643_v53 = vsub.f32 %v4545_v16, %v4638_v28  ;;  %v4644_v27 = vsub.f32 %v4547_v48, %v4638_v28  ;;  %v4645_v20 = vsub.f32 %v4616_v23, %v4638_v28  ;;  %v4646_v63 = vsub.f32 %v4618_v17, %v4638_v28 }
 0x3f4   : > { %v4647_v29 = vmul.f32 %v4639_v5, %v4639_v5  ;;  %v4648_v18 = vmul.f32 %v4640_v14, %v4640_v14  ;;  %v4649_v50 = vmul.f32 %v4641_v41, %v4641_v41  ;;  %v4650_v9 = vmul.f32 %v4642_v39, %v4642_v39 }
 0x3f5   : > { %v4651_v19 = vmul.f32 %v4643_v53, %v4643_v53  ;;  %v4652_v36 = vmul.f32 %v4644_v27, %v4644_v27  ;;  %v4653_v61 = vmul.f32 %v4645_v20, %v4645_v20  ;;  %v4654_v57 = vmul.f32 %v4646_v63, %v4646_v63 }
 0x3f6   : > { %v4655_v10 = vadd.f32 %v4648_v18, %v4647_v29 }
 0x3f8   : > { %v4656_v49 = vadd.f32 %v4655_v10, %v4649_v50 }
 0x3fa   : > { %v4657_v33 = vadd.f32 %v4656_v49, %v4650_v9 }
 0x3fc   : > { %v4658_v21 = vadd.f32 %v4657_v33, %v4651_v19 }
 0x3fe   : > { %v4659_v31 = vadd.f32 %v4658_v21, %v4652_v36 }
 0x400   : > { %v4660_v22 = vadd.f32 %v4659_v31, %v4653_v61 }
 0x402   : > { %v4661_v3 = vadd.f32 %v4660_v22, %v4654_v57 }
 0x404   : > { %4662 = vadd.xlane.f32.xlu0 %v4661_v3 }
 0x405   : > { %5389 = shalt.err (!%p5386_p3)
}
 0x406   : > { %s5390_s19 = scalar_lea.hbm %s8675_s9, 1024  ;;  %s5394_s23 = scalar_lea.hbm %s8717_s3, 2048 }
 0x407   : > { %p5391_p4 = scmp.ne.s32.totalorder %s8675_s9, %s5390_s19  ;;  %p5395_p9 = scmp.lt.u32.totalorder %s8675_s9, %s8717_s3 }
 0x408   : > { %p5396_p10 = scmp.lt.u32.totalorder %s5394_s23, %s5390_s19  ;;  %p5398_p12 = scmp.lt.u32.totalorder %s5390_s19, %s8675_s9 }
 0x409   : > { %p5392_p7 = pnand %p5391_p4, %p5513_p5 }
 0x40a   : > { %p5397_p11 = por %p5396_p10, %p5395_p9 }
 0x40b   : > { %p5393_p8 = pneg %p5392_p7 }
 0x40c   : > { %p5399_p13 = por %p5398_p12, %p5397_p11 }
 0x40e   : > { %p5400_p0 = pnand %p5399_p13, %p5393_p8 }
 0x410   : > { %5403 = shalt.err (!%p5400_p0)
}
 0x411   : > { %4831 = dma.vmem_to_hbm [thread:$0]  (%p5513_p5), %s4688_s6, 1024, %s8675_s9, %s4669_s10   ;;  %vm4666_vm8 = vcmask 15368  }
 0x491   : > { %v4663_v55 = vpop.xlane.xlu0 %4662 }
 0x492   : > { %4667 = vst.msk [vmem:[%s8667_s5] sm:$0xff] %vm4666_vm8, %v4663_v55 }
 0x493 PF: > { %p4837_p1 = scmp.ge.s32.totalorder %s5438_s18, 2  ;;  %s4702_s30 = sand.u32 1, %s5426_s15  }
 0x494   : > { %s4703_s27 = scalar_lea.sflag [#allocation3], %s4702_s30 }
 0x495   : > { %p4834_p2 = pnand %p4837_p1, %p5517_p6 }
 0x497   : > { %5421 = dma.done.wait (!%p4834_p2), %s4703_s27, 1024  }
 0x498   : > { %5423 = vsyncadd (!%p4834_p2), %s4703_s27, 4294966272  ;;  %p15_p5 = scmp.ge.s32.totalorder %s5500_s21, 4   ;;  %s9210_s15 = smov %s5430_s16 }
 0x499   : > { %s9211_s16 = smov %s5434_s17  ;;  %s9212_s17 = smov %s5511_s24 }
 0x49a   : > { %s9213_s18 = smov %s5500_s21  ;;  %17 = sbr.rel (!%p15_p5) target bundleno = 3 (0x3), region = 79 }
 0x4a1   :  { %4715 = vsyncpa [#allocation3], 1 }
 0x4a2   :  { %4717 = vsyncpa [#allocation3 + $0x1], 1 }

</bundles_post_ra>
